<compile_context>
chip_gen: v7x
topology: tpu7x:2x2x1
jax: 0.10.0
libtpu: 0.0.40
codegen_flags: <defaults>
</compile_context>

<pallas_src>
import math
import functools
from dataclasses import dataclass

import numpy as np
import jax
import jax.numpy as jnp
from jax.experimental import pallas as pl
from jax.experimental.pallas import tpu as pltpu


# ----------------------------- config ---------------------------------------

@dataclass
class ModelArgs:
    d_model: int
    n_layer: int
    vocab_size: int
    d_state: int = 16
    expand: int = 2
    dt_rank: int = -1           # -1 == 'auto'
    d_conv: int = 4
    pad_vocab_size_multiple: int = 8
    conv_bias: bool = True
    bias: bool = False

    def __post_init__(self):
        self.d_inner = int(self.expand * self.d_model)
        if self.dt_rank == -1:
            self.dt_rank = math.ceil(self.d_model / 16)
        if self.vocab_size % self.pad_vocab_size_multiple != 0:
            self.vocab_size += (self.pad_vocab_size_multiple
                                - self.vocab_size % self.pad_vocab_size_multiple)


_HAS_BUFFERED = hasattr(pl, "Buffered")


# ----------------------------- small utilities -------------------------------

def _vmem_limit_bytes(need_bytes):
    """Per-generation VMEM limit hint (v5e/v6e: 128 MiB, v7x: 64 MiB per core)."""
    try:
        cap = int(pltpu.get_tpu_info().vmem_capacity_bytes)
    except Exception:
        cap = 64 * 1024 * 1024                       # conservative default
    ceiling = (cap // 8) * 7                         # leave ~12% headroom
    want = max(int(need_bytes) + (8 << 20), 32 << 20)
    return int(min(want, ceiling))


def _pick_seq_chunk(L, cap=256):
    """Largest seq chunk <= cap that divides L (prefer multiples of 16 for bf16)."""
    for c in range(min(cap, L), 0, -1):
        if L % c == 0 and c % 16 == 0:
            return c
    for c in range(min(cap, L), 0, -1):
        if L % c == 0 and c % 8 == 0:
            return c
    return L


_ROLL_MODE = None


def _probe_roll_mode():
    """+1 if pltpu.roll matches jnp.roll on the sublane axis, -1 if reversed,
    0 if it does not lower here (-> use the scratch-window conv path)."""
    def k(x_ref, o_ref):
        o_ref[...] = pltpu.roll(x_ref[...], shift=3, axis=0)
    try:
        x = jnp.arange(16 * 128, dtype=jnp.float32).reshape(16, 128)
        y = pl.pallas_call(
            k, out_shape=jax.ShapeDtypeStruct((16, 128), jnp.float32))(x)
        y = np.asarray(jax.block_until_ready(y))
        xn = np.asarray(x)
        if np.array_equal(y, np.roll(xn, 3, axis=0)):
            return 1
        if np.array_equal(y, np.roll(xn, -3, axis=0)):
            return -1
        return 0
    except Exception:
        return 0


def _roll_mode():
    global _ROLL_MODE
    if _ROLL_MODE is None:
        _ROLL_MODE = _probe_roll_mode()
    return _ROLL_MODE


# ----------------------------- Pallas kernels --------------------------------

def mamba_block_kernel(x_ref, norm_w_ref, w_in_x_ref, w_in_res_ref,
                       conv_w_ref, conv_b_ref, w_dtlow_ref, w_bc_ref,
                       w_dt_ref, dt_b_ref, neg_a_t_ref, d_ref, w_out_ref,
                       o_ref,
                       s_scr, conv_scr, delta_scr, u_scr, bcT_scr, y_scr,
                       *, conv_roll_sign):
    """One ResidualBlock (RMSNorm + MambaBlock + residual) for one (batch, seq-chunk)."""
    chunk = pl.program_id(1)
    T = x_ref.shape[1]                        # chunk length (multiple of 8)
    d_inner = d_ref.shape[1]
    n = neg_a_t_ref.shape[0]                  # d_state
    K = conv_w_ref.shape[0]                   # d_conv
    n_groups = T // 8
    PAD = 8                                   # sublane-aligned conv left context

    # ---- reset carried state at the start of each batch row -----------------
    @pl.when(chunk == 0)
    def _init():
        s_scr[...] = jnp.zeros_like(s_scr)
        conv_scr[...] = jnp.zeros_like(conv_scr)

    x_in = x_ref[0].astype(jnp.float32)                            # (T, Dm)

    # ---- RMSNorm (f32) -------------------------------------------------------
    ms = jnp.mean(x_in * x_in, axis=-1, keepdims=True)
    xn = (x_in * jax.lax.rsqrt(ms + 1e-5) * norm_w_ref[...]).astype(jnp.bfloat16)

    # ---- in_proj: x / res halves (bf16 MXU, f32 accumulation) ----------------
    xc = jnp.dot(xn, w_in_x_ref[...], preferred_element_type=jnp.float32)
    res = jnp.dot(xn, w_in_res_ref[...], preferred_element_type=jnp.float32)

    # ---- causal depthwise conv1d --------------------------------------------
    if conv_roll_sign != 0:
        # roll-based path: xc stays in registers; only the K-1 carry rows
        # round-trip VMEM (carry read is one (T, d_inner) load).
        carry = conv_scr[pl.ds(PAD, T), :]              # rows T-(K-1).. = prev tail
        row_idx = jax.lax.broadcasted_iota(jnp.int32, (T, d_inner), 0)
        acc = conv_w_ref[K - 1:K, :] * xc + conv_b_ref[...]
        for sh in range(1, K):
            xc_mod = jnp.where(row_idx >= T - sh, carry, xc)
            amt = sh if conv_roll_sign == 1 else T - sh
            acc = acc + conv_w_ref[K - 1 - sh:K - sh, :] * pltpu.roll(
                xc_mod, shift=amt, axis=0)
        conv_scr[pl.ds(PAD + T - 8, 8), :] = xc[T - 8:, :]   # carry for next chunk
    else:
        # fallback: padded scratch window (proven path).
        conv_scr[pl.ds(PAD, T), :] = xc
        acc = conv_b_ref[...] + jnp.zeros((T, d_inner), jnp.float32)
        for k in range(K):
            acc = acc + conv_w_ref[k:k + 1, :] * conv_scr[pl.ds(PAD - (K - 1) + k, T), :]
        conv_scr[pl.ds(PAD - (K - 1), K - 1), :] = xc[T - (K - 1):, :]

    u = acc * jax.nn.sigmoid(acc)                               # SiLU
    u_bf = u.astype(jnp.bfloat16)

    # ---- x_proj / dt_proj / softplus -----------------------------------------
    # delta_low in (T, r_pad) row layout; B^T / C^T produced directly in (2n, T)
    # layout by ONE transposed matmul (no per-step transposes on the MXU path).
    dlt_low = jnp.dot(u_bf, w_dtlow_ref[...], preferred_element_type=jnp.float32)
    bc_t = jax.lax.dot_general(w_bc_ref[...], u_bf,
                               dimension_numbers=(((1,), (1,)), ((), ())),
                               preferred_element_type=jnp.float32)      # (2n, T)
    z = jnp.dot(dlt_low.astype(jnp.bfloat16), w_dt_ref[...],
                preferred_element_type=jnp.float32) + dt_b_ref[...]
    # TODO(synk): manual softplus; matches jax.nn.softplus within tolerance.
    delta = jnp.where(z > 20.0, z, jnp.log1p(jnp.exp(jnp.minimum(z, 20.0))))

    # Stage per-timestep operands in VMEM so the fori_loop can slice them with
    # dynamic (group) offsets.
    delta_scr[...] = delta
    u_scr[...] = u
    for g in range(n_groups):
        bcT_scr[g] = bc_t[:, g * 8:(g + 1) * 8]                  # (2n, 8) per group

    neg_a_t = neg_a_t_ref[...]                                   # (n, d_inner)
    onehot = [(jax.lax.broadcasted_iota(jnp.int32, (8, 1), 0) == j).astype(jnp.float32)
              for j in range(8)]                                 # static masks

    # ---- selective scan: fori_loop over 8-step groups, inner 8 steps unrolled --
    def group_body(g, s):
        base = pl.multiple_of(g * 8, 8)
        delta_g = delta_scr[pl.ds(base, 8), :]                   # (8, d_inner)
        du_g = delta_g * u_scr[pl.ds(base, 8), :]
        bcT_g = bcT_scr[g]                                       # (2n, 8)
        # deltaA / deltaB*u are independent of the recurrence -> pipeline ahead.
        da = [jnp.exp(delta_g[j:j + 1, :] * neg_a_t) for j in range(8)]
        dbu = [bcT_g[:n, j:j + 1] * du_g[j:j + 1, :] for j in range(8)]
        y_blk = jnp.zeros((8, d_inner), jnp.float32)
        for j in range(8):
            s = da[j] * s + dbu[j]                               # (n, d_inner) VPU
            y_j = jnp.sum(bcT_g[n:, j:j + 1] * s, axis=0, keepdims=True)
            y_blk = y_blk + onehot[j] * y_j                      # mul+add scatter
        y_scr[pl.ds(base, 8), :] = y_blk
        return s

    s_scr[...] = jax.lax.fori_loop(0, n_groups, group_body, s_scr[...])

    # ---- skip term, gating, out_proj, residual --------------------------------
    y = y_scr[...] + u_scr[...] * d_ref[...]
    y = y * (res * jax.nn.sigmoid(res))
    out = jnp.dot(y.astype(jnp.bfloat16), w_out_ref[...],
                  preferred_element_type=jnp.float32)
    o_ref[0] = (out + x_in).astype(o_ref.dtype)


def rmsnorm_kernel(x_ref, w_ref, o_ref):
    """Final RMSNorm (hoisted out of the per-vocab-tile lm_head body)."""
    x = x_ref[0].astype(jnp.float32)
    ms = jnp.mean(x * x, axis=-1, keepdims=True)
    o_ref[0] = (x * jax.lax.rsqrt(ms + 1e-5) * w_ref[...]).astype(o_ref.dtype)


def lm_head_kernel(x_ref, w_ref, o_ref):
    """Weight-tied lm_head matmul for one (vocab-tile, batch, seq-chunk)."""
    o_ref[0] = jnp.dot(x_ref[0], w_ref[...], preferred_element_type=jnp.float32)


# ----------------------------- wrappers --------------------------------------

def residual_block(x, lp, args, t_c):
    B_, L, Dm = x.shape
    d_in, n, K = args.d_inner, args.d_state, args.d_conv
    r_pad = lp['w_dtlow'].shape[1]
    assert L % t_c == 0 and t_c % 8 == 0
    assert t_c == L or t_c % 16 == 0          # bf16 activation tiling
    grid = (B_, L // t_c)
    kern = functools.partial(mamba_block_kernel, conv_roll_sign=_roll_mode())

    def call(buffer_weights):
        def wspec(shape):
            idx = lambda b, c: (0,) * len(shape)
            if buffer_weights:
                # constant block index -> nothing to pipeline; single-buffer to
                # halve resident weight VMEM (v7x has only 64 MiB).
                return pl.BlockSpec(shape, idx, pipeline_mode=pl.Buffered(1))
            return pl.BlockSpec(shape, idx)

        wfac = 1 if buffer_weights else 2
        wbytes = (2 * (2 * Dm * d_in + 2 * r_pad * d_in + 2 * n * d_in + d_in * Dm)
                  + 4 * (Dm + (K + 4) * d_in + n * d_in))
        scr = 4 * (n * d_in + (8 + t_c) * d_in + 3 * t_c * d_in
                   + (t_c // 8) * 2 * n * 128)
        act = 2 * 2 * 2 * t_c * Dm
        tmp = 4 * 12 * t_c * max(d_in, Dm)
        need = wfac * wbytes + scr + act + tmp

        return pl.pallas_call(
            kern,
            out_shape=jax.ShapeDtypeStruct((B_, L, Dm), jnp.bfloat16),
            grid=grid,
            in_specs=[
                pl.BlockSpec((1, t_c, Dm), lambda b, c: (b, c, 0)),
                wspec((1, Dm)),                # norm_w
                wspec((Dm, d_in)),             # in_proj (x half)
                wspec((Dm, d_in)),             # in_proj (res half)
                wspec((K, d_in)),              # conv weight
                wspec((1, d_in)),              # conv bias
                wspec((d_in, r_pad)),          # x_proj (delta_low, lane-padded)
                wspec((2 * n, d_in)),          # x_proj (B, C part)
                wspec((r_pad, d_in)),          # dt_proj weight (row-padded)
                wspec((1, d_in)),              # dt_proj bias
                wspec((n, d_in)),              # -exp(A_log)^T
                wspec((1, d_in)),              # D
                wspec((d_in, Dm)),             # out_proj
            ],
            out_specs=pl.BlockSpec((1, t_c, Dm), lambda b, c: (b, c, 0)),
            scratch_shapes=[
                pltpu.VMEM((n, d_in), jnp.float32),         # scan state (carried)
                pltpu.VMEM((8 + t_c, d_in), jnp.float32),   # conv carry / window
                pltpu.VMEM((t_c, d_in), jnp.float32),       # delta
                pltpu.VMEM((t_c, d_in), jnp.float32),       # u (post-SiLU)
                pltpu.VMEM((t_c // 8, 2 * n, 8), jnp.float32),  # per-group [B;C]^T
                pltpu.VMEM((t_c, d_in), jnp.float32),       # y
            ],
            compiler_params=pltpu.CompilerParams(
                # NOTE: the seq-chunk axis carries s_scr / conv_scr and MUST stay
                # the innermost, sequential ("arbitrary") axis.
                dimension_semantics=("parallel", "arbitrary"),
                vmem_limit_bytes=_vmem_limit_bytes(need)),
        )(x, lp['norm_w'], lp['w_in_x'], lp['w_in_res'], lp['conv_w'], lp['conv_b'],
          lp['w_dtlow'], lp['w_bc'], lp['w_dt_t'], lp['dt_b'], lp['neg_a_t'],
          lp['d_vec'], lp['w_out_t'])

    if _HAS_BUFFERED:
        try:
            return call(True)
        except Exception:      # pl.Buffered(1) not accepted -> default buffering
            pass
    return call(False)


def final_rmsnorm(x, norm_w, t_c):
    B_, L, Dm = x.shape
    return pl.pallas_call(
        rmsnorm_kernel,
        out_shape=jax.ShapeDtypeStruct((B_, L, Dm), jnp.bfloat16),
        grid=(B_, L // t_c),
        in_specs=[pl.BlockSpec((1, t_c, Dm), lambda b, c: (b, c, 0)),
                  pl.BlockSpec((1, Dm), lambda b, c: (0, 0))],
        out_specs=pl.BlockSpec((1, t_c, Dm), lambda b, c: (b, c, 0)),
        compiler_params=pltpu.CompilerParams(
            dimension_semantics=("parallel", "parallel"),
            vmem_limit_bytes=_vmem_limit_bytes(16 * t_c * Dm + 4 * Dm)),
    )(x, norm_w)


def lm_head(xn, emb_t, t_c):
    B_, L, Dm = xn.shape
    V = emb_t.shape[1]
    vt = V
    for cand in (2048, 1024, 512, 256, 128):
        if V % cand == 0:
            vt = cand
            break
    # vocab-tile axis OUTERMOST: each (Dm, vt) weight tile streams from HBM once
    # and is reused across every (batch, seq-chunk) block.
    grid = (V // vt, B_, L // t_c)
    need = 2 * (2 * Dm * vt) + 2 * (2 * t_c * Dm) + 3 * (4 * t_c * vt)
    return pl.pallas_call(
        lm_head_kernel,
        out_shape=jax.ShapeDtypeStruct((B_, L, V), jnp.float32),
        grid=grid,
        in_specs=[pl.BlockSpec((1, t_c, Dm), lambda v, b, c: (b, c, 0)),
                  pl.BlockSpec((Dm, vt), lambda v, b, c: (0, v))],
        out_specs=pl.BlockSpec((1, t_c, vt), lambda v, b, c: (b, c, v)),
        compiler_params=pltpu.CompilerParams(
            dimension_semantics=("arbitrary", "parallel", "parallel"),
            vmem_limit_bytes=_vmem_limit_bytes(need)),
    )(xn, emb_t)


def mamba_forward(ids, prepped, args, t_c=None):
    B_, L = ids.shape
    if t_c is None:
        t_c = _pick_seq_chunk(L)
    # Embedding lookup is a gather -> plain JAX glue; residual stream is bf16.
    x = jnp.take(prepped['emb_bf'], ids, axis=0)
    for lp in prepped['layers']:
        x = residual_block(x, lp, args, t_c)
    xn = final_rmsnorm(x, prepped['norm_f'], t_c)
    return lm_head(xn, prepped['emb_t'], t_c)


# ----------------------------- parameter prep --------------------------------

def prepare_params(params, args):
    """Pre-transpose / pre-cast / pad all weights ONCE into the kernel layouts."""
    d_in, r = args.d_inner, args.dt_rank
    r_pad = ((r + 127) // 128) * 128
    layers = []
    for lp in params['layers']:
        w_dtlow = lp['xproj_w'][:r, :].T.astype(jnp.bfloat16)          # (d_in, r)
        w_dtlow = jnp.pad(w_dtlow, ((0, 0), (0, r_pad - r)))           # lane-pad
        w_dt_t = lp['dt_w'].T.astype(jnp.bfloat16)                     # (r, d_in)
        w_dt_t = jnp.pad(w_dt_t, ((0, r_pad - r), (0, 0)))
        layers.append(dict(
            norm_w=lp['norm_w'][None, :].astype(jnp.float32),
            w_in_x=lp['in_w'][:d_in, :].T.astype(jnp.bfloat16),        # (Dm, d_in)
            w_in_res=lp['in_w'][d_in:, :].T.astype(jnp.bfloat16),      # (Dm, d_in)
            conv_w=jnp.transpose(lp['conv_w'][:, 0, :]).astype(jnp.float32),
            conv_b=lp['conv_b'][None, :].astype(jnp.float32),
            w_dtlow=w_dtlow,
            w_bc=lp['xproj_w'][r:, :].astype(jnp.bfloat16),            # (2n, d_in)
            w_dt_t=w_dt_t,
            dt_b=lp['dt_b'][None, :].astype(jnp.float32),
            neg_a_t=(-jnp.exp(lp['A_log'])).T.astype(jnp.float32),     # (n, d_in)
            d_vec=lp['D'][None, :].astype(jnp.float32),
            w_out_t=lp['out_w'].T.astype(jnp.bfloat16),                # (d_in, Dm)
        ))
    return dict(
        emb_bf=params['emb'].astype(jnp.bfloat16),                     # for the gather
        emb_t=params['emb'].T.astype(jnp.bfloat16),                    # tied lm_head
        norm_f=params['norm_f'][None, :].astype(jnp.float32),
        layers=layers,
    )


# ----------------------------- parameter init --------------------------------

def init_params(key, args):
    ks = jax.random.split(key, 2 + args.n_layer)
    emb = (jax.random.normal(ks[0], (args.vocab_size, args.d_model), jnp.float32)
           * 0.02)
    layers = []
    d_in = args.d_inner
    for i in range(args.n_layer):
        kk = jax.random.split(ks[2 + i], 8)
        lp = dict(
            norm_w=jnp.ones((args.d_model,), jnp.float32)
                   + 0.01 * jax.random.normal(kk[0], (args.d_model,), jnp.float32),
            in_w=jax.random.normal(kk[1], (2 * d_in, args.d_model), jnp.float32)
                 * (1.0 / math.sqrt(args.d_model)),
            conv_w=jax.random.normal(kk[2], (d_in, 1, args.d_conv), jnp.float32) * 0.3,
            conv_b=jax.random.normal(kk[3], (d_in,), jnp.float32) * 0.1,
            xproj_w=jax.random.normal(kk[4], (args.dt_rank + 2 * args.d_state, d_in),
                                      jnp.float32) * (1.0 / math.sqrt(d_in)),
            dt_w=jax.random.normal(kk[5], (d_in, args.dt_rank), jnp.float32)
                 * (1.0 / math.sqrt(args.dt_rank)),
            dt_b=jax.random.normal(kk[6], (d_in,), jnp.float32) * 0.1,
            A_log=jnp.log(jnp.broadcast_to(
                jnp.arange(1, args.d_state + 1, dtype=jnp.float32),
                (d_in, args.d_state))),
            D=jnp.ones((d_in,), jnp.float32),
            out_w=jax.random.normal(kk[7], (args.d_model, d_in), jnp.float32)
                  * (1.0 / math.sqrt(d_in)),
        )
        layers.append(lp)
    norm_f = (jnp.ones((args.d_model,), jnp.float32)
              + 0.01 * jax.random.normal(ks[1], (args.d_model,), jnp.float32))
    return dict(emb=emb, layers=layers, norm_f=norm_f)


# ----------------------------- pure-JAX reference -----------------------------

def _rmsnorm_ref(x, w, eps=1e-5):
    return x * jax.lax.rsqrt(jnp.mean(x * x, axis=-1, keepdims=True) + eps) * w


def _mamba_block_ref(x, lp, args):
    hp = jax.lax.Precision.HIGHEST
    b, l, _ = x.shape
    d_in, n, K, r = args.d_inner, args.d_state, args.d_conv, args.dt_rank
    xz = jnp.einsum('bld,ed->ble', x, lp['in_w'], precision=hp)
    xc, res = xz[..., :d_in], xz[..., d_in:]
    w = lp['conv_w'][:, 0, :]                                   # (d_in, K)
    xpad = jnp.pad(xc, ((0, 0), (K - 1, 0), (0, 0)))
    conv = sum(xpad[:, k:k + l, :] * w[:, k][None, None, :] for k in range(K))
    conv = conv + lp['conv_b']
    u = jax.nn.silu(conv)
    xdbl = jnp.einsum('bld,ed->ble', u, lp['xproj_w'], precision=hp)
    dlt, Bm, Cm = xdbl[..., :r], xdbl[..., r:r + n], xdbl[..., r + n:]
    delta = jax.nn.softplus(
        jnp.einsum('blr,dr->bld', dlt, lp['dt_w'], precision=hp) + lp['dt_b'])
    A = -jnp.exp(lp['A_log'])
    deltaA = jnp.exp(jnp.einsum('bld,dn->bldn', delta, A))
    deltaBu = jnp.einsum('bld,bln,bld->bldn', delta, Bm, u)
    s = jnp.zeros((b, d_in, n), jnp.float32)
    ys = []
    for i in range(l):
        s = deltaA[:, i] * s + deltaBu[:, i]
        ys.append(jnp.einsum('bdn,bn->bd', s, Cm[:, i]))
    y = jnp.stack(ys, axis=1) + u * lp['D']
    y = y * jax.nn.silu(res)
    return jnp.einsum('bld,ed->ble', y, lp['out_w'], precision=hp)


def mamba_forward_ref(ids, params, args):
    hp = jax.lax.Precision.HIGHEST
    x = jnp.take(params['emb'], ids, axis=0)
    for lp in params['layers']:
        x = _mamba_block_ref(_rmsnorm_ref(x, lp['norm_w']), lp, args) + x
    x = _rmsnorm_ref(x, params['norm_f'])
    return jnp.einsum('bld,vd->blv', x, params['emb'], precision=hp)


# ----------------------------- main -------------------------------------------

if __name__ == "__main__":
    args = ModelArgs(d_model=32, n_layer=2, vocab_size=48)   # d_inner=64, dt_rank=2
    key = jax.random.PRNGKey(0)
    kp, ki = jax.random.split(key)
    params = init_params(kp, args)
    prepped = prepare_params(params, args)

    batch, seq = 2, 32
    input_ids = jax.random.randint(ki, (batch, seq), 0, args.vocab_size, dtype=jnp.int32)

    # t_c=16 -> 2 seq chunks per batch row, exercising the carried conv/scan state
    # and the multi-group fori_loop scan.
    logits = mamba_forward(input_ids, prepped, args, t_c=16)
    logits = jax.block_until_ready(logits)

    ref = mamba_forward_ref(input_ids, params, args)
    assert logits.shape == (batch, seq, args.vocab_size)
    max_err = float(np.max(np.abs(np.asarray(logits) - np.asarray(ref))))
    # bf16 matmul inputs + bf16 residual stream -> looser tolerance than pure f32
    assert np.allclose(np.asarray(logits), np.asarray(ref), atol=4e-2, rtol=4e-2), max_err

    print("KERNEL_OK")
</pallas_src>

<mosaic_0001>
module attributes {stable_mosaic.version = 11 : i64} {
  func.func @k(%arg0: memref<16x128xf32, #tpu.memory_space<vmem>>, %arg1: memref<16x128xf32, #tpu.memory_space<vmem>>) attributes {dimension_semantics = [], scalar_prefetch = 0 : i64, scratch_operands = 0 : i64, tpu.core_type = #tpu.core_type<tc>} {
    %c0 = arith.constant 0 : index
    %c0_0 = arith.constant 0 : index
    %0 = vector.load %arg0[%c0, %c0_0] : memref<16x128xf32, #tpu.memory_space<vmem>>, vector<16x128xf32>
    %c3_i32 = arith.constant 3 : i32
    %1 = tpu.dynamic_rotate %0 by %c3_i32 dim 0 : vector<16x128xf32>, i32 -> vector<16x128xf32>
    %c0_1 = arith.constant 0 : index
    %c0_2 = arith.constant 0 : index
    %2 = vector.load %arg1[%c0_1, %c0_2] : memref<16x128xf32, #tpu.memory_space<vmem>>, vector<16x128xf32>
    tpu.vector_store %arg1[%c0_1, %c0_2], %1 {strides = array<i32>} : memref<16x128xf32, #tpu.memory_space<vmem>>, vector<16x128xf32>,
    return
  }
}

module attributes {stable_mosaic.version = 11 : i64} {
  func.func @mamba_block_kernel(%arg0: i32, %arg1: i32, %arg2: memref<1x16x32xbf16, #tpu.memory_space<vmem>>, %arg3: memref<1x32xf32, #tpu.memory_space<vmem>>, %arg4: memref<32x64xbf16, #tpu.memory_space<vmem>>, %arg5: memref<32x64xbf16, #tpu.memory_space<vmem>>, %arg6: memref<4x64xf32, #tpu.memory_space<vmem>>, %arg7: memref<1x64xf32, #tpu.memory_space<vmem>>, %arg8: memref<64x128xbf16, #tpu.memory_space<vmem>>, %arg9: memref<32x64xbf16, #tpu.memory_space<vmem>>, %arg10: memref<128x64xbf16, #tpu.memory_space<vmem>>, %arg11: memref<1x64xf32, #tpu.memory_space<vmem>>, %arg12: memref<16x64xf32, #tpu.memory_space<vmem>>, %arg13: memref<1x64xf32, #tpu.memory_space<vmem>>, %arg14: memref<64x32xbf16, #tpu.memory_space<vmem>>, %arg15: memref<1x16x32xbf16, #tpu.memory_space<vmem>>, %arg16: memref<16x64xf32, #tpu.memory_space<vmem>>, %arg17: memref<24x64xf32, #tpu.memory_space<vmem>>, %arg18: memref<16x64xf32, #tpu.memory_space<vmem>>, %arg19: memref<16x64xf32, #tpu.memory_space<vmem>>, %arg20: memref<2x32x8xf32, #tpu.memory_space<vmem>>, %arg21: memref<16x64xf32, #tpu.memory_space<vmem>>) attributes {dimension_semantics = [#tpu.dimension_semantics<parallel>, #tpu.dimension_semantics<arbitrary>], iteration_bounds = array<i64: 2, 2>, scalar_prefetch = 0 : i64, scratch_operands = 6 : i64, tpu.core_type = #tpu.core_type<tc>, window_params = [{transform_indices = @transform_0, window_bounds = array<i64: 1, 16, 32>}, {pipeline_mode = #tpu.pipeline_mode<synchronous>, transform_indices = @transform_1, window_bounds = array<i64: 1, 32>}, {pipeline_mode = #tpu.pipeline_mode<synchronous>, transform_indices = @transform_2, window_bounds = array<i64: 32, 64>}, {pipeline_mode = #tpu.pipeline_mode<synchronous>, transform_indices = @transform_3, window_bounds = array<i64: 32, 64>}, {pipeline_mode = #tpu.pipeline_mode<synchronous>, transform_indices = @transform_4, window_bounds = array<i64: 4, 64>}, {pipeline_mode = #tpu.pipeline_mode<synchronous>, transform_indices = @transform_5, window_bounds = array<i64: 1, 64>}, {pipeline_mode = #tpu.pipeline_mode<synchronous>, transform_indices = @transform_6, window_bounds = array<i64: 64, 128>}, {pipeline_mode = #tpu.pipeline_mode<synchronous>, transform_indices = @transform_7, window_bounds = array<i64: 32, 64>}, {pipeline_mode = #tpu.pipeline_mode<synchronous>, transform_indices = @transform_8, window_bounds = array<i64: 128, 64>}, {pipeline_mode = #tpu.pipeline_mode<synchronous>, transform_indices = @transform_9, window_bounds = array<i64: 1, 64>}, {pipeline_mode = #tpu.pipeline_mode<synchronous>, transform_indices = @transform_10, window_bounds = array<i64: 16, 64>}, {pipeline_mode = #tpu.pipeline_mode<synchronous>, transform_indices = @transform_11, window_bounds = array<i64: 1, 64>}, {pipeline_mode = #tpu.pipeline_mode<synchronous>, transform_indices = @transform_12, window_bounds = array<i64: 64, 32>}, {transform_indices = @transform_13, window_bounds = array<i64: 1, 16, 32>}]} {
    %c0_i32 = arith.constant 0 : i32
    %0 = arith.cmpi eq, %arg1, %c0_i32 : i32
    %1 = arith.extui %0 : i1 to i32
    %c0_i32_0 = arith.constant 0 : i32
    %2 = arith.cmpi ne, %1, %c0_i32_0 : i32
    scf.if %2 {
      %cst_77 = arith.constant 0.000000e+00 : f32
      %151 = vector.broadcast %cst_77 : f32 to vector<16x64xf32>
      %c0_78 = arith.constant 0 : index
      %c0_79 = arith.constant 0 : index
      %152 = vector.load %arg16[%c0_78, %c0_79] : memref<16x64xf32, #tpu.memory_space<vmem>>, vector<16x64xf32>
      tpu.vector_store %arg16[%c0_78, %c0_79], %151 {strides = array<i32>} : memref<16x64xf32, #tpu.memory_space<vmem>>, vector<16x64xf32>,
      %cst_80 = arith.constant 0.000000e+00 : f32
      %153 = vector.broadcast %cst_80 : f32 to vector<24x64xf32>
      %c0_81 = arith.constant 0 : index
      %c0_82 = arith.constant 0 : index
      %154 = vector.load %arg17[%c0_81, %c0_82] : memref<24x64xf32, #tpu.memory_space<vmem>>, vector<24x64xf32>
      tpu.vector_store %arg17[%c0_81, %c0_82], %153 {strides = array<i32>} : memref<24x64xf32, #tpu.memory_space<vmem>>, vector<24x64xf32>,
    } else {
    }
    %c0 = arith.constant 0 : index
    %c0_1 = arith.constant 0 : index
    %c0_2 = arith.constant 0 : index
    %3 = vector.load %arg2[%c0, %c0_1, %c0_2] : memref<1x16x32xbf16, #tpu.memory_space<vmem>>, vector<1x16x32xbf16>
    %4 = vector.shape_cast %3 : vector<1x16x32xbf16> to vector<16x32xbf16>
    %5 = arith.extf %4 : vector<16x32xbf16> to vector<16x32xf32>
    %6 = arith.mulf %5, %5 : vector<16x32xf32>
    %cst = arith.constant dense<0.000000e+00> : vector<16xf32>
    %7 = vector.multi_reduction <add>, %6, %cst [1] : vector<16x32xf32> to vector<16xf32>
    %8 = vector.shape_cast %7 : vector<16xf32> to vector<16x1xf32>
    %cst_3 = arith.constant 3.200000e+01 : f32
    %9 = vector.broadcast %cst_3 : f32 to vector<16x1xf32>
    %10 = arith.divf %8, %9 : vector<16x1xf32>
    %cst_4 = arith.constant 9.99999974E-6 : f32
    %11 = vector.broadcast %cst_4 : f32 to vector<16x1xf32>
    %12 = arith.addf %10, %11 : vector<16x1xf32>
    %13 = math.rsqrt %12 : vector<16x1xf32>
    %14 = vector.broadcast %13 : vector<16x1xf32> to vector<16x32xf32>
    %15 = arith.mulf %5, %14 : vector<16x32xf32>
    %c0_5 = arith.constant 0 : index
    %c0_6 = arith.constant 0 : index
    %16 = vector.load %arg3[%c0_5, %c0_6] : memref<1x32xf32, #tpu.memory_space<vmem>>, vector<1x32xf32>
    %17 = vector.broadcast %16 : vector<1x32xf32> to vector<16x32xf32>
    %18 = arith.mulf %15, %17 : vector<16x32xf32>
    %19 = arith.truncf %18 : vector<16x32xf32> to vector<16x32xbf16>
    %c0_7 = arith.constant 0 : index
    %c0_8 = arith.constant 0 : index
    %20 = vector.load %arg4[%c0_7, %c0_8] : memref<32x64xbf16, #tpu.memory_space<vmem>>, vector<32x64xbf16>
    %cst_9 = arith.constant dense<0.000000e+00> : vector<16x64xf32>
    %21 = tpu.matmul %19, %20, %cst_9 {dimension_numbers = #tpu.dot_dimension_numbers<[1], [0], [0], [1], [0, 0, 1, 1], [], []>} : vector<16x32xbf16>, vector<32x64xbf16>, vector<16x64xf32> -> vector<16x64xf32>
    %c0_10 = arith.constant 0 : index
    %c0_11 = arith.constant 0 : index
    %22 = vector.load %arg5[%c0_10, %c0_11] : memref<32x64xbf16, #tpu.memory_space<vmem>>, vector<32x64xbf16>
    %cst_12 = arith.constant dense<0.000000e+00> : vector<16x64xf32>
    %23 = tpu.matmul %19, %22, %cst_12 {dimension_numbers = #tpu.dot_dimension_numbers<[1], [0], [0], [1], [0, 0, 1, 1], [], []>} : vector<16x32xbf16>, vector<32x64xbf16>, vector<16x64xf32> -> vector<16x64xf32>
    %c8 = arith.constant 8 : index
    %c0_13 = arith.constant 0 : index
    %24 = vector.load %arg17[%c8, %c0_13] : memref<24x64xf32, #tpu.memory_space<vmem>>, vector<16x64xf32>
    tpu.vector_store %arg17[%c8, %c0_13], %21 {strides = array<i32>} : memref<24x64xf32, #tpu.memory_space<vmem>>, vector<16x64xf32>,
    %c0_14 = arith.constant 0 : index
    %c0_15 = arith.constant 0 : index
    %25 = vector.load %arg7[%c0_14, %c0_15] : memref<1x64xf32, #tpu.memory_space<vmem>>, vector<1x64xf32>
    %cst_16 = arith.constant 0.000000e+00 : f32
    %26 = vector.broadcast %cst_16 : f32 to vector<16x64xf32>
    %27 = vector.broadcast %25 : vector<1x64xf32> to vector<16x64xf32>
    %28 = arith.addf %27, %26 : vector<16x64xf32>
    %c0_17 = arith.constant 0 : index
    %c0_18 = arith.constant 0 : index
    %29 = vector.load %arg6[%c0_17, %c0_18] : memref<4x64xf32, #tpu.memory_space<vmem>>, vector<1x64xf32>
    %c5 = arith.constant 5 : index
    %c0_19 = arith.constant 0 : index
    %30 = vector.load %arg17[%c5, %c0_19] : memref<24x64xf32, #tpu.memory_space<vmem>>, vector<16x64xf32>
    %31 = vector.broadcast %29 : vector<1x64xf32> to vector<16x64xf32>
    %32 = arith.mulf %31, %30 : vector<16x64xf32>
    %33 = arith.addf %28, %32 : vector<16x64xf32>
    %c1 = arith.constant 1 : index
    %c0_20 = arith.constant 0 : index
    %34 = vector.load %arg6[%c1, %c0_20] : memref<4x64xf32, #tpu.memory_space<vmem>>, vector<1x64xf32>
    %c6 = arith.constant 6 : index
    %c0_21 = arith.constant 0 : index
    %35 = vector.load %arg17[%c6, %c0_21] : memref<24x64xf32, #tpu.memory_space<vmem>>, vector<16x64xf32>
    %36 = vector.broadcast %34 : vector<1x64xf32> to vector<16x64xf32>
    %37 = arith.mulf %36, %35 : vector<16x64xf32>
    %38 = arith.addf %33, %37 : vector<16x64xf32>
    %c2 = arith.constant 2 : index
    %c0_22 = arith.constant 0 : index
    %39 = vector.load %arg6[%c2, %c0_22] : memref<4x64xf32, #tpu.memory_space<vmem>>, vector<1x64xf32>
    %c7 = arith.constant 7 : index
    %c0_23 = arith.constant 0 : index
    %40 = vector.load %arg17[%c7, %c0_23] : memref<24x64xf32, #tpu.memory_space<vmem>>, vector<16x64xf32>
    %41 = vector.broadcast %39 : vector<1x64xf32> to vector<16x64xf32>
    %42 = arith.mulf %41, %40 : vector<16x64xf32>
    %43 = arith.addf %38, %42 : vector<16x64xf32>
    %c3 = arith.constant 3 : index
    %c0_24 = arith.constant 0 : index
    %44 = vector.load %arg6[%c3, %c0_24] : memref<4x64xf32, #tpu.memory_space<vmem>>, vector<1x64xf32>
    %c8_25 = arith.constant 8 : index
    %c0_26 = arith.constant 0 : index
    %45 = vector.load %arg17[%c8_25, %c0_26] : memref<24x64xf32, #tpu.memory_space<vmem>>, vector<16x64xf32>
    %46 = vector.broadcast %44 : vector<1x64xf32> to vector<16x64xf32>
    %47 = arith.mulf %46, %45 : vector<16x64xf32>
    %48 = arith.addf %43, %47 : vector<16x64xf32>
    %49 = vector.extract_strided_slice %21 {offsets = [13, 0], sizes = [3, 64], strides = [1, 1]} : vector<16x64xf32> to vector<3x64xf32>
    %c5_27 = arith.constant 5 : index
    %c0_28 = arith.constant 0 : index
    %50 = vector.load %arg17[%c5_27, %c0_28] : memref<24x64xf32, #tpu.memory_space<vmem>>, vector<3x64xf32>
    tpu.vector_store %arg17[%c5_27, %c0_28], %49 {strides = array<i32>} : memref<24x64xf32, #tpu.memory_space<vmem>>, vector<3x64xf32>,
    %51 = arith.negf %48 : vector<16x64xf32>
    %52 = math.exp %51 : vector<16x64xf32>
    %cst_29 = arith.constant 1.000000e+00 : f32
    %53 = vector.broadcast %cst_29 : f32 to vector<16x64xf32>
    %54 = arith.addf %53, %52 : vector<16x64xf32>
    %55 = arith.divf %53, %54 : vector<16x64xf32>
    %56 = arith.mulf %48, %55 : vector<16x64xf32>
    %57 = arith.truncf %56 : vector<16x64xf32> to vector<16x64xbf16>
    %c0_30 = arith.constant 0 : index
    %c0_31 = arith.constant 0 : index
    %58 = vector.load %arg8[%c0_30, %c0_31] : memref<64x128xbf16, #tpu.memory_space<vmem>>, vector<64x128xbf16>
    %cst_32 = arith.constant dense<0.000000e+00> : vector<16x128xf32>
    %59 = tpu.matmul %57, %58, %cst_32 {dimension_numbers = #tpu.dot_dimension_numbers<[1], [0], [0], [1], [0, 0, 1, 1], [], []>} : vector<16x64xbf16>, vector<64x128xbf16>, vector<16x128xf32> -> vector<16x128xf32>
    %c0_33 = arith.constant 0 : index
    %c0_34 = arith.constant 0 : index
    %60 = vector.load %arg9[%c0_33, %c0_34] : memref<32x64xbf16, #tpu.memory_space<vmem>>, vector<32x64xbf16>
    %cst_35 = arith.constant dense<0.000000e+00> : vector<32x16xf32>
    %61 = tpu.matmul %60, %57, %cst_35 {dimension_numbers = #tpu.dot_dimension_numbers<[1], [1], [0], [0], [0, 0, 1, 0], [], []>} : vector<32x64xbf16>, vector<16x64xbf16>, vector<32x16xf32> -> vector<32x16xf32>
    %62 = arith.truncf %59 : vector<16x128xf32> to vector<16x128xbf16>
    %c0_36 = arith.constant 0 : index
    %c0_37 = arith.constant 0 : index
    %63 = vector.load %arg10[%c0_36, %c0_37] : memref<128x64xbf16, #tpu.memory_space<vmem>>, vector<128x64xbf16>
    %cst_38 = arith.constant dense<0.000000e+00> : vector<16x64xf32>
    %64 = tpu.matmul %62, %63, %cst_38 {dimension_numbers = #tpu.dot_dimension_numbers<[1], [0], [0], [1], [0, 0, 1, 1], [], []>} : vector<16x128xbf16>, vector<128x64xbf16>, vector<16x64xf32> -> vector<16x64xf32>
    %c0_39 = arith.constant 0 : index
    %c0_40 = arith.constant 0 : index
    %65 = vector.load %arg11[%c0_39, %c0_40] : memref<1x64xf32, #tpu.memory_space<vmem>>, vector<1x64xf32>
    %66 = vector.broadcast %65 : vector<1x64xf32> to vector<16x64xf32>
    %67 = arith.addf %64, %66 : vector<16x64xf32>
    %cst_41 = arith.constant 2.000000e+01 : f32
    %68 = vector.broadcast %cst_41 : f32 to vector<16x64xf32>
    %69 = arith.cmpf ogt, %67, %68 : vector<16x64xf32>
    %cst_42 = arith.constant 2.000000e+01 : f32
    %70 = vector.broadcast %cst_42 : f32 to vector<16x64xf32>
    %71 = arith.minimumf %67, %70 : vector<16x64xf32>
    %72 = math.exp %71 : vector<16x64xf32>
    %73 = math.log1p %72 : vector<16x64xf32>
    %74 = arith.select %69, %67, %73 : vector<16x64xi1>, vector<16x64xf32>
    %c0_43 = arith.constant 0 : index
    %c0_44 = arith.constant 0 : index
    %75 = vector.load %arg18[%c0_43, %c0_44] : memref<16x64xf32, #tpu.memory_space<vmem>>, vector<16x64xf32>
    tpu.vector_store %arg18[%c0_43, %c0_44], %74 {strides = array<i32>} : memref<16x64xf32, #tpu.memory_space<vmem>>, vector<16x64xf32>,
    %c0_45 = arith.constant 0 : index
    %c0_46 = arith.constant 0 : index
    %76 = vector.load %arg19[%c0_45, %c0_46] : memref<16x64xf32, #tpu.memory_space<vmem>>, vector<16x64xf32>
    tpu.vector_store %arg19[%c0_45, %c0_46], %56 {strides = array<i32>} : memref<16x64xf32, #tpu.memory_space<vmem>>, vector<16x64xf32>,
    %77 = vector.extract_strided_slice %61 {offsets = [0, 0], sizes = [32, 8], strides = [1, 1]} : vector<32x16xf32> to vector<32x8xf32>
    %c0_47 = arith.constant 0 : index
    %c0_48 = arith.constant 0 : index
    %c0_49 = arith.constant 0 : index
    %78 = vector.load %arg20[%c0_47, %c0_48, %c0_49] : memref<2x32x8xf32, #tpu.memory_space<vmem>>, vector<1x32x8xf32>
    %79 = vector.shape_cast %78 : vector<1x32x8xf32> to vector<32x8xf32>
    %80 = vector.shape_cast %77 : vector<32x8xf32> to vector<1x32x8xf32>
    tpu.vector_store %arg20[%c0_47, %c0_48, %c0_49], %80 {strides = array<i32>} : memref<2x32x8xf32, #tpu.memory_space<vmem>>, vector<1x32x8xf32>,
    %81 = vector.extract_strided_slice %61 {offsets = [0, 8], sizes = [32, 8], strides = [1, 1]} : vector<32x16xf32> to vector<32x8xf32>
    %c1_50 = arith.constant 1 : index
    %c0_51 = arith.constant 0 : index
    %c0_52 = arith.constant 0 : index
    %82 = vector.load %arg20[%c1_50, %c0_51, %c0_52] : memref<2x32x8xf32, #tpu.memory_space<vmem>>, vector<1x32x8xf32>
    %83 = vector.shape_cast %82 : vector<1x32x8xf32> to vector<32x8xf32>
    %84 = vector.shape_cast %81 : vector<32x8xf32> to vector<1x32x8xf32>
    tpu.vector_store %arg20[%c1_50, %c0_51, %c0_52], %84 {strides = array<i32>} : memref<2x32x8xf32, #tpu.memory_space<vmem>>, vector<1x32x8xf32>,
    %c0_53 = arith.constant 0 : index
    %c0_54 = arith.constant 0 : index
    %85 = vector.load %arg12[%c0_53, %c0_54] : memref<16x64xf32, #tpu.memory_space<vmem>>, vector<16x64xf32>
    %86 = tpu.iota {dimensions = array<i32: 0>} : vector<8x1xi32>
    %c0_i32_55 = arith.constant 0 : i32
    %87 = vector.broadcast %c0_i32_55 : i32 to vector<8x1xi32>
    %88 = arith.cmpi eq, %86, %87 : vector<8x1xi32>
    %89 = arith.extui %88 : vector<8x1xi1> to vector<8x1xi32>
    %90 = arith.sitofp %89 : vector<8x1xi32> to vector<8x1xf32>
    %91 = tpu.iota {dimensions = array<i32: 0>} : vector<8x1xi32>
    %c1_i32 = arith.constant 1 : i32
    %92 = vector.broadcast %c1_i32 : i32 to vector<8x1xi32>
    %93 = arith.cmpi eq, %91, %92 : vector<8x1xi32>
    %94 = arith.extui %93 : vector<8x1xi1> to vector<8x1xi32>
    %95 = arith.sitofp %94 : vector<8x1xi32> to vector<8x1xf32>
    %96 = tpu.iota {dimensions = array<i32: 0>} : vector<8x1xi32>
    %c2_i32 = arith.constant 2 : i32
    %97 = vector.broadcast %c2_i32 : i32 to vector<8x1xi32>
    %98 = arith.cmpi eq, %96, %97 : vector<8x1xi32>
    %99 = arith.extui %98 : vector<8x1xi1> to vector<8x1xi32>
    %100 = arith.sitofp %99 : vector<8x1xi32> to vector<8x1xf32>
    %101 = tpu.iota {dimensions = array<i32: 0>} : vector<8x1xi32>
    %c3_i32 = arith.constant 3 : i32
    %102 = vector.broadcast %c3_i32 : i32 to vector<8x1xi32>
    %103 = arith.cmpi eq, %101, %102 : vector<8x1xi32>
    %104 = arith.extui %103 : vector<8x1xi1> to vector<8x1xi32>
    %105 = arith.sitofp %104 : vector<8x1xi32> to vector<8x1xf32>
    %106 = tpu.iota {dimensions = array<i32: 0>} : vector<8x1xi32>
    %c4_i32 = arith.constant 4 : i32
    %107 = vector.broadcast %c4_i32 : i32 to vector<8x1xi32>
    %108 = arith.cmpi eq, %106, %107 : vector<8x1xi32>
    %109 = arith.extui %108 : vector<8x1xi1> to vector<8x1xi32>
    %110 = arith.sitofp %109 : vector<8x1xi32> to vector<8x1xf32>
    %111 = tpu.iota {dimensions = array<i32: 0>} : vector<8x1xi32>
    %c5_i32 = arith.constant 5 : i32
    %112 = vector.broadcast %c5_i32 : i32 to vector<8x1xi32>
    %113 = arith.cmpi eq, %111, %112 : vector<8x1xi32>
    %114 = arith.extui %113 : vector<8x1xi1> to vector<8x1xi32>
    %115 = arith.sitofp %114 : vector<8x1xi32> to vector<8x1xf32>
    %116 = tpu.iota {dimensions = array<i32: 0>} : vector<8x1xi32>
    %c6_i32 = arith.constant 6 : i32
    %117 = vector.broadcast %c6_i32 : i32 to vector<8x1xi32>
    %118 = arith.cmpi eq, %116, %117 : vector<8x1xi32>
    %119 = arith.extui %118 : vector<8x1xi1> to vector<8x1xi32>
    %120 = arith.sitofp %119 : vector<8x1xi32> to vector<8x1xf32>
    %121 = tpu.iota {dimensions = array<i32: 0>} : vector<8x1xi32>
    %c7_i32 = arith.constant 7 : i32
    %122 = vector.broadcast %c7_i32 : i32 to vector<8x1xi32>
    %123 = arith.cmpi eq, %121, %122 : vector<8x1xi32>
    %124 = arith.extui %123 : vector<8x1xi1> to vector<8x1xi32>
    %125 = arith.sitofp %124 : vector<8x1xi32> to vector<8x1xf32>
    %c0_56 = arith.constant 0 : index
    %c0_57 = arith.constant 0 : index
    %126 = vector.load %arg16[%c0_56, %c0_57] : memref<16x64xf32, #tpu.memory_space<vmem>>, vector<16x64xf32>
    %c0_i32_58 = arith.constant 0 : i32
    %c2_i32_59 = arith.constant 2 : i32
    %127 = arith.addi %c0_i32_58, %c2_i32_59 : i32
    %c1_i32_60 = arith.constant 1 : i32
    %128 = scf.for %arg22 = %c0_i32_58 to %127 step %c1_i32_60 iter_args(%arg23 = %126) -> (vector<16x64xf32>)  : i32 {
      %c8_i32 = arith.constant 8 : i32
      %151 = arith.muli %arg22, %c8_i32 : i32
      %152 = tpu.assume_multiple %151, 8 : i32
      %153 = arith.index_cast %152 : i32 to index
      %c0_77 = arith.constant 0 : index
      %154 = vector.load %arg18[%153, %c0_77] : memref<16x64xf32, #tpu.memory_space<vmem>>, vector<8x64xf32>
      %155 = arith.index_cast %152 : i32 to index
      %c0_78 = arith.constant 0 : index
      %156 = vector.load %arg19[%155, %c0_78] : memref<16x64xf32, #tpu.memory_space<vmem>>, vector<8x64xf32>
      %157 = arith.mulf %154, %156 : vector<8x64xf32>
      %158 = arith.index_cast %arg22 : i32 to index
      %c0_79 = arith.constant 0 : index
      %c0_80 = arith.constant 0 : index
      %159 = vector.load %arg20[%158, %c0_79, %c0_80] : memref<2x32x8xf32, #tpu.memory_space<vmem>>, vector<1x32x8xf32>
      %160 = vector.shape_cast %159 : vector<1x32x8xf32> to vector<32x8xf32>
      %161 = vector.extract_strided_slice %154 {offsets = [0, 0], sizes = [1, 64], strides = [1, 1]} : vector<8x64xf32> to vector<1x64xf32>
      %162 = vector.broadcast %161 : vector<1x64xf32> to vector<16x64xf32>
      %163 = arith.mulf %162, %85 : vector<16x64xf32>
      %164 = math.exp %163 : vector<16x64xf32>
      %165 = vector.extract_strided_slice %154 {offsets = [1, 0], sizes = [1, 64], strides = [1, 1]} : vector<8x64xf32> to vector<1x64xf32>
      %166 = vector.broadcast %165 : vector<1x64xf32> to vector<16x64xf32>
      %167 = arith.mulf %166, %85 : vector<16x64xf32>
      %168 = math.exp %167 : vector<16x64xf32>
      %169 = vector.extract_strided_slice %154 {offsets = [2, 0], sizes = [1, 64], strides = [1, 1]} : vector<8x64xf32> to vector<1x64xf32>
      %170 = vector.broadcast %169 : vector<1x64xf32> to vector<16x64xf32>
      %171 = arith.mulf %170, %85 : vector<16x64xf32>
      %172 = math.exp %171 : vector<16x64xf32>
      %173 = vector.extract_strided_slice %154 {offsets = [3, 0], sizes = [1, 64], strides = [1, 1]} : vector<8x64xf32> to vector<1x64xf32>
      %174 = vector.broadcast %173 : vector<1x64xf32> to vector<16x64xf32>
      %175 = arith.mulf %174, %85 : vector<16x64xf32>
      %176 = math.exp %175 : vector<16x64xf32>
      %177 = vector.extract_strided_slice %154 {offsets = [4, 0], sizes = [1, 64], strides = [1, 1]} : vector<8x64xf32> to vector<1x64xf32>
      %178 = vector.broadcast %177 : vector<1x64xf32> to vector<16x64xf32>
      %179 = arith.mulf %178, %85 : vector<16x64xf32>
      %180 = math.exp %179 : vector<16x64xf32>
      %181 = vector.extract_strided_slice %154 {offsets = [5, 0], sizes = [1, 64], strides = [1, 1]} : vector<8x64xf32> to vector<1x64xf32>
      %182 = vector.broadcast %181 : vector<1x64xf32> to vector<16x64xf32>
      %183 = arith.mulf %182, %85 : vector<16x64xf32>
      %184 = math.exp %183 : vector<16x64xf32>
      %185 = vector.extract_strided_slice %154 {offsets = [6, 0], sizes = [1, 64], strides = [1, 1]} : vector<8x64xf32> to vector<1x64xf32>
      %186 = vector.broadcast %185 : vector<1x64xf32> to vector<16x64xf32>
      %187 = arith.mulf %186, %85 : vector<16x64xf32>
      %188 = math.exp %187 : vector<16x64xf32>
      %189 = vector.extract_strided_slice %154 {offsets = [7, 0], sizes = [1, 64], strides = [1, 1]} : vector<8x64xf32> to vector<1x64xf32>
      %190 = vector.broadcast %189 : vector<1x64xf32> to vector<16x64xf32>
      %191 = arith.mulf %190, %85 : vector<16x64xf32>
      %192 = math.exp %191 : vector<16x64xf32>
      %193 = vector.extract_strided_slice %160 {offsets = [0, 0], sizes = [16, 1], strides = [1, 1]} : vector<32x8xf32> to vector<16x1xf32>
      %194 = vector.extract_strided_slice %157 {offsets = [0, 0], sizes = [1, 64], strides = [1, 1]} : vector<8x64xf32> to vector<1x64xf32>
      %195 = vector.broadcast %193 : vector<16x1xf32> to vector<16x64xf32>
      %196 = vector.broadcast %194 : vector<1x64xf32> to vector<16x64xf32>
      %197 = arith.mulf %195, %196 : vector<16x64xf32>
      %198 = vector.extract_strided_slice %160 {offsets = [0, 1], sizes = [16, 1], strides = [1, 1]} : vector<32x8xf32> to vector<16x1xf32>
      %199 = vector.extract_strided_slice %157 {offsets = [1, 0], sizes = [1, 64], strides = [1, 1]} : vector<8x64xf32> to vector<1x64xf32>
      %200 = vector.broadcast %198 : vector<16x1xf32> to vector<16x64xf32>
      %201 = vector.broadcast %199 : vector<1x64xf32> to vector<16x64xf32>
      %202 = arith.mulf %200, %201 : vector<16x64xf32>
      %203 = vector.extract_strided_slice %160 {offsets = [0, 2], sizes = [16, 1], strides = [1, 1]} : vector<32x8xf32> to vector<16x1xf32>
      %204 = vector.extract_strided_slice %157 {offsets = [2, 0], sizes = [1, 64], strides = [1, 1]} : vector<8x64xf32> to vector<1x64xf32>
      %205 = vector.broadcast %203 : vector<16x1xf32> to vector<16x64xf32>
      %206 = vector.broadcast %204 : vector<1x64xf32> to vector<16x64xf32>
      %207 = arith.mulf %205, %206 : vector<16x64xf32>
      %208 = vector.extract_strided_slice %160 {offsets = [0, 3], sizes = [16, 1], strides = [1, 1]} : vector<32x8xf32> to vector<16x1xf32>
      %209 = vector.extract_strided_slice %157 {offsets = [3, 0], sizes = [1, 64], strides = [1, 1]} : vector<8x64xf32> to vector<1x64xf32>
      %210 = vector.broadcast %208 : vector<16x1xf32> to vector<16x64xf32>
      %211 = vector.broadcast %209 : vector<1x64xf32> to vector<16x64xf32>
      %212 = arith.mulf %210, %211 : vector<16x64xf32>
      %213 = vector.extract_strided_slice %160 {offsets = [0, 4], sizes = [16, 1], strides = [1, 1]} : vector<32x8xf32> to vector<16x1xf32>
      %214 = vector.extract_strided_slice %157 {offsets = [4, 0], sizes = [1, 64], strides = [1, 1]} : vector<8x64xf32> to vector<1x64xf32>
      %215 = vector.broadcast %213 : vector<16x1xf32> to vector<16x64xf32>
      %216 = vector.broadcast %214 : vector<1x64xf32> to vector<16x64xf32>
      %217 = arith.mulf %215, %216 : vector<16x64xf32>
      %218 = vector.extract_strided_slice %160 {offsets = [0, 5], sizes = [16, 1], strides = [1, 1]} : vector<32x8xf32> to vector<16x1xf32>
      %219 = vector.extract_strided_slice %157 {offsets = [5, 0], sizes = [1, 64], strides = [1, 1]} : vector<8x64xf32> to vector<1x64xf32>
      %220 = vector.broadcast %218 : vector<16x1xf32> to vector<16x64xf32>
      %221 = vector.broadcast %219 : vector<1x64xf32> to vector<16x64xf32>
      %222 = arith.mulf %220, %221 : vector<16x64xf32>
      %223 = vector.extract_strided_slice %160 {offsets = [0, 6], sizes = [16, 1], strides = [1, 1]} : vector<32x8xf32> to vector<16x1xf32>
      %224 = vector.extract_strided_slice %157 {offsets = [6, 0], sizes = [1, 64], strides = [1, 1]} : vector<8x64xf32> to vector<1x64xf32>
      %225 = vector.broadcast %223 : vector<16x1xf32> to vector<16x64xf32>
      %226 = vector.broadcast %224 : vector<1x64xf32> to vector<16x64xf32>
      %227 = arith.mulf %225, %226 : vector<16x64xf32>
      %228 = vector.extract_strided_slice %160 {offsets = [0, 7], sizes = [16, 1], strides = [1, 1]} : vector<32x8xf32> to vector<16x1xf32>
      %229 = vector.extract_strided_slice %157 {offsets = [7, 0], sizes = [1, 64], strides = [1, 1]} : vector<8x64xf32> to vector<1x64xf32>
      %230 = vector.broadcast %228 : vector<16x1xf32> to vector<16x64xf32>
      %231 = vector.broadcast %229 : vector<1x64xf32> to vector<16x64xf32>
      %232 = arith.mulf %230, %231 : vector<16x64xf32>
      %cst_81 = arith.constant 0.000000e+00 : f32
      %233 = vector.broadcast %cst_81 : f32 to vector<8x64xf32>
      %234 = arith.mulf %164, %arg23 : vector<16x64xf32>
      %235 = arith.addf %234, %197 : vector<16x64xf32>
      %236 = vector.extract_strided_slice %160 {offsets = [16, 0], sizes = [16, 1], strides = [1, 1]} : vector<32x8xf32> to vector<16x1xf32>
      %237 = vector.broadcast %236 : vector<16x1xf32> to vector<16x64xf32>
      %238 = arith.mulf %237, %235 : vector<16x64xf32>
      %cst_82 = arith.constant dense<0.000000e+00> : vector<64xf32>
      %239 = vector.multi_reduction <add>, %238, %cst_82 [0] : vector<16x64xf32> to vector<64xf32>
      %240 = vector.shape_cast %239 : vector<64xf32> to vector<1x64xf32>
      %241 = vector.broadcast %90 : vector<8x1xf32> to vector<8x64xf32>
      %242 = vector.broadcast %240 : vector<1x64xf32> to vector<8x64xf32>
      %243 = arith.mulf %241, %242 : vector<8x64xf32>
      %244 = arith.addf %233, %243 : vector<8x64xf32>
      %245 = arith.mulf %168, %235 : vector<16x64xf32>
      %246 = arith.addf %245, %202 : vector<16x64xf32>
      %247 = vector.extract_strided_slice %160 {offsets = [16, 1], sizes = [16, 1], strides = [1, 1]} : vector<32x8xf32> to vector<16x1xf32>
      %248 = vector.broadcast %247 : vector<16x1xf32> to vector<16x64xf32>
      %249 = arith.mulf %248, %246 : vector<16x64xf32>
      %cst_83 = arith.constant dense<0.000000e+00> : vector<64xf32>
      %250 = vector.multi_reduction <add>, %249, %cst_83 [0] : vector<16x64xf32> to vector<64xf32>
      %251 = vector.shape_cast %250 : vector<64xf32> to vector<1x64xf32>
      %252 = vector.broadcast %95 : vector<8x1xf32> to vector<8x64xf32>
      %253 = vector.broadcast %251 : vector<1x64xf32> to vector<8x64xf32>
      %254 = arith.mulf %252, %253 : vector<8x64xf32>
      %255 = arith.addf %244, %254 : vector<8x64xf32>
      %256 = arith.mulf %172, %246 : vector<16x64xf32>
      %257 = arith.addf %256, %207 : vector<16x64xf32>
      %258 = vector.extract_strided_slice %160 {offsets = [16, 2], sizes = [16, 1], strides = [1, 1]} : vector<32x8xf32> to vector<16x1xf32>
      %259 = vector.broadcast %258 : vector<16x1xf32> to vector<16x64xf32>
      %260 = arith.mulf %259, %257 : vector<16x64xf32>
      %cst_84 = arith.constant dense<0.000000e+00> : vector<64xf32>
      %261 = vector.multi_reduction <add>, %260, %cst_84 [0] : vector<16x64xf32> to vector<64xf32>
      %262 = vector.shape_cast %261 : vector<64xf32> to vector<1x64xf32>
      %263 = vector.broadcast %100 : vector<8x1xf32> to vector<8x64xf32>
      %264 = vector.broadcast %262 : vector<1x64xf32> to vector<8x64xf32>
      %265 = arith.mulf %263, %264 : vector<8x64xf32>
      %266 = arith.addf %255, %265 : vector<8x64xf32>
      %267 = arith.mulf %176, %257 : vector<16x64xf32>
      %268 = arith.addf %267, %212 : vector<16x64xf32>
      %269 = vector.extract_strided_slice %160 {offsets = [16, 3], sizes = [16, 1], strides = [1, 1]} : vector<32x8xf32> to vector<16x1xf32>
      %270 = vector.broadcast %269 : vector<16x1xf32> to vector<16x64xf32>
      %271 = arith.mulf %270, %268 : vector<16x64xf32>
      %cst_85 = arith.constant dense<0.000000e+00> : vector<64xf32>
      %272 = vector.multi_reduction <add>, %271, %cst_85 [0] : vector<16x64xf32> to vector<64xf32>
      %273 = vector.shape_cast %272 : vector<64xf32> to vector<1x64xf32>
      %274 = vector.broadcast %105 : vector<8x1xf32> to vector<8x64xf32>
      %275 = vector.broadcast %273 : vector<1x64xf32> to vector<8x64xf32>
      %276 = arith.mulf %274, %275 : vector<8x64xf32>
      %277 = arith.addf %266, %276 : vector<8x64xf32>
      %278 = arith.mulf %180, %268 : vector<16x64xf32>
      %279 = arith.addf %278, %217 : vector<16x64xf32>
      %280 = vector.extract_strided_slice %160 {offsets = [16, 4], sizes = [16, 1], strides = [1, 1]} : vector<32x8xf32> to vector<16x1xf32>
      %281 = vector.broadcast %280 : vector<16x1xf32> to vector<16x64xf32>
      %282 = arith.mulf %281, %279 : vector<16x64xf32>
      %cst_86 = arith.constant dense<0.000000e+00> : vector<64xf32>
      %283 = vector.multi_reduction <add>, %282, %cst_86 [0] : vector<16x64xf32> to vector<64xf32>
      %284 = vector.shape_cast %283 : vector<64xf32> to vector<1x64xf32>
      %285 = vector.broadcast %110 : vector<8x1xf32> to vector<8x64xf32>
      %286 = vector.broadcast %284 : vector<1x64xf32> to vector<8x64xf32>
      %287 = arith.mulf %285, %286 : vector<8x64xf32>
      %288 = arith.addf %277, %287 : vector<8x64xf32>
      %289 = arith.mulf %184, %279 : vector<16x64xf32>
      %290 = arith.addf %289, %222 : vector<16x64xf32>
      %291 = vector.extract_strided_slice %160 {offsets = [16, 5], sizes = [16, 1], strides = [1, 1]} : vector<32x8xf32> to vector<16x1xf32>
      %292 = vector.broadcast %291 : vector<16x1xf32> to vector<16x64xf32>
      %293 = arith.mulf %292, %290 : vector<16x64xf32>
      %cst_87 = arith.constant dense<0.000000e+00> : vector<64xf32>
      %294 = vector.multi_reduction <add>, %293, %cst_87 [0] : vector<16x64xf32> to vector<64xf32>
      %295 = vector.shape_cast %294 : vector<64xf32> to vector<1x64xf32>
      %296 = vector.broadcast %115 : vector<8x1xf32> to vector<8x64xf32>
      %297 = vector.broadcast %295 : vector<1x64xf32> to vector<8x64xf32>
      %298 = arith.mulf %296, %297 : vector<8x64xf32>
      %299 = arith.addf %288, %298 : vector<8x64xf32>
      %300 = arith.mulf %188, %290 : vector<16x64xf32>
      %301 = arith.addf %300, %227 : vector<16x64xf32>
      %302 = vector.extract_strided_slice %160 {offsets = [16, 6], sizes = [16, 1], strides = [1, 1]} : vector<32x8xf32> to vector<16x1xf32>
      %303 = vector.broadcast %302 : vector<16x1xf32> to vector<16x64xf32>
      %304 = arith.mulf %303, %301 : vector<16x64xf32>
      %cst_88 = arith.constant dense<0.000000e+00> : vector<64xf32>
      %305 = vector.multi_reduction <add>, %304, %cst_88 [0] : vector<16x64xf32> to vector<64xf32>
      %306 = vector.shape_cast %305 : vector<64xf32> to vector<1x64xf32>
      %307 = vector.broadcast %120 : vector<8x1xf32> to vector<8x64xf32>
      %308 = vector.broadcast %306 : vector<1x64xf32> to vector<8x64xf32>
      %309 = arith.mulf %307, %308 : vector<8x64xf32>
      %310 = arith.addf %299, %309 : vector<8x64xf32>
      %311 = arith.mulf %192, %301 : vector<16x64xf32>
      %312 = arith.addf %311, %232 : vector<16x64xf32>
      %313 = vector.extract_strided_slice %160 {offsets = [16, 7], sizes = [16, 1], strides = [1, 1]} : vector<32x8xf32> to vector<16x1xf32>
      %314 = vector.broadcast %313 : vector<16x1xf32> to vector<16x64xf32>
      %315 = arith.mulf %314, %312 : vector<16x64xf32>
      %cst_89 = arith.constant dense<0.000000e+00> : vector<64xf32>
      %316 = vector.multi_reduction <add>, %315, %cst_89 [0] : vector<16x64xf32> to vector<64xf32>
      %317 = vector.shape_cast %316 : vector<64xf32> to vector<1x64xf32>
      %318 = vector.broadcast %125 : vector<8x1xf32> to vector<8x64xf32>
      %319 = vector.broadcast %317 : vector<1x64xf32> to vector<8x64xf32>
      %320 = arith.mulf %318, %319 : vector<8x64xf32>
      %321 = arith.addf %310, %320 : vector<8x64xf32>
      %322 = arith.index_cast %152 : i32 to index
      %c0_90 = arith.constant 0 : index
      %323 = vector.load %arg21[%322, %c0_90] : memref<16x64xf32, #tpu.memory_space<vmem>>, vector<8x64xf32>
      tpu.vector_store %arg21[%322, %c0_90], %321 {strides = array<i32>} : memref<16x64xf32, #tpu.memory_space<vmem>>, vector<8x64xf32>,
      scf.yield %312 : vector<16x64xf32>
    }
    %c2_i32_61 = arith.constant 2 : i32
    %c0_62 = arith.constant 0 : index
    %c0_63 = arith.constant 0 : index
    %129 = vector.load %arg16[%c0_62, %c0_63] : memref<16x64xf32, #tpu.memory_space<vmem>>, vector<16x64xf32>
    tpu.vector_store %arg16[%c0_62, %c0_63], %128 {strides = array<i32>} : memref<16x64xf32, #tpu.memory_space<vmem>>, vector<16x64xf32>,
    %c0_64 = arith.constant 0 : index
    %c0_65 = arith.constant 0 : index
    %130 = vector.load %arg21[%c0_64, %c0_65] : memref<16x64xf32, #tpu.memory_space<vmem>>, vector<16x64xf32>
    %c0_66 = arith.constant 0 : index
    %c0_67 = arith.constant 0 : index
    %131 = vector.load %arg19[%c0_66, %c0_67] : memref<16x64xf32, #tpu.memory_space<vmem>>, vector<16x64xf32>
    %c0_68 = arith.constant 0 : index
    %c0_69 = arith.constant 0 : index
    %132 = vector.load %arg13[%c0_68, %c0_69] : memref<1x64xf32, #tpu.memory_space<vmem>>, vector<1x64xf32>
    %133 = vector.broadcast %132 : vector<1x64xf32> to vector<16x64xf32>
    %134 = arith.mulf %131, %133 : vector<16x64xf32>
    %135 = arith.addf %130, %134 : vector<16x64xf32>
    %136 = arith.negf %23 : vector<16x64xf32>
    %137 = math.exp %136 : vector<16x64xf32>
    %cst_70 = arith.constant 1.000000e+00 : f32
    %138 = vector.broadcast %cst_70 : f32 to vector<16x64xf32>
    %139 = arith.addf %138, %137 : vector<16x64xf32>
    %140 = arith.divf %138, %139 : vector<16x64xf32>
    %141 = arith.mulf %23, %140 : vector<16x64xf32>
    %142 = arith.mulf %135, %141 : vector<16x64xf32>
    %143 = arith.truncf %142 : vector<16x64xf32> to vector<16x64xbf16>
    %c0_71 = arith.constant 0 : index
    %c0_72 = arith.constant 0 : index
    %144 = vector.load %arg14[%c0_71, %c0_72] : memref<64x32xbf16, #tpu.memory_space<vmem>>, vector<64x32xbf16>
    %cst_73 = arith.constant dense<0.000000e+00> : vector<16x32xf32>
    %145 = tpu.matmul %143, %144, %cst_73 {dimension_numbers = #tpu.dot_dimension_numbers<[1], [0], [0], [1], [0, 0, 1, 1], [], []>} : vector<16x64xbf16>, vector<64x32xbf16>, vector<16x32xf32> -> vector<16x32xf32>
    %146 = arith.addf %145, %5 : vector<16x32xf32>
    %147 = arith.truncf %146 : vector<16x32xf32> to vector<16x32xbf16>
    %c0_74 = arith.constant 0 : index
    %c0_75 = arith.constant 0 : index
    %c0_76 = arith.constant 0 : index
    %148 = vector.load %arg15[%c0_74, %c0_75, %c0_76] : memref<1x16x32xbf16, #tpu.memory_space<vmem>>, vector<1x16x32xbf16>
    %149 = vector.shape_cast %148 : vector<1x16x32xbf16> to vector<16x32xbf16>
    %150 = vector.shape_cast %147 : vector<16x32xbf16> to vector<1x16x32xbf16>
    tpu.vector_store %arg15[%c0_74, %c0_75, %c0_76], %150 {strides = array<i32>} : memref<1x16x32xbf16, #tpu.memory_space<vmem>>, vector<1x16x32xbf16>,
    return
  }
  func.func @transform_0(%arg0: i32, %arg1: i32) -> (i32, i32, i32) {
    %c0_i32 = arith.constant 0 : i32
    %c0_i32_0 = arith.constant 0 : i32
    return %arg0, %arg1, %c0_i32 : i32, i32, i32
  }
  func.func @transform_1(%arg0: i32, %arg1: i32) -> (i32, i32) {
    %c0_i32 = arith.constant 0 : i32
    %c0_i32_0 = arith.constant 0 : i32
    %c0_i32_1 = arith.constant 0 : i32
    return %c0_i32, %c0_i32_0 : i32, i32
  }
  func.func @transform_2(%arg0: i32, %arg1: i32) -> (i32, i32) {
    %c0_i32 = arith.constant 0 : i32
    %c0_i32_0 = arith.constant 0 : i32
    %c0_i32_1 = arith.constant 0 : i32
    return %c0_i32, %c0_i32_0 : i32, i32
  }
  func.func @transform_3(%arg0: i32, %arg1: i32) -> (i32, i32) {
    %c0_i32 = arith.constant 0 : i32
    %c0_i32_0 = arith.constant 0 : i32
    %c0_i32_1 = arith.constant 0 : i32
    return %c0_i32, %c0_i32_0 : i32, i32
  }
  func.func @transform_4(%arg0: i32, %arg1: i32) -> (i32, i32) {
    %c0_i32 = arith.constant 0 : i32
    %c0_i32_0 = arith.constant 0 : i32
    %c0_i32_1 = arith.constant 0 : i32
    return %c0_i32, %c0_i32_0 : i32, i32
  }
  func.func @transform_5(%arg0: i32, %arg1: i32) -> (i32, i32) {
    %c0_i32 = arith.constant 0 : i32
    %c0_i32_0 = arith.constant 0 : i32
    %c0_i32_1 = arith.constant 0 : i32
    return %c0_i32, %c0_i32_0 : i32, i32
  }
  func.func @transform_6(%arg0: i32, %arg1: i32) -> (i32, i32) {
    %c0_i32 = arith.constant 0 : i32
    %c0_i32_0 = arith.constant 0 : i32
    %c0_i32_1 = arith.constant 0 : i32
    return %c0_i32, %c0_i32_0 : i32, i32
  }
  func.func @transform_7(%arg0: i32, %arg1: i32) -> (i32, i32) {
    %c0_i32 = arith.constant 0 : i32
    %c0_i32_0 = arith.constant 0 : i32
    %c0_i32_1 = arith.constant 0 : i32
    return %c0_i32, %c0_i32_0 : i32, i32
  }
  func.func @transform_8(%arg0: i32, %arg1: i32) -> (i32, i32) {
    %c0_i32 = arith.constant 0 : i32
    %c0_i32_0 = arith.constant 0 : i32
    %c0_i32_1 = arith.constant 0 : i32
    return %c0_i32, %c0_i32_0 : i32, i32
  }
  func.func @transform_9(%arg0: i32, %arg1: i32) -> (i32, i32) {
    %c0_i32 = arith.constant 0 : i32
    %c0_i32_0 = arith.constant 0 : i32
    %c0_i32_1 = arith.constant 0 : i32
    return %c0_i32, %c0_i32_0 : i32, i32
  }
  func.func @transform_10(%arg0: i32, %arg1: i32) -> (i32, i32) {
    %c0_i32 = arith.constant 0 : i32
    %c0_i32_0 = arith.constant 0 : i32
    %c0_i32_1 = arith.constant 0 : i32
    return %c0_i32, %c0_i32_0 : i32, i32
  }
  func.func @transform_11(%arg0: i32, %arg1: i32) -> (i32, i32) {
    %c0_i32 = arith.constant 0 : i32
    %c0_i32_0 = arith.constant 0 : i32
    %c0_i32_1 = arith.constant 0 : i32
    return %c0_i32, %c0_i32_0 : i32, i32
  }
  func.func @transform_12(%arg0: i32, %arg1: i32) -> (i32, i32) {
    %c0_i32 = arith.constant 0 : i32
    %c0_i32_0 = arith.constant 0 : i32
    %c0_i32_1 = arith.constant 0 : i32
    return %c0_i32, %c0_i32_0 : i32, i32
  }
  func.func @transform_13(%arg0: i32, %arg1: i32) -> (i32, i32, i32) {
    %c0_i32 = arith.constant 0 : i32
    %c0_i32_0 = arith.constant 0 : i32
    return %arg0, %arg1, %c0_i32 : i32, i32, i32
  }
}

module attributes {stable_mosaic.version = 11 : i64} {
  func.func @mamba_block_kernel(%arg0: i32, %arg1: i32, %arg2: memref<1x16x32xbf16, #tpu.memory_space<vmem>>, %arg3: memref<1x32xf32, #tpu.memory_space<vmem>>, %arg4: memref<32x64xbf16, #tpu.memory_space<vmem>>, %arg5: memref<32x64xbf16, #tpu.memory_space<vmem>>, %arg6: memref<4x64xf32, #tpu.memory_space<vmem>>, %arg7: memref<1x64xf32, #tpu.memory_space<vmem>>, %arg8: memref<64x128xbf16, #tpu.memory_space<vmem>>, %arg9: memref<32x64xbf16, #tpu.memory_space<vmem>>, %arg10: memref<128x64xbf16, #tpu.memory_space<vmem>>, %arg11: memref<1x64xf32, #tpu.memory_space<vmem>>, %arg12: memref<16x64xf32, #tpu.memory_space<vmem>>, %arg13: memref<1x64xf32, #tpu.memory_space<vmem>>, %arg14: memref<64x32xbf16, #tpu.memory_space<vmem>>, %arg15: memref<1x16x32xbf16, #tpu.memory_space<vmem>>, %arg16: memref<16x64xf32, #tpu.memory_space<vmem>>, %arg17: memref<24x64xf32, #tpu.memory_space<vmem>>, %arg18: memref<16x64xf32, #tpu.memory_space<vmem>>, %arg19: memref<16x64xf32, #tpu.memory_space<vmem>>, %arg20: memref<2x32x8xf32, #tpu.memory_space<vmem>>, %arg21: memref<16x64xf32, #tpu.memory_space<vmem>>) attributes {dimension_semantics = [#tpu.dimension_semantics<parallel>, #tpu.dimension_semantics<arbitrary>], iteration_bounds = array<i64: 2, 2>, scalar_prefetch = 0 : i64, scratch_operands = 6 : i64, tpu.core_type = #tpu.core_type<tc>, window_params = [{transform_indices = @transform_0, window_bounds = array<i64: 1, 16, 32>}, {pipeline_mode = #tpu.pipeline_mode<synchronous>, transform_indices = @transform_1, window_bounds = array<i64: 1, 32>}, {pipeline_mode = #tpu.pipeline_mode<synchronous>, transform_indices = @transform_2, window_bounds = array<i64: 32, 64>}, {pipeline_mode = #tpu.pipeline_mode<synchronous>, transform_indices = @transform_3, window_bounds = array<i64: 32, 64>}, {pipeline_mode = #tpu.pipeline_mode<synchronous>, transform_indices = @transform_4, window_bounds = array<i64: 4, 64>}, {pipeline_mode = #tpu.pipeline_mode<synchronous>, transform_indices = @transform_5, window_bounds = array<i64: 1, 64>}, {pipeline_mode = #tpu.pipeline_mode<synchronous>, transform_indices = @transform_6, window_bounds = array<i64: 64, 128>}, {pipeline_mode = #tpu.pipeline_mode<synchronous>, transform_indices = @transform_7, window_bounds = array<i64: 32, 64>}, {pipeline_mode = #tpu.pipeline_mode<synchronous>, transform_indices = @transform_8, window_bounds = array<i64: 128, 64>}, {pipeline_mode = #tpu.pipeline_mode<synchronous>, transform_indices = @transform_9, window_bounds = array<i64: 1, 64>}, {pipeline_mode = #tpu.pipeline_mode<synchronous>, transform_indices = @transform_10, window_bounds = array<i64: 16, 64>}, {pipeline_mode = #tpu.pipeline_mode<synchronous>, transform_indices = @transform_11, window_bounds = array<i64: 1, 64>}, {pipeline_mode = #tpu.pipeline_mode<synchronous>, transform_indices = @transform_12, window_bounds = array<i64: 64, 32>}, {transform_indices = @transform_13, window_bounds = array<i64: 1, 16, 32>}]} {
    %c0_i32 = arith.constant 0 : i32
    %0 = arith.cmpi eq, %arg1, %c0_i32 : i32
    %1 = arith.extui %0 : i1 to i32
    %c0_i32_0 = arith.constant 0 : i32
    %2 = arith.cmpi ne, %1, %c0_i32_0 : i32
    scf.if %2 {
      %cst_77 = arith.constant 0.000000e+00 : f32
      %151 = vector.broadcast %cst_77 : f32 to vector<16x64xf32>
      %c0_78 = arith.constant 0 : index
      %c0_79 = arith.constant 0 : index
      %152 = vector.load %arg16[%c0_78, %c0_79] : memref<16x64xf32, #tpu.memory_space<vmem>>, vector<16x64xf32>
      tpu.vector_store %arg16[%c0_78, %c0_79], %151 {strides = array<i32>} : memref<16x64xf32, #tpu.memory_space<vmem>>, vector<16x64xf32>,
      %cst_80 = arith.constant 0.000000e+00 : f32
      %153 = vector.broadcast %cst_80 : f32 to vector<24x64xf32>
      %c0_81 = arith.constant 0 : index
      %c0_82 = arith.constant 0 : index
      %154 = vector.load %arg17[%c0_81, %c0_82] : memref<24x64xf32, #tpu.memory_space<vmem>>, vector<24x64xf32>
      tpu.vector_store %arg17[%c0_81, %c0_82], %153 {strides = array<i32>} : memref<24x64xf32, #tpu.memory_space<vmem>>, vector<24x64xf32>,
    } else {
    }
    %c0 = arith.constant 0 : index
    %c0_1 = arith.constant 0 : index
    %c0_2 = arith.constant 0 : index
    %3 = vector.load %arg2[%c0, %c0_1, %c0_2] : memref<1x16x32xbf16, #tpu.memory_space<vmem>>, vector<1x16x32xbf16>
    %4 = vector.shape_cast %3 : vector<1x16x32xbf16> to vector<16x32xbf16>
    %5 = arith.extf %4 : vector<16x32xbf16> to vector<16x32xf32>
    %6 = arith.mulf %5, %5 : vector<16x32xf32>
    %cst = arith.constant dense<0.000000e+00> : vector<16xf32>
    %7 = vector.multi_reduction <add>, %6, %cst [1] : vector<16x32xf32> to vector<16xf32>
    %8 = vector.shape_cast %7 : vector<16xf32> to vector<16x1xf32>
    %cst_3 = arith.constant 3.200000e+01 : f32
    %9 = vector.broadcast %cst_3 : f32 to vector<16x1xf32>
    %10 = arith.divf %8, %9 : vector<16x1xf32>
    %cst_4 = arith.constant 9.99999974E-6 : f32
    %11 = vector.broadcast %cst_4 : f32 to vector<16x1xf32>
    %12 = arith.addf %10, %11 : vector<16x1xf32>
    %13 = math.rsqrt %12 : vector<16x1xf32>
    %14 = vector.broadcast %13 : vector<16x1xf32> to vector<16x32xf32>
    %15 = arith.mulf %5, %14 : vector<16x32xf32>
    %c0_5 = arith.constant 0 : index
    %c0_6 = arith.constant 0 : index
    %16 = vector.load %arg3[%c0_5, %c0_6] : memref<1x32xf32, #tpu.memory_space<vmem>>, vector<1x32xf32>
    %17 = vector.broadcast %16 : vector<1x32xf32> to vector<16x32xf32>
    %18 = arith.mulf %15, %17 : vector<16x32xf32>
    %19 = arith.truncf %18 : vector<16x32xf32> to vector<16x32xbf16>
    %c0_7 = arith.constant 0 : index
    %c0_8 = arith.constant 0 : index
    %20 = vector.load %arg4[%c0_7, %c0_8] : memref<32x64xbf16, #tpu.memory_space<vmem>>, vector<32x64xbf16>
    %cst_9 = arith.constant dense<0.000000e+00> : vector<16x64xf32>
    %21 = tpu.matmul %19, %20, %cst_9 {dimension_numbers = #tpu.dot_dimension_numbers<[1], [0], [0], [1], [0, 0, 1, 1], [], []>} : vector<16x32xbf16>, vector<32x64xbf16>, vector<16x64xf32> -> vector<16x64xf32>
    %c0_10 = arith.constant 0 : index
    %c0_11 = arith.constant 0 : index
    %22 = vector.load %arg5[%c0_10, %c0_11] : memref<32x64xbf16, #tpu.memory_space<vmem>>, vector<32x64xbf16>
    %cst_12 = arith.constant dense<0.000000e+00> : vector<16x64xf32>
    %23 = tpu.matmul %19, %22, %cst_12 {dimension_numbers = #tpu.dot_dimension_numbers<[1], [0], [0], [1], [0, 0, 1, 1], [], []>} : vector<16x32xbf16>, vector<32x64xbf16>, vector<16x64xf32> -> vector<16x64xf32>
    %c8 = arith.constant 8 : index
    %c0_13 = arith.constant 0 : index
    %24 = vector.load %arg17[%c8, %c0_13] : memref<24x64xf32, #tpu.memory_space<vmem>>, vector<16x64xf32>
    tpu.vector_store %arg17[%c8, %c0_13], %21 {strides = array<i32>} : memref<24x64xf32, #tpu.memory_space<vmem>>, vector<16x64xf32>,
    %c0_14 = arith.constant 0 : index
    %c0_15 = arith.constant 0 : index
    %25 = vector.load %arg7[%c0_14, %c0_15] : memref<1x64xf32, #tpu.memory_space<vmem>>, vector<1x64xf32>
    %cst_16 = arith.constant 0.000000e+00 : f32
    %26 = vector.broadcast %cst_16 : f32 to vector<16x64xf32>
    %27 = vector.broadcast %25 : vector<1x64xf32> to vector<16x64xf32>
    %28 = arith.addf %27, %26 : vector<16x64xf32>
    %c0_17 = arith.constant 0 : index
    %c0_18 = arith.constant 0 : index
    %29 = vector.load %arg6[%c0_17, %c0_18] : memref<4x64xf32, #tpu.memory_space<vmem>>, vector<1x64xf32>
    %c5 = arith.constant 5 : index
    %c0_19 = arith.constant 0 : index
    %30 = vector.load %arg17[%c5, %c0_19] : memref<24x64xf32, #tpu.memory_space<vmem>>, vector<16x64xf32>
    %31 = vector.broadcast %29 : vector<1x64xf32> to vector<16x64xf32>
    %32 = arith.mulf %31, %30 : vector<16x64xf32>
    %33 = arith.addf %28, %32 : vector<16x64xf32>
    %c1 = arith.constant 1 : index
    %c0_20 = arith.constant 0 : index
    %34 = vector.load %arg6[%c1, %c0_20] : memref<4x64xf32, #tpu.memory_space<vmem>>, vector<1x64xf32>
    %c6 = arith.constant 6 : index
    %c0_21 = arith.constant 0 : index
    %35 = vector.load %arg17[%c6, %c0_21] : memref<24x64xf32, #tpu.memory_space<vmem>>, vector<16x64xf32>
    %36 = vector.broadcast %34 : vector<1x64xf32> to vector<16x64xf32>
    %37 = arith.mulf %36, %35 : vector<16x64xf32>
    %38 = arith.addf %33, %37 : vector<16x64xf32>
    %c2 = arith.constant 2 : index
    %c0_22 = arith.constant 0 : index
    %39 = vector.load %arg6[%c2, %c0_22] : memref<4x64xf32, #tpu.memory_space<vmem>>, vector<1x64xf32>
    %c7 = arith.constant 7 : index
    %c0_23 = arith.constant 0 : index
    %40 = vector.load %arg17[%c7, %c0_23] : memref<24x64xf32, #tpu.memory_space<vmem>>, vector<16x64xf32>
    %41 = vector.broadcast %39 : vector<1x64xf32> to vector<16x64xf32>
    %42 = arith.mulf %41, %40 : vector<16x64xf32>
    %43 = arith.addf %38, %42 : vector<16x64xf32>
    %c3 = arith.constant 3 : index
    %c0_24 = arith.constant 0 : index
    %44 = vector.load %arg6[%c3, %c0_24] : memref<4x64xf32, #tpu.memory_space<vmem>>, vector<1x64xf32>
    %c8_25 = arith.constant 8 : index
    %c0_26 = arith.constant 0 : index
    %45 = vector.load %arg17[%c8_25, %c0_26] : memref<24x64xf32, #tpu.memory_space<vmem>>, vector<16x64xf32>
    %46 = vector.broadcast %44 : vector<1x64xf32> to vector<16x64xf32>
    %47 = arith.mulf %46, %45 : vector<16x64xf32>
    %48 = arith.addf %43, %47 : vector<16x64xf32>
    %49 = vector.extract_strided_slice %21 {offsets = [13, 0], sizes = [3, 64], strides = [1, 1]} : vector<16x64xf32> to vector<3x64xf32>
    %c5_27 = arith.constant 5 : index
    %c0_28 = arith.constant 0 : index
    %50 = vector.load %arg17[%c5_27, %c0_28] : memref<24x64xf32, #tpu.memory_space<vmem>>, vector<3x64xf32>
    tpu.vector_store %arg17[%c5_27, %c0_28], %49 {strides = array<i32>} : memref<24x64xf32, #tpu.memory_space<vmem>>, vector<3x64xf32>,
    %51 = arith.negf %48 : vector<16x64xf32>
    %52 = math.exp %51 : vector<16x64xf32>
    %cst_29 = arith.constant 1.000000e+00 : f32
    %53 = vector.broadcast %cst_29 : f32 to vector<16x64xf32>
    %54 = arith.addf %53, %52 : vector<16x64xf32>
    %55 = arith.divf %53, %54 : vector<16x64xf32>
    %56 = arith.mulf %48, %55 : vector<16x64xf32>
    %57 = arith.truncf %56 : vector<16x64xf32> to vector<16x64xbf16>
    %c0_30 = arith.constant 0 : index
    %c0_31 = arith.constant 0 : index
    %58 = vector.load %arg8[%c0_30, %c0_31] : memref<64x128xbf16, #tpu.memory_space<vmem>>, vector<64x128xbf16>
    %cst_32 = arith.constant dense<0.000000e+00> : vector<16x128xf32>
    %59 = tpu.matmul %57, %58, %cst_32 {dimension_numbers = #tpu.dot_dimension_numbers<[1], [0], [0], [1], [0, 0, 1, 1], [], []>} : vector<16x64xbf16>, vector<64x128xbf16>, vector<16x128xf32> -> vector<16x128xf32>
    %c0_33 = arith.constant 0 : index
    %c0_34 = arith.constant 0 : index
    %60 = vector.load %arg9[%c0_33, %c0_34] : memref<32x64xbf16, #tpu.memory_space<vmem>>, vector<32x64xbf16>
    %cst_35 = arith.constant dense<0.000000e+00> : vector<32x16xf32>
    %61 = tpu.matmul %60, %57, %cst_35 {dimension_numbers = #tpu.dot_dimension_numbers<[1], [1], [0], [0], [0, 0, 1, 0], [], []>} : vector<32x64xbf16>, vector<16x64xbf16>, vector<32x16xf32> -> vector<32x16xf32>
    %62 = arith.truncf %59 : vector<16x128xf32> to vector<16x128xbf16>
    %c0_36 = arith.constant 0 : index
    %c0_37 = arith.constant 0 : index
    %63 = vector.load %arg10[%c0_36, %c0_37] : memref<128x64xbf16, #tpu.memory_space<vmem>>, vector<128x64xbf16>
    %cst_38 = arith.constant dense<0.000000e+00> : vector<16x64xf32>
    %64 = tpu.matmul %62, %63, %cst_38 {dimension_numbers = #tpu.dot_dimension_numbers<[1], [0], [0], [1], [0, 0, 1, 1], [], []>} : vector<16x128xbf16>, vector<128x64xbf16>, vector<16x64xf32> -> vector<16x64xf32>
    %c0_39 = arith.constant 0 : index
    %c0_40 = arith.constant 0 : index
    %65 = vector.load %arg11[%c0_39, %c0_40] : memref<1x64xf32, #tpu.memory_space<vmem>>, vector<1x64xf32>
    %66 = vector.broadcast %65 : vector<1x64xf32> to vector<16x64xf32>
    %67 = arith.addf %64, %66 : vector<16x64xf32>
    %cst_41 = arith.constant 2.000000e+01 : f32
    %68 = vector.broadcast %cst_41 : f32 to vector<16x64xf32>
    %69 = arith.cmpf ogt, %67, %68 : vector<16x64xf32>
    %cst_42 = arith.constant 2.000000e+01 : f32
    %70 = vector.broadcast %cst_42 : f32 to vector<16x64xf32>
    %71 = arith.minimumf %67, %70 : vector<16x64xf32>
    %72 = math.exp %71 : vector<16x64xf32>
    %73 = math.log1p %72 : vector<16x64xf32>
    %74 = arith.select %69, %67, %73 : vector<16x64xi1>, vector<16x64xf32>
    %c0_43 = arith.constant 0 : index
    %c0_44 = arith.constant 0 : index
    %75 = vector.load %arg18[%c0_43, %c0_44] : memref<16x64xf32, #tpu.memory_space<vmem>>, vector<16x64xf32>
    tpu.vector_store %arg18[%c0_43, %c0_44], %74 {strides = array<i32>} : memref<16x64xf32, #tpu.memory_space<vmem>>, vector<16x64xf32>,
    %c0_45 = arith.constant 0 : index
    %c0_46 = arith.constant 0 : index
    %76 = vector.load %arg19[%c0_45, %c0_46] : memref<16x64xf32, #tpu.memory_space<vmem>>, vector<16x64xf32>
    tpu.vector_store %arg19[%c0_45, %c0_46], %56 {strides = array<i32>} : memref<16x64xf32, #tpu.memory_space<vmem>>, vector<16x64xf32>,
    %77 = vector.extract_strided_slice %61 {offsets = [0, 0], sizes = [32, 8], strides = [1, 1]} : vector<32x16xf32> to vector<32x8xf32>
    %c0_47 = arith.constant 0 : index
    %c0_48 = arith.constant 0 : index
    %c0_49 = arith.constant 0 : index
    %78 = vector.load %arg20[%c0_47, %c0_48, %c0_49] : memref<2x32x8xf32, #tpu.memory_space<vmem>>, vector<1x32x8xf32>
    %79 = vector.shape_cast %78 : vector<1x32x8xf32> to vector<32x8xf32>
    %80 = vector.shape_cast %77 : vector<32x8xf32> to vector<1x32x8xf32>
    tpu.vector_store %arg20[%c0_47, %c0_48, %c0_49], %80 {strides = array<i32>} : memref<2x32x8xf32, #tpu.memory_space<vmem>>, vector<1x32x8xf32>,
    %81 = vector.extract_strided_slice %61 {offsets = [0, 8], sizes = [32, 8], strides = [1, 1]} : vector<32x16xf32> to vector<32x8xf32>
    %c1_50 = arith.constant 1 : index
    %c0_51 = arith.constant 0 : index
    %c0_52 = arith.constant 0 : index
    %82 = vector.load %arg20[%c1_50, %c0_51, %c0_52] : memref<2x32x8xf32, #tpu.memory_space<vmem>>, vector<1x32x8xf32>
    %83 = vector.shape_cast %82 : vector<1x32x8xf32> to vector<32x8xf32>
    %84 = vector.shape_cast %81 : vector<32x8xf32> to vector<1x32x8xf32>
    tpu.vector_store %arg20[%c1_50, %c0_51, %c0_52], %84 {strides = array<i32>} : memref<2x32x8xf32, #tpu.memory_space<vmem>>, vector<1x32x8xf32>,
    %c0_53 = arith.constant 0 : index
    %c0_54 = arith.constant 0 : index
    %85 = vector.load %arg12[%c0_53, %c0_54] : memref<16x64xf32, #tpu.memory_space<vmem>>, vector<16x64xf32>
    %86 = tpu.iota {dimensions = array<i32: 0>} : vector<8x1xi32>
    %c0_i32_55 = arith.constant 0 : i32
    %87 = vector.broadcast %c0_i32_55 : i32 to vector<8x1xi32>
    %88 = arith.cmpi eq, %86, %87 : vector<8x1xi32>
    %89 = arith.extui %88 : vector<8x1xi1> to vector<8x1xi32>
    %90 = arith.sitofp %89 : vector<8x1xi32> to vector<8x1xf32>
    %91 = tpu.iota {dimensions = array<i32: 0>} : vector<8x1xi32>
    %c1_i32 = arith.constant 1 : i32
    %92 = vector.broadcast %c1_i32 : i32 to vector<8x1xi32>
    %93 = arith.cmpi eq, %91, %92 : vector<8x1xi32>
    %94 = arith.extui %93 : vector<8x1xi1> to vector<8x1xi32>
    %95 = arith.sitofp %94 : vector<8x1xi32> to vector<8x1xf32>
    %96 = tpu.iota {dimensions = array<i32: 0>} : vector<8x1xi32>
    %c2_i32 = arith.constant 2 : i32
    %97 = vector.broadcast %c2_i32 : i32 to vector<8x1xi32>
    %98 = arith.cmpi eq, %96, %97 : vector<8x1xi32>
    %99 = arith.extui %98 : vector<8x1xi1> to vector<8x1xi32>
    %100 = arith.sitofp %99 : vector<8x1xi32> to vector<8x1xf32>
    %101 = tpu.iota {dimensions = array<i32: 0>} : vector<8x1xi32>
    %c3_i32 = arith.constant 3 : i32
    %102 = vector.broadcast %c3_i32 : i32 to vector<8x1xi32>
    %103 = arith.cmpi eq, %101, %102 : vector<8x1xi32>
    %104 = arith.extui %103 : vector<8x1xi1> to vector<8x1xi32>
    %105 = arith.sitofp %104 : vector<8x1xi32> to vector<8x1xf32>
    %106 = tpu.iota {dimensions = array<i32: 0>} : vector<8x1xi32>
    %c4_i32 = arith.constant 4 : i32
    %107 = vector.broadcast %c4_i32 : i32 to vector<8x1xi32>
    %108 = arith.cmpi eq, %106, %107 : vector<8x1xi32>
    %109 = arith.extui %108 : vector<8x1xi1> to vector<8x1xi32>
    %110 = arith.sitofp %109 : vector<8x1xi32> to vector<8x1xf32>
    %111 = tpu.iota {dimensions = array<i32: 0>} : vector<8x1xi32>
    %c5_i32 = arith.constant 5 : i32
    %112 = vector.broadcast %c5_i32 : i32 to vector<8x1xi32>
    %113 = arith.cmpi eq, %111, %112 : vector<8x1xi32>
    %114 = arith.extui %113 : vector<8x1xi1> to vector<8x1xi32>
    %115 = arith.sitofp %114 : vector<8x1xi32> to vector<8x1xf32>
    %116 = tpu.iota {dimensions = array<i32: 0>} : vector<8x1xi32>
    %c6_i32 = arith.constant 6 : i32
    %117 = vector.broadcast %c6_i32 : i32 to vector<8x1xi32>
    %118 = arith.cmpi eq, %116, %117 : vector<8x1xi32>
    %119 = arith.extui %118 : vector<8x1xi1> to vector<8x1xi32>
    %120 = arith.sitofp %119 : vector<8x1xi32> to vector<8x1xf32>
    %121 = tpu.iota {dimensions = array<i32: 0>} : vector<8x1xi32>
    %c7_i32 = arith.constant 7 : i32
    %122 = vector.broadcast %c7_i32 : i32 to vector<8x1xi32>
    %123 = arith.cmpi eq, %121, %122 : vector<8x1xi32>
    %124 = arith.extui %123 : vector<8x1xi1> to vector<8x1xi32>
    %125 = arith.sitofp %124 : vector<8x1xi32> to vector<8x1xf32>
    %c0_56 = arith.constant 0 : index
    %c0_57 = arith.constant 0 : index
    %126 = vector.load %arg16[%c0_56, %c0_57] : memref<16x64xf32, #tpu.memory_space<vmem>>, vector<16x64xf32>
    %c0_i32_58 = arith.constant 0 : i32
    %c2_i32_59 = arith.constant 2 : i32
    %127 = arith.addi %c0_i32_58, %c2_i32_59 : i32
    %c1_i32_60 = arith.constant 1 : i32
    %128 = scf.for %arg22 = %c0_i32_58 to %127 step %c1_i32_60 iter_args(%arg23 = %126) -> (vector<16x64xf32>)  : i32 {
      %c8_i32 = arith.constant 8 : i32
      %151 = arith.muli %arg22, %c8_i32 : i32
      %152 = tpu.assume_multiple %151, 8 : i32
      %153 = arith.index_cast %152 : i32 to index
      %c0_77 = arith.constant 0 : index
      %154 = vector.load %arg18[%153, %c0_77] : memref<16x64xf32, #tpu.memory_space<vmem>>, vector<8x64xf32>
      %155 = arith.index_cast %152 : i32 to index
      %c0_78 = arith.constant 0 : index
      %156 = vector.load %arg19[%155, %c0_78] : memref<16x64xf32, #tpu.memory_space<vmem>>, vector<8x64xf32>
      %157 = arith.mulf %154, %156 : vector<8x64xf32>
      %158 = arith.index_cast %arg22 : i32 to index
      %c0_79 = arith.constant 0 : index
      %c0_80 = arith.constant 0 : index
      %159 = vector.load %arg20[%158, %c0_79, %c0_80] : memref<2x32x8xf32, #tpu.memory_space<vmem>>, vector<1x32x8xf32>
      %160 = vector.shape_cast %159 : vector<1x32x8xf32> to vector<32x8xf32>
      %161 = vector.extract_strided_slice %154 {offsets = [0, 0], sizes = [1, 64], strides = [1, 1]} : vector<8x64xf32> to vector<1x64xf32>
      %162 = vector.broadcast %161 : vector<1x64xf32> to vector<16x64xf32>
      %163 = arith.mulf %162, %85 : vector<16x64xf32>
      %164 = math.exp %163 : vector<16x64xf32>
      %165 = vector.extract_strided_slice %154 {offsets = [1, 0], sizes = [1, 64], strides = [1, 1]} : vector<8x64xf32> to vector<1x64xf32>
      %166 = vector.broadcast %165 : vector<1x64xf32> to vector<16x64xf32>
      %167 = arith.mulf %166, %85 : vector<16x64xf32>
      %168 = math.exp %167 : vector<16x64xf32>
      %169 = vector.extract_strided_slice %154 {offsets = [2, 0], sizes = [1, 64], strides = [1, 1]} : vector<8x64xf32> to vector<1x64xf32>
      %170 = vector.broadcast %169 : vector<1x64xf32> to vector<16x64xf32>
      %171 = arith.mulf %170, %85 : vector<16x64xf32>
      %172 = math.exp %171 : vector<16x64xf32>
      %173 = vector.extract_strided_slice %154 {offsets = [3, 0], sizes = [1, 64], strides = [1, 1]} : vector<8x64xf32> to vector<1x64xf32>
      %174 = vector.broadcast %173 : vector<1x64xf32> to vector<16x64xf32>
      %175 = arith.mulf %174, %85 : vector<16x64xf32>
      %176 = math.exp %175 : vector<16x64xf32>
      %177 = vector.extract_strided_slice %154 {offsets = [4, 0], sizes = [1, 64], strides = [1, 1]} : vector<8x64xf32> to vector<1x64xf32>
      %178 = vector.broadcast %177 : vector<1x64xf32> to vector<16x64xf32>
      %179 = arith.mulf %178, %85 : vector<16x64xf32>
      %180 = math.exp %179 : vector<16x64xf32>
      %181 = vector.extract_strided_slice %154 {offsets = [5, 0], sizes = [1, 64], strides = [1, 1]} : vector<8x64xf32> to vector<1x64xf32>
      %182 = vector.broadcast %181 : vector<1x64xf32> to vector<16x64xf32>
      %183 = arith.mulf %182, %85 : vector<16x64xf32>
      %184 = math.exp %183 : vector<16x64xf32>
      %185 = vector.extract_strided_slice %154 {offsets = [6, 0], sizes = [1, 64], strides = [1, 1]} : vector<8x64xf32> to vector<1x64xf32>
      %186 = vector.broadcast %185 : vector<1x64xf32> to vector<16x64xf32>
      %187 = arith.mulf %186, %85 : vector<16x64xf32>
      %188 = math.exp %187 : vector<16x64xf32>
      %189 = vector.extract_strided_slice %154 {offsets = [7, 0], sizes = [1, 64], strides = [1, 1]} : vector<8x64xf32> to vector<1x64xf32>
      %190 = vector.broadcast %189 : vector<1x64xf32> to vector<16x64xf32>
      %191 = arith.mulf %190, %85 : vector<16x64xf32>
      %192 = math.exp %191 : vector<16x64xf32>
      %193 = vector.extract_strided_slice %160 {offsets = [0, 0], sizes = [16, 1], strides = [1, 1]} : vector<32x8xf32> to vector<16x1xf32>
      %194 = vector.extract_strided_slice %157 {offsets = [0, 0], sizes = [1, 64], strides = [1, 1]} : vector<8x64xf32> to vector<1x64xf32>
      %195 = vector.broadcast %193 : vector<16x1xf32> to vector<16x64xf32>
      %196 = vector.broadcast %194 : vector<1x64xf32> to vector<16x64xf32>
      %197 = arith.mulf %195, %196 : vector<16x64xf32>
      %198 = vector.extract_strided_slice %160 {offsets = [0, 1], sizes = [16, 1], strides = [1, 1]} : vector<32x8xf32> to vector<16x1xf32>
      %199 = vector.extract_strided_slice %157 {offsets = [1, 0], sizes = [1, 64], strides = [1, 1]} : vector<8x64xf32> to vector<1x64xf32>
      %200 = vector.broadcast %198 : vector<16x1xf32> to vector<16x64xf32>
      %201 = vector.broadcast %199 : vector<1x64xf32> to vector<16x64xf32>
      %202 = arith.mulf %200, %201 : vector<16x64xf32>
      %203 = vector.extract_strided_slice %160 {offsets = [0, 2], sizes = [16, 1], strides = [1, 1]} : vector<32x8xf32> to vector<16x1xf32>
      %204 = vector.extract_strided_slice %157 {offsets = [2, 0], sizes = [1, 64], strides = [1, 1]} : vector<8x64xf32> to vector<1x64xf32>
      %205 = vector.broadcast %203 : vector<16x1xf32> to vector<16x64xf32>
      %206 = vector.broadcast %204 : vector<1x64xf32> to vector<16x64xf32>
      %207 = arith.mulf %205, %206 : vector<16x64xf32>
      %208 = vector.extract_strided_slice %160 {offsets = [0, 3], sizes = [16, 1], strides = [1, 1]} : vector<32x8xf32> to vector<16x1xf32>
      %209 = vector.extract_strided_slice %157 {offsets = [3, 0], sizes = [1, 64], strides = [1, 1]} : vector<8x64xf32> to vector<1x64xf32>
      %210 = vector.broadcast %208 : vector<16x1xf32> to vector<16x64xf32>
      %211 = vector.broadcast %209 : vector<1x64xf32> to vector<16x64xf32>
      %212 = arith.mulf %210, %211 : vector<16x64xf32>
      %213 = vector.extract_strided_slice %160 {offsets = [0, 4], sizes = [16, 1], strides = [1, 1]} : vector<32x8xf32> to vector<16x1xf32>
      %214 = vector.extract_strided_slice %157 {offsets = [4, 0], sizes = [1, 64], strides = [1, 1]} : vector<8x64xf32> to vector<1x64xf32>
      %215 = vector.broadcast %213 : vector<16x1xf32> to vector<16x64xf32>
      %216 = vector.broadcast %214 : vector<1x64xf32> to vector<16x64xf32>
      %217 = arith.mulf %215, %216 : vector<16x64xf32>
      %218 = vector.extract_strided_slice %160 {offsets = [0, 5], sizes = [16, 1], strides = [1, 1]} : vector<32x8xf32> to vector<16x1xf32>
      %219 = vector.extract_strided_slice %157 {offsets = [5, 0], sizes = [1, 64], strides = [1, 1]} : vector<8x64xf32> to vector<1x64xf32>
      %220 = vector.broadcast %218 : vector<16x1xf32> to vector<16x64xf32>
      %221 = vector.broadcast %219 : vector<1x64xf32> to vector<16x64xf32>
      %222 = arith.mulf %220, %221 : vector<16x64xf32>
      %223 = vector.extract_strided_slice %160 {offsets = [0, 6], sizes = [16, 1], strides = [1, 1]} : vector<32x8xf32> to vector<16x1xf32>
      %224 = vector.extract_strided_slice %157 {offsets = [6, 0], sizes = [1, 64], strides = [1, 1]} : vector<8x64xf32> to vector<1x64xf32>
      %225 = vector.broadcast %223 : vector<16x1xf32> to vector<16x64xf32>
      %226 = vector.broadcast %224 : vector<1x64xf32> to vector<16x64xf32>
      %227 = arith.mulf %225, %226 : vector<16x64xf32>
      %228 = vector.extract_strided_slice %160 {offsets = [0, 7], sizes = [16, 1], strides = [1, 1]} : vector<32x8xf32> to vector<16x1xf32>
      %229 = vector.extract_strided_slice %157 {offsets = [7, 0], sizes = [1, 64], strides = [1, 1]} : vector<8x64xf32> to vector<1x64xf32>
      %230 = vector.broadcast %228 : vector<16x1xf32> to vector<16x64xf32>
      %231 = vector.broadcast %229 : vector<1x64xf32> to vector<16x64xf32>
      %232 = arith.mulf %230, %231 : vector<16x64xf32>
      %cst_81 = arith.constant 0.000000e+00 : f32
      %233 = vector.broadcast %cst_81 : f32 to vector<8x64xf32>
      %234 = arith.mulf %164, %arg23 : vector<16x64xf32>
      %235 = arith.addf %234, %197 : vector<16x64xf32>
      %236 = vector.extract_strided_slice %160 {offsets = [16, 0], sizes = [16, 1], strides = [1, 1]} : vector<32x8xf32> to vector<16x1xf32>
      %237 = vector.broadcast %236 : vector<16x1xf32> to vector<16x64xf32>
      %238 = arith.mulf %237, %235 : vector<16x64xf32>
      %cst_82 = arith.constant dense<0.000000e+00> : vector<64xf32>
      %239 = vector.multi_reduction <add>, %238, %cst_82 [0] : vector<16x64xf32> to vector<64xf32>
      %240 = vector.shape_cast %239 : vector<64xf32> to vector<1x64xf32>
      %241 = vector.broadcast %90 : vector<8x1xf32> to vector<8x64xf32>
      %242 = vector.broadcast %240 : vector<1x64xf32> to vector<8x64xf32>
      %243 = arith.mulf %241, %242 : vector<8x64xf32>
      %244 = arith.addf %233, %243 : vector<8x64xf32>
      %245 = arith.mulf %168, %235 : vector<16x64xf32>
      %246 = arith.addf %245, %202 : vector<16x64xf32>
      %247 = vector.extract_strided_slice %160 {offsets = [16, 1], sizes = [16, 1], strides = [1, 1]} : vector<32x8xf32> to vector<16x1xf32>
      %248 = vector.broadcast %247 : vector<16x1xf32> to vector<16x64xf32>
      %249 = arith.mulf %248, %246 : vector<16x64xf32>
      %cst_83 = arith.constant dense<0.000000e+00> : vector<64xf32>
      %250 = vector.multi_reduction <add>, %249, %cst_83 [0] : vector<16x64xf32> to vector<64xf32>
      %251 = vector.shape_cast %250 : vector<64xf32> to vector<1x64xf32>
      %252 = vector.broadcast %95 : vector<8x1xf32> to vector<8x64xf32>
      %253 = vector.broadcast %251 : vector<1x64xf32> to vector<8x64xf32>
      %254 = arith.mulf %252, %253 : vector<8x64xf32>
      %255 = arith.addf %244, %254 : vector<8x64xf32>
      %256 = arith.mulf %172, %246 : vector<16x64xf32>
      %257 = arith.addf %256, %207 : vector<16x64xf32>
      %258 = vector.extract_strided_slice %160 {offsets = [16, 2], sizes = [16, 1], strides = [1, 1]} : vector<32x8xf32> to vector<16x1xf32>
      %259 = vector.broadcast %258 : vector<16x1xf32> to vector<16x64xf32>
      %260 = arith.mulf %259, %257 : vector<16x64xf32>
      %cst_84 = arith.constant dense<0.000000e+00> : vector<64xf32>
      %261 = vector.multi_reduction <add>, %260, %cst_84 [0] : vector<16x64xf32> to vector<64xf32>
      %262 = vector.shape_cast %261 : vector<64xf32> to vector<1x64xf32>
      %263 = vector.broadcast %100 : vector<8x1xf32> to vector<8x64xf32>
      %264 = vector.broadcast %262 : vector<1x64xf32> to vector<8x64xf32>
      %265 = arith.mulf %263, %264 : vector<8x64xf32>
      %266 = arith.addf %255, %265 : vector<8x64xf32>
      %267 = arith.mulf %176, %257 : vector<16x64xf32>
      %268 = arith.addf %267, %212 : vector<16x64xf32>
      %269 = vector.extract_strided_slice %160 {offsets = [16, 3], sizes = [16, 1], strides = [1, 1]} : vector<32x8xf32> to vector<16x1xf32>
      %270 = vector.broadcast %269 : vector<16x1xf32> to vector<16x64xf32>
      %271 = arith.mulf %270, %268 : vector<16x64xf32>
      %cst_85 = arith.constant dense<0.000000e+00> : vector<64xf32>
      %272 = vector.multi_reduction <add>, %271, %cst_85 [0] : vector<16x64xf32> to vector<64xf32>
      %273 = vector.shape_cast %272 : vector<64xf32> to vector<1x64xf32>
      %274 = vector.broadcast %105 : vector<8x1xf32> to vector<8x64xf32>
      %275 = vector.broadcast %273 : vector<1x64xf32> to vector<8x64xf32>
      %276 = arith.mulf %274, %275 : vector<8x64xf32>
      %277 = arith.addf %266, %276 : vector<8x64xf32>
      %278 = arith.mulf %180, %268 : vector<16x64xf32>
      %279 = arith.addf %278, %217 : vector<16x64xf32>
      %280 = vector.extract_strided_slice %160 {offsets = [16, 4], sizes = [16, 1], strides = [1, 1]} : vector<32x8xf32> to vector<16x1xf32>
      %281 = vector.broadcast %280 : vector<16x1xf32> to vector<16x64xf32>
      %282 = arith.mulf %281, %279 : vector<16x64xf32>
      %cst_86 = arith.constant dense<0.000000e+00> : vector<64xf32>
      %283 = vector.multi_reduction <add>, %282, %cst_86 [0] : vector<16x64xf32> to vector<64xf32>
      %284 = vector.shape_cast %283 : vector<64xf32> to vector<1x64xf32>
      %285 = vector.broadcast %110 : vector<8x1xf32> to vector<8x64xf32>
      %286 = vector.broadcast %284 : vector<1x64xf32> to vector<8x64xf32>
      %287 = arith.mulf %285, %286 : vector<8x64xf32>
      %288 = arith.addf %277, %287 : vector<8x64xf32>
      %289 = arith.mulf %184, %279 : vector<16x64xf32>
      %290 = arith.addf %289, %222 : vector<16x64xf32>
      %291 = vector.extract_strided_slice %160 {offsets = [16, 5], sizes = [16, 1], strides = [1, 1]} : vector<32x8xf32> to vector<16x1xf32>
      %292 = vector.broadcast %291 : vector<16x1xf32> to vector<16x64xf32>
      %293 = arith.mulf %292, %290 : vector<16x64xf32>
      %cst_87 = arith.constant dense<0.000000e+00> : vector<64xf32>
      %294 = vector.multi_reduction <add>, %293, %cst_87 [0] : vector<16x64xf32> to vector<64xf32>
      %295 = vector.shape_cast %294 : vector<64xf32> to vector<1x64xf32>
      %296 = vector.broadcast %115 : vector<8x1xf32> to vector<8x64xf32>
      %297 = vector.broadcast %295 : vector<1x64xf32> to vector<8x64xf32>
      %298 = arith.mulf %296, %297 : vector<8x64xf32>
      %299 = arith.addf %288, %298 : vector<8x64xf32>
      %300 = arith.mulf %188, %290 : vector<16x64xf32>
      %301 = arith.addf %300, %227 : vector<16x64xf32>
      %302 = vector.extract_strided_slice %160 {offsets = [16, 6], sizes = [16, 1], strides = [1, 1]} : vector<32x8xf32> to vector<16x1xf32>
      %303 = vector.broadcast %302 : vector<16x1xf32> to vector<16x64xf32>
      %304 = arith.mulf %303, %301 : vector<16x64xf32>
      %cst_88 = arith.constant dense<0.000000e+00> : vector<64xf32>
      %305 = vector.multi_reduction <add>, %304, %cst_88 [0] : vector<16x64xf32> to vector<64xf32>
      %306 = vector.shape_cast %305 : vector<64xf32> to vector<1x64xf32>
      %307 = vector.broadcast %120 : vector<8x1xf32> to vector<8x64xf32>
      %308 = vector.broadcast %306 : vector<1x64xf32> to vector<8x64xf32>
      %309 = arith.mulf %307, %308 : vector<8x64xf32>
      %310 = arith.addf %299, %309 : vector<8x64xf32>
      %311 = arith.mulf %192, %301 : vector<16x64xf32>
      %312 = arith.addf %311, %232 : vector<16x64xf32>
      %313 = vector.extract_strided_slice %160 {offsets = [16, 7], sizes = [16, 1], strides = [1, 1]} : vector<32x8xf32> to vector<16x1xf32>
      %314 = vector.broadcast %313 : vector<16x1xf32> to vector<16x64xf32>
      %315 = arith.mulf %314, %312 : vector<16x64xf32>
      %cst_89 = arith.constant dense<0.000000e+00> : vector<64xf32>
      %316 = vector.multi_reduction <add>, %315, %cst_89 [0] : vector<16x64xf32> to vector<64xf32>
      %317 = vector.shape_cast %316 : vector<64xf32> to vector<1x64xf32>
      %318 = vector.broadcast %125 : vector<8x1xf32> to vector<8x64xf32>
      %319 = vector.broadcast %317 : vector<1x64xf32> to vector<8x64xf32>
      %320 = arith.mulf %318, %319 : vector<8x64xf32>
      %321 = arith.addf %310, %320 : vector<8x64xf32>
      %322 = arith.index_cast %152 : i32 to index
      %c0_90 = arith.constant 0 : index
      %323 = vector.load %arg21[%322, %c0_90] : memref<16x64xf32, #tpu.memory_space<vmem>>, vector<8x64xf32>
      tpu.vector_store %arg21[%322, %c0_90], %321 {strides = array<i32>} : memref<16x64xf32, #tpu.memory_space<vmem>>, vector<8x64xf32>,
      scf.yield %312 : vector<16x64xf32>
    }
    %c2_i32_61 = arith.constant 2 : i32
    %c0_62 = arith.constant 0 : index
    %c0_63 = arith.constant 0 : index
    %129 = vector.load %arg16[%c0_62, %c0_63] : memref<16x64xf32, #tpu.memory_space<vmem>>, vector<16x64xf32>
    tpu.vector_store %arg16[%c0_62, %c0_63], %128 {strides = array<i32>} : memref<16x64xf32, #tpu.memory_space<vmem>>, vector<16x64xf32>,
    %c0_64 = arith.constant 0 : index
    %c0_65 = arith.constant 0 : index
    %130 = vector.load %arg21[%c0_64, %c0_65] : memref<16x64xf32, #tpu.memory_space<vmem>>, vector<16x64xf32>
    %c0_66 = arith.constant 0 : index
    %c0_67 = arith.constant 0 : index
    %131 = vector.load %arg19[%c0_66, %c0_67] : memref<16x64xf32, #tpu.memory_space<vmem>>, vector<16x64xf32>
    %c0_68 = arith.constant 0 : index
    %c0_69 = arith.constant 0 : index
    %132 = vector.load %arg13[%c0_68, %c0_69] : memref<1x64xf32, #tpu.memory_space<vmem>>, vector<1x64xf32>
    %133 = vector.broadcast %132 : vector<1x64xf32> to vector<16x64xf32>
    %134 = arith.mulf %131, %133 : vector<16x64xf32>
    %135 = arith.addf %130, %134 : vector<16x64xf32>
    %136 = arith.negf %23 : vector<16x64xf32>
    %137 = math.exp %136 : vector<16x64xf32>
    %cst_70 = arith.constant 1.000000e+00 : f32
    %138 = vector.broadcast %cst_70 : f32 to vector<16x64xf32>
    %139 = arith.addf %138, %137 : vector<16x64xf32>
    %140 = arith.divf %138, %139 : vector<16x64xf32>
    %141 = arith.mulf %23, %140 : vector<16x64xf32>
    %142 = arith.mulf %135, %141 : vector<16x64xf32>
    %143 = arith.truncf %142 : vector<16x64xf32> to vector<16x64xbf16>
    %c0_71 = arith.constant 0 : index
    %c0_72 = arith.constant 0 : index
    %144 = vector.load %arg14[%c0_71, %c0_72] : memref<64x32xbf16, #tpu.memory_space<vmem>>, vector<64x32xbf16>
    %cst_73 = arith.constant dense<0.000000e+00> : vector<16x32xf32>
    %145 = tpu.matmul %143, %144, %cst_73 {dimension_numbers = #tpu.dot_dimension_numbers<[1], [0], [0], [1], [0, 0, 1, 1], [], []>} : vector<16x64xbf16>, vector<64x32xbf16>, vector<16x32xf32> -> vector<16x32xf32>
    %146 = arith.addf %145, %5 : vector<16x32xf32>
    %147 = arith.truncf %146 : vector<16x32xf32> to vector<16x32xbf16>
    %c0_74 = arith.constant 0 : index
    %c0_75 = arith.constant 0 : index
    %c0_76 = arith.constant 0 : index
    %148 = vector.load %arg15[%c0_74, %c0_75, %c0_76] : memref<1x16x32xbf16, #tpu.memory_space<vmem>>, vector<1x16x32xbf16>
    %149 = vector.shape_cast %148 : vector<1x16x32xbf16> to vector<16x32xbf16>
    %150 = vector.shape_cast %147 : vector<16x32xbf16> to vector<1x16x32xbf16>
    tpu.vector_store %arg15[%c0_74, %c0_75, %c0_76], %150 {strides = array<i32>} : memref<1x16x32xbf16, #tpu.memory_space<vmem>>, vector<1x16x32xbf16>,
    return
  }
  func.func @transform_0(%arg0: i32, %arg1: i32) -> (i32, i32, i32) {
    %c0_i32 = arith.constant 0 : i32
    %c0_i32_0 = arith.constant 0 : i32
    return %arg0, %arg1, %c0_i32 : i32, i32, i32
  }
  func.func @transform_1(%arg0: i32, %arg1: i32) -> (i32, i32) {
    %c0_i32 = arith.constant 0 : i32
    %c0_i32_0 = arith.constant 0 : i32
    %c0_i32_1 = arith.constant 0 : i32
    return %c0_i32, %c0_i32_0 : i32, i32
  }
  func.func @transform_2(%arg0: i32, %arg1: i32) -> (i32, i32) {
    %c0_i32 = arith.constant 0 : i32
    %c0_i32_0 = arith.constant 0 : i32
    %c0_i32_1 = arith.constant 0 : i32
    return %c0_i32, %c0_i32_0 : i32, i32
  }
  func.func @transform_3(%arg0: i32, %arg1: i32) -> (i32, i32) {
    %c0_i32 = arith.constant 0 : i32
    %c0_i32_0 = arith.constant 0 : i32
    %c0_i32_1 = arith.constant 0 : i32
    return %c0_i32, %c0_i32_0 : i32, i32
  }
  func.func @transform_4(%arg0: i32, %arg1: i32) -> (i32, i32) {
    %c0_i32 = arith.constant 0 : i32
    %c0_i32_0 = arith.constant 0 : i32
    %c0_i32_1 = arith.constant 0 : i32
    return %c0_i32, %c0_i32_0 : i32, i32
  }
  func.func @transform_5(%arg0: i32, %arg1: i32) -> (i32, i32) {
    %c0_i32 = arith.constant 0 : i32
    %c0_i32_0 = arith.constant 0 : i32
    %c0_i32_1 = arith.constant 0 : i32
    return %c0_i32, %c0_i32_0 : i32, i32
  }
  func.func @transform_6(%arg0: i32, %arg1: i32) -> (i32, i32) {
    %c0_i32 = arith.constant 0 : i32
    %c0_i32_0 = arith.constant 0 : i32
    %c0_i32_1 = arith.constant 0 : i32
    return %c0_i32, %c0_i32_0 : i32, i32
  }
  func.func @transform_7(%arg0: i32, %arg1: i32) -> (i32, i32) {
    %c0_i32 = arith.constant 0 : i32
    %c0_i32_0 = arith.constant 0 : i32
    %c0_i32_1 = arith.constant 0 : i32
    return %c0_i32, %c0_i32_0 : i32, i32
  }
  func.func @transform_8(%arg0: i32, %arg1: i32) -> (i32, i32) {
    %c0_i32 = arith.constant 0 : i32
    %c0_i32_0 = arith.constant 0 : i32
    %c0_i32_1 = arith.constant 0 : i32
    return %c0_i32, %c0_i32_0 : i32, i32
  }
  func.func @transform_9(%arg0: i32, %arg1: i32) -> (i32, i32) {
    %c0_i32 = arith.constant 0 : i32
    %c0_i32_0 = arith.constant 0 : i32
    %c0_i32_1 = arith.constant 0 : i32
    return %c0_i32, %c0_i32_0 : i32, i32
  }
  func.func @transform_10(%arg0: i32, %arg1: i32) -> (i32, i32) {
    %c0_i32 = arith.constant 0 : i32
    %c0_i32_0 = arith.constant 0 : i32
    %c0_i32_1 = arith.constant 0 : i32
    return %c0_i32, %c0_i32_0 : i32, i32
  }
  func.func @transform_11(%arg0: i32, %arg1: i32) -> (i32, i32) {
    %c0_i32 = arith.constant 0 : i32
    %c0_i32_0 = arith.constant 0 : i32
    %c0_i32_1 = arith.constant 0 : i32
    return %c0_i32, %c0_i32_0 : i32, i32
  }
  func.func @transform_12(%arg0: i32, %arg1: i32) -> (i32, i32) {
    %c0_i32 = arith.constant 0 : i32
    %c0_i32_0 = arith.constant 0 : i32
    %c0_i32_1 = arith.constant 0 : i32
    return %c0_i32, %c0_i32_0 : i32, i32
  }
  func.func @transform_13(%arg0: i32, %arg1: i32) -> (i32, i32, i32) {
    %c0_i32 = arith.constant 0 : i32
    %c0_i32_0 = arith.constant 0 : i32
    return %arg0, %arg1, %c0_i32 : i32, i32, i32
  }
}

</mosaic_0001>

<bundles_post_ra>
// kernel: tpu_custom_call.1
= control target key start
LH: loop header
LB: loop body
LE: loop exit
PB: predicated region body
PF: predicated region fallthrough
CT: control target
= control target key end

     0   :  { %6 = vsyncpa [#allocation3], 0  ;;  %s147_s0 = inlined_call_operand.hbm [shape: f32[16,128], index: 0, kind: input, shape index: {}]   ;;  %s148_s1 = inlined_call_operand.hbm [shape: f32[16,128], index: 1, kind: output, shape index: {}]  }
   0x1   :  { %7 = vsyncpa [#allocation4], 0  ;;  %s103_s6 = smov [#allocation2]   ;;  %s55_s10 = scalar_lea.hbm %s147_s0, 256 }
   0x2   :  { %s13_s7 = sshll.u32 %s103_s6, 4  ;;  %p56_p0 = scmp.ne.s32.totalorder %s147_s0, %s55_s10  ;;  %s14_s7 = int_to_ptr.vmem [resolvable:$true] %s13_s7 }
   0x3   :  { %p59_p1 = scmp.lt.u32.totalorder %s55_s10, %s147_s0 }
   0x5   :  { %p61_p2 = pnand %p59_p1, %p56_p0 }
   0x7   :  { %64 = shalt.err (!%p61_p2)
}
   0x8   :  { %s65_s15 = scalar_lea.vmem %s14_s7, 256  ;;  %p70_p4 = scmp.lt.s32.totalorder %s14_s7, %s14_s7 }
   0x9   :  { %p66_p3 = scmp.ne.s32.totalorder %s14_s7, %s65_s15  ;;  %p71_p5 = scmp.lt.s32.totalorder %s65_s15, %s65_s15 }
   0xb   :  { %p72_p6 = por %p71_p5, %p70_p4 }
   0xd   :  { %p73_p7 = pnand %p72_p6, %p66_p3 }
   0xf   :  { %76 = shalt.err (!%p73_p7)
}
  0x10   :  { %s104_s16 = smov 128   ;;  %s105_s17 = smov 8  }
  0x11   :  { %19 = dma.hbm_to_vmem [thread:$0]  %s147_s0, 256, %s14_s7, [#allocation3], %s104_s16, %s104_s16, %s105_s17  }
  0x12   :  { %99 = dma.done.wait [#allocation3], 256  }
  0x13   :  { %100 = vsyncadd [#allocation3], 4294967040  ;;  %v27_v0 = vlaneseq  ;;  %s106_s20 = smov [#allocation5]   ;;  %v23_v2 = vld [vmem:[#allocation2] sm:$0xff]  ;;  %v24_v3 = vld [vmem:[#allocation2 + $0x8] sm:$0xff] }
  0x14   :  { %s39_s21 = sshll.u32 %s106_s20, 4  ;;  %v25_v4 = vrot.slane %v23_v2, 5  ;;  %v26_v5 = vrot.slane %v24_v3, 5  ;;  %s40_s21 = int_to_ptr.vmem [resolvable:$true] %s39_s21 }
  0x15   :  { %v28_v1 = vshrl.u32 %v27_v0, 7  ;;  %s77_s22 = scalar_lea.vmem %s40_s21, 256  ;;  %p82_p9 = scmp.lt.s32.totalorder %s40_s21, %s40_s21 }
  0x16   :  { %p78_p8 = scmp.ne.s32.totalorder %s40_s21, %s77_s22  ;;  %p83_p10 = scmp.lt.s32.totalorder %s77_s22, %s77_s22 }
  0x17   :  { %vm29_vm0 = vcmp.lt.s32.totalorder %v28_v1, 3 }
  0x18   :  { %v31_v6 = vsel %vm29_vm0, %v26_v5, %v25_v4  ;;  %v30_v7 = vsel %vm29_vm0, %v25_v4, %v26_v5  ;;  %p84_p11 = por %p83_p10, %p82_p9 }
  0x19   :  { %32 = vst [vmem:[#allocation5] sm:$0xff] %v31_v6  ;;  %33 = vst [vmem:[#allocation5 + $0x8] sm:$0xff] %v30_v7 }
  0x1a   :  { %p85_p12 = pnand %p84_p11, %p78_p8 }
  0x1c   :  { %88 = shalt.err (!%p85_p12)
}
  0x1d   :  { %s89_s24 = scalar_lea.hbm %s148_s1, 256 }
  0x1e   :  { %p90_p13 = scmp.ne.s32.totalorder %s148_s1, %s89_s24  ;;  %p93_p0 = scmp.lt.u32.totalorder %s89_s24, %s148_s1 }
  0x20   :  { %p95_p1 = pnand %p93_p0, %p90_p13 }
  0x22   :  { %98 = shalt.err (!%p95_p1)
}
  0x23   :  { %45 = dma.vmem_to_hbm [thread:$0]  %s40_s21, 256, %s148_s1, [#allocation4], %s104_s16, %s104_s16, %s105_s17  }
  0x24   :  { %101 = dma.done.wait [#allocation4], 256  }
  0x25   :  { %102 = vsyncadd [#allocation4], 4294967040 }
  0x26   :  { %49 = vsyncpa [#allocation3], 1 }
  0x27   :  { %50 = vsyncpa [#allocation4], 1 }

// kernel: tpu_custom_call.1
= control target key start
LH: loop header
LB: loop body
LE: loop exit
PB: predicated region body
PF: predicated region fallthrough
CT: control target
= control target key end

     0   :  { %s3010_s0 = inlined_call_operand.vmem [shape: bf16[2,32,32], index: 0, kind: input, shape index: {}]   ;;  %s3011_s1 = inlined_call_operand.vmem [shape: f32[1,32], index: 1, kind: input, shape index: {}]   ;;  %s3012_s2 = inlined_call_operand.vmem [shape: bf16[32,64], index: 2, kind: input, shape index: {}]   ;;  %s3013_s3 = inlined_call_operand.vmem [shape: bf16[32,64], index: 3, kind: input, shape index: {}]   ;;  %s3014_s4 = inlined_call_operand.hbm [shape: f32[4,64], index: 4, kind: input, shape index: {}]   ;;  %s3015_s5 = inlined_call_operand.vmem [shape: f32[1,64], index: 5, kind: input, shape index: {}]   ;;  %s3016_s6 = inlined_call_operand.vmem [shape: bf16[64,128], index: 6, kind: input, shape index: {}]   ;;  %s3017_s7 = inlined_call_operand.vmem [shape: bf16[32,64], index: 7, kind: input, shape index: {}]   ;;  %s3018_s8 = inlined_call_operand.vmem [shape: bf16[128,64], index: 8, kind: input, shape index: {}]   ;;  %s3019_s9 = inlined_call_operand.hbm [shape: f32[1,64], index: 9, kind: input, shape index: {}]   ;;  %s3020_s10 = inlined_call_operand.vmem [shape: f32[16,64], index: 10, kind: input, shape index: {}]   ;;  %s3021_s11 = inlined_call_operand.vmem [shape: f32[1,64], index: 11, kind: input, shape index: {}]   ;;  %s3022_s12 = inlined_call_operand.vmem [shape: bf16[64,32], index: 12, kind: input, shape index: {}]   ;;  %s3023_s13 = inlined_call_operand.hbm [shape: bf16[2,32,32], index: 13, kind: output, shape index: {}]  }
   0x1   :  { %3039 = sst [smem:[#allocation26_spill]] %s3023_s13 }
   0x2   :  { %18 = vsyncpa [#allocation9], 0 }
   0x3   :  { %19 = vsyncpa [#allocation12], 0 }
   0x4   :  { %20 = vsyncpa [#allocation10], 0 }
   0x5   :  { %22 = vsyncpa [#allocation10 + $0x1], 0  ;;  %s2430_s25 = smov 0   ;;  %s2432_s26 = smov 0  }
   0x6   :  { %s2434_s27 = smov 0   ;;  %s2436_s28 = smov 0  }
   0x7   :  { %s2438_s29 = smov 0   ;;  %s2440_s30 = smov 0  }
   0x8   :  { %s2442_s14 = smov 0   ;;  %s2444_s15 = smov 0  }
   0x9 LB: > { %3040 = sst [smem:[#allocation17_spill]] %s2301_s25  ;;  %s1752_s16 = sadd.s32 4294967295, %s2329_s15   ;;  %s2329_s15 = sphi %s2444_s15, %s28_s15   ;;  %s2325_s14 = sphi %s2442_s14, %s3070_s14   ;;  %s2321_s30 = sphi %s2440_s30, %s3069_s30   ;;  %s2317_s29 = sphi %s2438_s29, %s3068_s29   ;;  %s2313_s28 = sphi %s2436_s28, %s3067_s28   ;;  %s2309_s27 = sphi %s2434_s27, %s3073_s27   ;;  %s2305_s26 = sphi %s2432_s26, %s3072_s26   ;;  %s2301_s25 = sphi %s2430_s25, %s3071_s25  }
   0xa   : > { %3041 = sst [smem:[#allocation18_spill]] %s2321_s30  ;;  %s1753_s17 = sadd.s32 4294967294, %s2329_s15  }
   0xb   : > { %3042 = sst [smem:[#allocation19_spill]] %s2325_s14  ;;  %s37_s18 = sadd.s32 1, %s2321_s30 }
   0xc   : > { %3043 = sst [smem:[#allocation20_spill]] %s2329_s15  ;;  %s40_s19 = sadd.s32 1, %s2325_s14 }
   0xd   : > { %p38_p0 = scmp.ge.s32.totalorder %s37_s18, 2  ;;  %s329_s20 = sadd.s32 1, %s2309_s27 }
   0xe   : > { %p339_p1 = scmp.ne.s32.totalorder %s2309_s27, %s2305_s26  ;;  %p340_p2 = scmp.eq.s32.totalorder %s1752_s16, 3 }
   0xf   : > { %s3075_s18 = smov (%p38_p0, %s37_s18), 0  ;;  %s3077_s19 = smov (!%p38_p0, %s40_s19), %s2325_s14 }
  0x10   : > { %3044 = sst [smem:[#allocation21_spill]] %s3075_s18  ;;  %s325_s21 = ssub.s32 %s2321_s30, %s3075_s18 }
  0x11   : > { %p2482_p3 = por %p340_p2, %p339_p1  ;;  %p42_p4 = scmp.ge.s32.totalorder %s3077_s19, 2 }
  0x12   : > { %p345_p5 = scmp.ne.s32.totalorder %s2305_s26, %s2301_s25  ;;  %p346_p6 = scmp.eq.s32.totalorder %s1753_s17, 3 }
  0x13   : > { %s3045_s22 = scalar_select %p2482_p3, 1, 0 }
  0x14   : > { %p1754_p7 = scmp.ge.s32.totalorder %s2329_s15, 1  ;;  %s3079_s19 = smov (%p42_p4, %s3077_s19), 0 }
  0x15   : > { %3046 = sst [smem:[#allocation22_spill]] %s3045_s22  ;;  %p2491_p8 = por %p346_p6, %p345_p5 }
  0x16   : > { %3047 = sst [smem:[#allocation23_spill]] %s3079_s19  ;;  %p353_p9 = scmp.lt.s32.totalorder %s2329_s15, 5 }
  0x17   : > { %s3048_s23 = scalar_select %p2491_p8, 1, 0 }
  0x18   : > { %s324_s24 = ssub.s32 %s2325_s14, %s3079_s19  ;;  %p2498_p10 = pnand %p1754_p7, %p353_p9 }
  0x19   : > { %3049 = sst [smem:[#allocation24_spill]] %s3048_s23  ;;  %s326_s13 = sor.u32 %s325_s21, %s324_s24 }
  0x1a   : > { %s3050_s18 = scalar_select %p2498_p10, 1, 0 }
  0x1b   : > { %p327_p11 = scmp.eq.s32.totalorder %s326_s13, 0  ;;  %p2502_p12 = scmp.eq.s32.totalorder %s1752_s16, 0 }
  0x1c   : > { %p1935_p13 = pneg %p2498_p10  ;;  %s2343_s25 = smov [#allocation8]  }
  0x1d   : > { %s3051_s30 = scalar_select %p2502_p12, 1, 0 }
  0x1e   : > { %s2509_s17 = scalar_select %p327_p11, %s2309_s27, %s329_s20  }
  0x1f   : > { %s375_s23 = sshll.u32 %s2343_s25, 4  ;;  %p2513_p0 = pnand %p2502_p12, %p1935_p13  ;;  %s376_s23 = int_to_ptr.vmem [resolvable:$true] %s375_s23 }
  0x20   : > { %3052 = sst [smem:[#allocation25_spill]] %s2509_s17  ;;  %s2344_s13 = smov [#allocation11]  }
  0x21   : > { %s398_s16 = sshll.u32 %s2344_s13, 4  ;;  %s2159_s14 = scalar_lea.hbm %s3014_s4, 64  ;;  %s399_s16 = int_to_ptr.vmem [resolvable:$true] %s398_s16 }
  0x22   : > { %p2160_p1 = scmp.ne.s32.totalorder %s3014_s4, %s2159_s14  ;;  %p2161_p2 = pneg %p2513_p0 }
  0x23   : > { %p2166_p6 = scmp.lt.u32.totalorder %s2159_s14, %s3014_s4 }
  0x24   : > { %p2162_p4 = pnand %p2161_p2, %p2160_p1 }
  0x26   : > { %p2163_p5 = pneg %p2162_p4 }
  0x28   : > { %p2168_p7 = pnand %p2166_p6, %p2163_p5 }
  0x2a   : > { %2171 = shalt.err (!%p2168_p7)
}
  0x2b   : > { %s2172_s13 = scalar_lea.vmem %s376_s23, 64  ;;  %p2180_p8 = scmp.lt.s32.totalorder %s376_s23, %s376_s23 }
  0x2c   : > { %p2173_p9 = scmp.ne.s32.totalorder %s376_s23, %s2172_s13  ;;  %p2181_p3 = scmp.lt.s32.totalorder %s2172_s13, %s2172_s13 }
  0x2e   : > { %p2175_p11 = pnand %p2173_p9, %p2161_p2  ;;  %p2182_p12 = por %p2181_p3, %p2180_p8 }
  0x30   : > { %p2176_p13 = pneg %p2175_p11 }
  0x32   : > { %p2183_p10 = pnand %p2182_p12, %p2176_p13 }
  0x34   : > { %2186 = shalt.err (!%p2183_p10)
}
  0x35   : > { %1938 = dma.hbm_to_vmem [thread:$0]  (!%p2513_p0), %s3014_s4, 64, %s376_s23, [#allocation9]  }
  0x36   : > { %s2187_s24 = scalar_lea.hbm %s3019_s9, 16 }
  0x37   : > { %p2188_p1 = scmp.ne.s32.totalorder %s3019_s9, %s2187_s24  ;;  %p2194_p10 = scmp.lt.u32.totalorder %s2187_s24, %s3019_s9 }
  0x39   : > { %p2190_p3 = pnand %p2188_p1, %p2161_p2 }
  0x3b   : > { %p2191_p8 = pneg %p2190_p3 }
  0x3d   : > { %p2196_p12 = pnand %p2194_p10, %p2191_p8 }
  0x3f   : > { %2199 = shalt.err (!%p2196_p12)
}
  0x40   : > { %s2200_s23 = scalar_lea.vmem %s399_s16, 16  ;;  %s2207_s15 = scalar_lea.vmem %s399_s16, 32 }
  0x41   : > { %p2201_p4 = scmp.ne.s32.totalorder %s399_s16, %s2200_s23  ;;  %p2208_p7 = scmp.lt.s32.totalorder %s399_s16, %s399_s16 }
  0x42   : > { %p2209_p9 = scmp.lt.s32.totalorder %s2207_s15, %s2200_s23 }
  0x43   : > { %p2203_p5 = pnand %p2201_p4, %p2161_p2 }
  0x44   : > { %p2210_p11 = por %p2209_p9, %p2208_p7 }
  0x45   : > { %p2204_p6 = pneg %p2203_p5 }
  0x47   : > { %p2211_p13 = pnand %p2210_p11, %p2204_p6 }
  0x49   : > { %2214 = shalt.err (!%p2211_p13)
}
  0x4a   : > { %1941 = dma.hbm_to_vmem [thread:$0]  (!%p2513_p0), %s3019_s9, 16, %s399_s16, [#allocation12]  }
  0x4b   : > { %p3054_p1 = scmp.ne.s32.totalorder %s3050_s18, 0 }
  0x4c   : > { %p3055_p3 = scmp.ne.s32.totalorder (!%p3054_p1), %s3051_s30, 0 }
  0x4d   : > { %433 = sbr.rel (%p3054_p1) target bundleno = 1491 (0x5d3), region = 72 }
  0x54   : > { %2288 = dma.done.wait (%p3055_p3), [#allocation9], 64  }
  0x55   : > { %2290 = vsyncadd (%p3055_p3), [#allocation9], 4294967232 }
  0x56   : > { %2292 = dma.done.wait (%p3055_p3), [#allocation12], 16  }
  0x57   : > { %2294 = vsyncadd (%p3055_p3), [#allocation12], 4294967280  ;;  %s482_s21 = sand.u32 1, %s2305_s26   ;;  %s2571_s18 = sshll.u32 %s2313_s28, 1 }
  0x58   : > { %s1761_s16 = sshll.u32 %s482_s21, 3  ;;  %p486_p0 = scmp.lt.s32.totalorder %s2317_s29, 1 }
  0x59   : > { %p488_p2 = scmp.lt.s32.totalorder %s2571_s18, 3  ;;  %s2582_s15 = scalar_lea.vmem [#allocation13], %s1761_s16 }
  0x5a   : > { %s487_s14 = scalar_select %p486_p0, %s2317_s29, 1 }
  0x5b   : > { %s489_s22 = scalar_select %p488_p2, %s2571_s18, 3 }
  0x5c   : > { %s1763_s24 = sshll.u32 %s487_s14, 2  ;;  %p1765_p8 = scmp.ne.s32.totalorder %s2313_s28, 0 }
  0x5d   : > { %s491_s25 = sadd.s32 %s1763_s24, %s489_s22  ;;  %vm501_vm0 = vcmask (!%p1765_p8), 523264   ;;  %v2345_v0 = vmov (!%p1765_p8), 0.0  }
  0x5e   : > { %s1764_s30 = sshll.u32 %s491_s25, 2  ;;  %500 = sbr.rel (%p1765_p8) target bundleno = 101 (0x65), region = 84  ;;  %502 = vst.msk [vmem:[#allocation2] sm:$0xff] (!%p1765_p8), %vm501_vm0, %v2345_v0  ;;  %503 = vst.msk [vmem:[#allocation2 + $0x8] sm:$0xff] (!%p1765_p8), %vm501_vm0, %v2345_v0 }
  0x5f   : > { %s493_s23 = scalar_lea.vmem %s3010_s0, %s1764_s30  ;;  %504 = vst.msk [vmem:[#allocation3] sm:$0xff] (!%p1765_p8), %vm501_vm0, %v2345_v0  ;;  %505 = vst.msk [vmem:[#allocation3 + $0x8] sm:$0xff] (!%p1765_p8), %vm501_vm0, %v2345_v0 }
  0x60   : > { %506 = vst.msk [vmem:[#allocation3 + $0x10] sm:$0xff] (!%p1765_p8), %vm501_vm0, %v2345_v0 }
  0x65 PF: > { %v1827_v1 = vld [vmem:[%s493_s23] sm:$0xff]   ;;  %vm513_vm1 = vcmask 261120   ;;  %v1046_v8 = vlaneseq  ;;  %v2346_v11 = vmov 0.0   ;;  %v2057_v13 = vld [vmem:[%s3012_s2 + $0x8] sm:$0xff]   ;;  %vm2347_vm6 = vmmov 0   ;;  %v2061_v39 = vld [vmem:[%s3016_s6 + $0x10] sm:$0xff]  }
  0x66   : > { %v2585_v2 = vunpack.c.l.bf16 %v1827_v1  ;;  %v2587_v3 = vunpack.c.h.bf16 %v1827_v1  ;;  %v2055_v9 = vld [vmem:[%s3012_s2] sm:$0xff]   ;;  %1858 = vmatprep.subr.bf16.mxu0 %v2346_v11  ;;  %1866 = vmatprep.subr.bf16.mxu1 %v2346_v11  ;;  %v2058_v14 = vld [vmem:[%s3013_s3 + $0x8] sm:$0xff]   ;;  %v2062_v40 = vld [vmem:[%s3016_s6 + $0x18] sm:$0xff]   ;;  %vm656_vm11 = vcmask 523264   ;;  %vm711_vm12 = vcmask 523269   ;;  %s2348_s14 = smov 120  }
  0x67   : > { %v2056_v10 = vld [vmem:[%s3013_s3] sm:$0xff]   ;;  %v2603_v12 = vshrl.u32 %v1046_v8, 7  ;;  %1859 = vmatpush3.bf16.msra.mxu0 %v2055_v9  ;;  %1862 = vmatprep.mubr.msk.bf16.mxu0 %vm2347_vm6, %v2346_v11  ;;  %v2060_v38 = vld [vmem:[%s3016_s6 + $0x8] sm:$0xff]   ;;  %v1774_v50 = vld [vmem:[#allocation8] ss:$0 sm:$0xff]  ;;  %vm1018_vm13 = vcmask 64512  }
  0x68   : > { %v511_v4 = vmul.f32 %v2585_v2, %v2585_v2  ;;  %v512_v5 = vmul.f32 %v2587_v3, %v2587_v3  ;;  %1867 = vmatpush3.bf16.msra.mxu1 %v2056_v10  ;;  %1860 = vmatprep.subr.bf16.mxu0 %v2346_v11  ;;  %v1766_v32 = vld [vmem:[%s3011_s1] ss:$0 sm:$0xff]  ;;  %v1775_v52 = vld [vmem:[#allocation8 + $0x1] ss:$0 sm:$0xff]  ;;  %v1776_v59 = vld [vmem:[#allocation8 + $0x2] ss:$0 sm:$0xff] }
  0x69   : > { %1868 = vmatprep.subr.bf16.mxu1 %v2346_v11  ;;  %vm1048_vm2 = vcmp.eq.s32.totalorder %v2603_v12, 0  ;;  %vm1051_vm3 = vcmp.eq.s32.totalorder %v2603_v12, 1  ;;  %vm1054_vm4 = vcmp.eq.s32.totalorder %v2603_v12, 2  ;;  %vm1057_vm5 = vcmp.eq.s32.totalorder %v2603_v12, 3  ;;  %1870 = vmatprep.mubr.msk.bf16.mxu1 %vm2347_vm6, %v2346_v11  ;;  %v2059_v37 = vld [vmem:[%s3016_s6] sm:$0xff]   ;;  %s2754_s20 = smov 0  }
  0x6a   : > { %v514_v6 = vsel %vm513_vm1, %v511_v4, 0.0  ;;  %v517_v7 = vsel %vm513_vm1, %v512_v5, 0.0  ;;  %v2622_v15 = vsel %vm1048_vm2, 1.0, %v2346_v11  ;;  %v2625_v16 = vsel %vm1051_vm3, 1.0, %v2346_v11  ;;  %v2063_v41 = vld [vmem:[%s3017_s7] sm:$0xff]  }
  0x6b   : > { %515 = vadd.xlane.f32.xlu0 %v514_v6  ;;  %v2628_v17 = vsel %vm1054_vm4, 1.0, %v2346_v11  ;;  %v2631_v18 = vsel %vm1057_vm5, 1.0, %v2346_v11  ;;  %vm1060_vm7 = vcmp.eq.s32.totalorder %v2603_v12, 4  ;;  %vm1063_vm8 = vcmp.eq.s32.totalorder %v2603_v12, 5  ;;  %1861 = vmatpush3.bf16.msra.mxu0 %v2057_v13  ;;  %v1773_v51 = vld [vmem:[%s3015_s5] ss:$0 sm:$0xff] }
  0x6c   : > { %vm1066_vm9 = vcmp.eq.s32.totalorder %v2603_v12, 6  ;;  %vm1069_vm10 = vcmp.eq.s32.totalorder %v2603_v12, 7  ;;  %1869 = vmatpush3.bf16.msra.mxu1 %v2058_v14  ;;  %v2638_v19 = vsel %vm1060_vm7, 1.0, %v2346_v11  ;;  %v2641_v20 = vsel %vm1063_vm8, 1.0, %v2346_v11  ;;  %1874 = vmatprep.subr.bf16.mxu0 %v2346_v11  ;;  %v1777_v0 = vld [vmem:[#allocation8 + $0x3] ss:$0 sm:$0xff] }
  0x6d   : > { %v2644_v21 = vsel %vm1066_vm9, 1.0, %v2346_v11  ;;  %v2647_v22 = vsel %vm1069_vm10, 1.0, %v2346_v11 }
  0x6f   : > { %518 = vadd.xlane.f32.xlu0 %v517_v7 }
  0xf8   : > { %v516_v23 = vpop.xlane.xlu0 %515 }
  0xf9   : > { %v521_v24 = vmul.f32 0.03125, %v516_v23 }
  0xfb   : > { %v523_v25 = vadd.f32 1e-05, %v521_v24 }
  0xfc   : > { %v519_v26 = vpop.xlane.xlu0 %518 }
  0xfd   : > { %2073 = vrsqrt.f32 %v523_v25  ;;  %v522_v27 = vmul.f32 0.03125, %v519_v26 }
  0xff   : > { %v524_v28 = vadd.f32 1e-05, %v522_v27 }
 0x101   : > { %2075 = vrsqrt.f32 %v524_v28 }
 0x107   : > { %v2074_v29 = vpop.eup %2073 }
 0x108   : > { %v527_v30 = vmul.f32 %v2074_v29, %v2585_v2 }
 0x10a   : > { %v536_v34 = vmul.f32 %v1766_v32, %v527_v30 }
 0x10b   : > { %v2076_v31 = vpop.eup %2075 }
 0x10c   : > { %v528_v33 = vmul.f32 %v2076_v31, %v2587_v3 }
 0x10e   : > { %v537_v35 = vmul.f32 %v1766_v32, %v528_v33 }
 0x110   : > { %v538_v36 = vpack.c.bf16 %v537_v35, %v536_v34 }
 0x112   : > { %1863 = vmatmul.mubr.msk.bf16.vlgmr.msra.gmra.mrb[0].mxu0 %vm513_vm1, %v538_v36  ;;  %1871 = vmatmul.mubr.msk.bf16.vlgmr.msra.gmra.mrb[0].mxu1 %vm513_vm1, %v538_v36 }
 0x113   : > { %1882 = vmatprep.mubr.msk.bf16.mxu0 %vm2347_vm6, %v2346_v11  ;;  %1875 = vmatpush3.bf16.msra.mxu0 %v2059_v37 }
 0x114   : > { %1876 = vmatprep.subr.bf16.mxu0 %v2346_v11  ;;  %1888 = vmatprep.mubr.msk.bf16.mxu1 %vm656_vm11, %v2063_v41  ;;  %v2066_v41 = vld [vmem:[%s3018_s8 + $0x8] sm:$0xff]  }
 0x117   : > { %1877 = vmatpush3.bf16.msra.mxu0 %v2060_v38 }
 0x118   : > { %1878 = vmatprep.subr.bf16.mxu0 %v2346_v11 }
 0x11b   : > { %1879 = vmatpush3.bf16.msra.mxu0 %v2061_v39  ;;  %v2064_v39 = vld [vmem:[%s3017_s7 + $0x8] sm:$0xff]  }
 0x11c   : > { %1880 = vmatprep.subr.bf16.mxu0 %v2346_v11 }
 0x11f   : > { %1881 = vmatpush3.bf16.msra.mxu0 %v2062_v40  ;;  %v2065_v40 = vld [vmem:[%s3018_s8] sm:$0xff]  }
 0x1e5   : > { %v592_v42 = vpop.f32.mrb[0].mxu0  ;;  %v2678_v43 = vpop.f32.mrb[0].mxu1 }
 0x1e6   : > { %657 = vst.msk [vmem:[#allocation3 + $0x8] sm:$0xff] %vm656_vm11, %v592_v42  ;;  %v1864_v44 = vpop.f32.mrb[1].mxu0  ;;  %v1872_v45 = vpop.f32.mrb[1].mxu1  ;;  %v2067_v42 = vld [vmem:[%s3018_s8 + $0x10] sm:$0xff]  }
 0x1e7   : > { %v595_v46 = vpop.f32.mrb[2].mxu0  ;;  %v2681_v47 = vpop.f32.mrb[2].mxu1  ;;  %v2068_v44 = vld [vmem:[%s3018_s8 + $0x18] sm:$0xff]   ;;  %v2069_v45 = vld [vmem:[%s3018_s8 + $0x20] sm:$0xff]  }
 0x1e8   : > { %658 = vst.msk [vmem:[#allocation3 + $0x10] sm:$0xff] %vm656_vm11, %v595_v46  ;;  %v1865_v48 = vpop.f32.mrb[3].mxu0  ;;  %v1873_v49 = vpop.f32.mrb[3].mxu1 }
 0x1e9   : > { %v2071_v48 = vld [vmem:[%s3018_s8 + $0x30] sm:$0xff]   ;;  %v2072_v49 = vld [vmem:[%s3018_s8 + $0x38] sm:$0xff]  }
 0x1ed   : > { %v668_v53 = vld [vmem:[#allocation3 + $0x5] sm:$0xff] }
 0x1ee   : > { %v679_v54 = vld [vmem:[#allocation3 + $0x6] sm:$0xff]  ;;  %v674_v56 = vmul.f32 %v1774_v50, %v668_v53 }
 0x1ef   : > { %v690_v55 = vld [vmem:[#allocation3 + $0x7] sm:$0xff]  ;;  %v685_v62 = vmul.f32 %v1775_v52, %v679_v54  ;;  %v691_v63 = vld [vmem:[#allocation3 + $0xf] sm:$0xff] }
 0x1f0   : > { %712 = vst.msk [vmem:[#allocation3] sm:$0xe0] %vm711_vm12, %v595_v46  ;;  %v669_v57 = vld [vmem:[#allocation3 + $0xd] sm:$0xff]  ;;  %v676_v61 = vadd.f32 %v1773_v51, %v674_v56  ;;  %v696_v7 = vmul.f32 %v1776_v59, %v690_v55  ;;  %v697_v10 = vmul.f32 %v1776_v59, %v691_v63  ;;  %v2070_v46 = vld [vmem:[%s3018_s8 + $0x28] sm:$0xff]  }
 0x1f1   : > { %v680_v58 = vld [vmem:[#allocation3 + $0xe] sm:$0xff]  ;;  %v675_v60 = vmul.f32 %v1774_v50, %v669_v57 }
 0x1f2   : > { %v701_v1 = vld [vmem:[#allocation3 + $0x8] sm:$0xff]  ;;  %v686_v5 = vmul.f32 %v1775_v52, %v680_v58  ;;  %v687_v6 = vadd.f32 %v685_v62, %v676_v61  ;;  %v702_v8 = vld [vmem:[#allocation3 + $0x10] sm:$0xff]  ;;  %v2744_v62 = vld [vmem:[%s3020_s10 + $0x8] sm:$0xff] }
 0x1f3   : > { %v677_v4 = vadd.f32 %v1773_v51, %v675_v60  ;;  %v707_v14 = vmul.f32 %v1777_v0, %v701_v1  ;;  %v708_v24 = vmul.f32 %v1777_v0, %v702_v8  ;;  %v2739_v61 = vld [vmem:[%s3020_s10] sm:$0xff]  ;;  %v1073_v0 = vld [vmem:[#allocation2 + $0x8] sm:$0xff]  }
 0x1f4   : > { %v698_v13 = vadd.f32 %v696_v7, %v687_v6  ;;  %v1072_v63 = vld [vmem:[#allocation2] sm:$0xff]  }
 0x1f5   : > { %v688_v9 = vadd.f32 %v686_v5, %v677_v4  ;;  %v1789_v5 = vld [vmem:[#allocation11] ss:$0 sm:$0xff] }
 0x1f6   : > { %v709_v25 = vadd.f32 %v707_v14, %v698_v13 }
 0x1f7   : > { %v699_v23 = vadd.f32 %v697_v10, %v688_v9 }
 0x1f8   : > { %v1778_v27 = vmul.f32 -1.442695, %v709_v25 }
 0x1f9   : > { %v710_v26 = vadd.f32 %v708_v24, %v699_v23 }
 0x1fa   : > { %2077 = vpow2.f32 %v1778_v27 }
 0x1fb   : > { %v1779_v28 = vmul.f32 -1.442695, %v710_v26 }
 0x1fd   : > { %2079 = vpow2.f32 %v1779_v28 }
 0x204   : > { %v2078_v29 = vpop.eup %2077 }
 0x205   : > { %v719_v30 = vadd.f32 1.0, %v2078_v29 }
 0x207   : > { %v2080_v31 = vpop.eup %2079  ;;  %2081 = vrcp.f32 %v719_v30 }
 0x208   : > { %v720_v32 = vadd.f32 1.0, %v2080_v31 }
 0x20a   : > { %2083 = vrcp.f32 %v720_v32 }
 0x211   : > { %v2082_v33 = vpop.eup %2081 }
 0x212   : > { %v725_v34 = vmul.f32 %v2082_v33, %v709_v25 }
 0x214   : > { %v2084_v35 = vpop.eup %2083  ;;  %1016 = vst.msk [vmem:[#allocation5] sm:$0xff] %vm656_vm11, %v725_v34 }
 0x215   : > { %v726_v36 = vmul.f32 %v2084_v35, %v710_v26 }
 0x217   : > { %v727_v37 = vpack.c.bf16 %v726_v36, %v725_v34  ;;  %1017 = vst.msk [vmem:[#allocation5 + $0x8] sm:$0xff] %vm656_vm11, %v726_v36 }
 0x219   : > { %1883 = vmatmul.mubr.msk.bf16.vlgmr.msra.gmra.mrb[4].mxu0 %vm656_vm11, %v727_v37  ;;  %1924 = vmatprep.subr.msk.bf16.mxu1 %vm656_vm11, %v727_v37  ;;  %v761_v38 = vsel %vm656_vm11, %v727_v37, 0 }
 0x21a   : > { %1887 = vmatpush3.bf16.xpose.msra.mxu1 %v761_v38 }
 0x21b   : > { %1892 = vmatprep.subr.bf16.mxu1 %v2346_v11 }
 0x221   : > { %1889 = vmatmul.mubr.msk.bf16.vlgmr.msra.gmra.mrb[4].mxu1 %vm656_vm11, %v2064_v39 }
 0x222   : > { %1893 = vmatpush3.bf16.msra.mxu1 %v2065_v40  ;;  %1908 = vmatprep.mubr.msk.bf16.mxu1 %vm2347_vm6, %v2346_v11 }
 0x223   : > { %1894 = vmatprep.subr.bf16.mxu1 %v2346_v11 }
 0x226   : > { %1895 = vmatpush3.bf16.msra.mxu1 %v2066_v41 }
 0x227   : > { %1896 = vmatprep.subr.bf16.mxu1 %v2346_v11 }
 0x22a   : > { %1897 = vmatpush3.bf16.msra.mxu1 %v2067_v42 }
 0x22b   : > { %1898 = vmatprep.subr.bf16.mxu1 %v2346_v11 }
 0x22e   : > { %1899 = vmatpush3.bf16.msra.mxu1 %v2068_v44 }
 0x22f   : > { %1900 = vmatprep.subr.bf16.mxu1 %v2346_v11 }
 0x232   : > { %1901 = vmatpush3.bf16.msra.mxu1 %v2069_v45 }
 0x233   : > { %1902 = vmatprep.subr.bf16.mxu1 %v2346_v11 }
 0x236   : > { %1903 = vmatpush3.bf16.msra.mxu1 %v2070_v46 }
 0x237   : > { %1904 = vmatprep.subr.bf16.mxu1 %v2346_v11 }
 0x23a   : > { %1905 = vmatpush3.bf16.msra.mxu1 %v2071_v48 }
 0x23b   : > { %1906 = vmatprep.subr.bf16.mxu1 %v2346_v11 }
 0x23e   : > { %1907 = vmatpush3.bf16.msra.mxu1 %v2072_v49 }
 0x2ec   : > { %v797_v50 = vpop.f32.mrb[4].mxu0 }
 0x2ed   : > { %v1884_v51 = vpop.f32.mrb[5].mxu0 }
 0x2ee   : > { %v800_v52 = vpop.f32.mrb[6].mxu0 }
 0x2ef   : > { %v873_v53 = vpack.c.bf16 %v800_v52, %v797_v50  ;;  %v1885_v54 = vpop.f32.mrb[7].mxu0 }
 0x2f1   : > { %1909 = vmatmul.mubr.bf16.vlgmr.msra.gmra.mrb[8].mxu1 %v873_v53 }
 0x2f4   : > { %v1890_v55 = vpop.f32.mrb[4].mxu1 }
 0x2f5   : > { %1021 = vst.msk [vmem:[#allocation6 + $0x10] sm:$0xff] %vm1018_vm13, %v1890_v55  ;;  %v858_v56 = vpop.f32.mrb[5].mxu1  ;;  %1031 = vrot.lane.b32.xlu0 %v1890_v55, %s2348_s14 }
 0x2f6   : > { %1019 = vst.msk [vmem:[#allocation6] sm:$0xff] %vm1018_vm13, %v858_v56  ;;  %1027 = vrot.lane.b32.xlu1 %v858_v56, %s2348_s14  ;;  %v1891_v57 = vpop.f32.mrb[6].mxu1 }
 0x2f7   : > { %1022 = vst.msk [vmem:[#allocation6 + $0x18] sm:$0xff] %vm1018_vm13, %v1891_v57  ;;  %v861_v58 = vpop.f32.mrb[7].mxu1 }
 0x2f8   : > { %1020 = vst.msk [vmem:[#allocation6 + $0x8] sm:$0xff] %vm1018_vm13, %v861_v58 }
 0x2fa   : > { %1029 = vrot.lane.b32.xlu1 %v861_v58, %s2348_s14 }
 0x2fe   : > { %1033 = vrot.lane.b32.xlu1 %v1891_v57, %s2348_s14 }
 0x367   : > { %v1032_v59 = vpop.permute.xlu0 %1031 }
 0x368   : > { %v1028_v60 = vpop.permute.xlu1 %1027  ;;  %1042 = vst.msk [vmem:[#allocation6 + $0x30] sm:$0xff] %vm1018_vm13, %v1032_v59 }
 0x369   : > { %1040 = vst.msk [vmem:[#allocation6 + $0x20] sm:$0xff] %vm1018_vm13, %v1028_v60 }
 0x36c   : > { %v1030_v1 = vpop.permute.xlu1 %1029 }
 0x36d   : > { %1041 = vst.msk [vmem:[#allocation6 + $0x28] sm:$0xff] %vm1018_vm13, %v1030_v1 }
 0x370   : > { %v1034_v4 = vpop.permute.xlu1 %1033 }
 0x371   : > { %1043 = vst.msk [vmem:[#allocation6 + $0x38] sm:$0xff] %vm1018_vm13, %v1034_v4 }
 0x3c4   : > { %v979_v6 = vpop.f32.mrb[8].mxu1 }
 0x3c5   : > { %v980_v7 = vadd.f32 %v1789_v5, %v979_v6  ;;  %v1910_v8 = vpop.f32.mrb[9].mxu1 }
 0x3c6   : > { %v982_v9 = vpop.f32.mrb[10].mxu1 }
 0x3c7   : > { %v988_v10 = vmin.f32 %v980_v7, 20.0  ;;  %v983_v13 = vadd.f32 %v1789_v5, %v982_v9  ;;  %v1911_v14 = vpop.f32.mrb[11].mxu1  ;;  %vm986_vm15 = vcmp.gt.f32.partialorder %v980_v7, 20.0 }
 0x3c9   : > { %v990_v23 = vmul.f32 1.442695, %v988_v10  ;;  %v989_v24 = vmin.f32 %v983_v13, 20.0  ;;  %vm987_vm1 = vcmp.gt.f32.partialorder %v983_v13, 20.0 }
 0x3cb   : > { %2085 = vpow2.f32 %v990_v23  ;;  %v992_v25 = vmul.f32 1.442695, %v989_v24 }
 0x3cd   : > { %2087 = vpow2.f32 %v992_v25 }
 0x3d5   : > { %v2086_v26 = vpop.eup %2085 }
 0x3d6   : > { %v994_v27 = vadd.f32 1.0, %v2086_v26  ;;  %v997_v30 = vmul.f32 -0.5, %v2086_v26  ;;  %v1000_v33 = vand.u32 2147483647, %v2086_v26 }
 0x3d7   : > { %v2088_v28 = vpop.eup %2087 }
 0x3d8   : > { %2089 = vlog2.f32 %v994_v27  ;;  %v1003_v29 = vadd.f32 1.0, %v2088_v28  ;;  %v1006_v31 = vmul.f32 -0.5, %v2088_v28  ;;  %v998_v32 = vadd.f32 1.0, %v997_v30 }
 0x3d9   : > { %v1009_v36 = vand.u32 2147483647, %v2088_v28  ;;  %vm1001_vm14 = vcmp.lt.f32.partialorder %v1000_v33, 0.0004427343 }
 0x3da   : > { %2091 = vlog2.f32 %v1003_v29  ;;  %v1007_v34 = vadd.f32 1.0, %v1006_v31  ;;  %v999_v38 = vmul.f32 %v2086_v26, %v998_v32 }
 0x3db   : > { %vm1010_vm0 = vcmp.lt.f32.partialorder %v1009_v36, 0.0004427343 }
 0x3dc   : > { %v1008_v42 = vmul.f32 %v2088_v28, %v1007_v34 }
 0x3e2   : > { %v2090_v35 = vpop.eup %2089 }
 0x3e3   : > { %v996_v37 = vmul.f32 0.6931472, %v2090_v35 }
 0x3e4   : > { %v2092_v39 = vpop.eup %2091 }
 0x3e5   : > { %v1002_v40 = vsel %vm1001_vm14, %v999_v38, %v996_v37  ;;  %v1005_v41 = vmul.f32 0.6931472, %v2092_v39 }
 0x3e6   : > { %v1012_v44 = vsel %vm986_vm15, %v980_v7, %v1002_v40 }
 0x3e7   : > { %1014 = vst.msk [vmem:[#allocation4] sm:$0xff] %vm656_vm11, %v1012_v44  ;;  %v1011_v45 = vsel %vm1010_vm0, %v1008_v42, %v1005_v41 }
 0x3e8   : > { %v1013_v46 = vsel %vm987_vm1, %v983_v13, %v1011_v45 }
 0x3e9   : > { %1015 = vst.msk [vmem:[#allocation4 + $0x8] sm:$0xff] %vm656_vm11, %v1013_v46 }
 0x3ea LB: >> { %v2349_v48 = vmov 3   ;;  %v2350_v49 = vmov 1   ;;  %s1807_s13 = sshll.u32 %s2341_s20, 5  ;;  %v2351_v52 = vmov 5   ;;  %v2352_v53 = vmov 2   ;;  %s2767_s28 = sshll.u32 %s2341_s20, 3  ;;  %s2341_s20 = sphi %s2754_s20, %s1079_s20   ;;  %v2337_v63 = vphi %v1072_v63, %v3058_v63   ;;  %v2333_v0 = vphi %v1073_v0, %v3057_v0  }
 0x3eb   : >> { %2096 = vset.pattern.permute.xlu0 %v2349_v48  ;;  %2093 = vset.pattern.permute.xlu1 %v2350_v49  ;;  %s1089_s23 = scalar_lea.vmem [#allocation6], %s1807_s13  ;;  %v2353_v54 = vmov 0   ;;  %v2354_v56 = vmov 4   ;;  %v2355_v58 = vmov 6   ;;  %v2356_v59 = vmov 7   ;;  %s1083_s19 = scalar_lea.vmem [#allocation4], %s2767_s28 }
 0x3ec   : >> { %v1091_v50 = vld [vmem:[%s1089_s23 + $0x8] sm:$0xff]  ;;  %v1090_v51 = vld [vmem:[%s1089_s23] sm:$0xff]  ;;  %v1093_v55 = vld [vmem:[%s1089_s23 + $0x18] sm:$0xff]  ;;  %v1096_v60 = vsub.s32 0, %v2603_v12  ;;  %v1106_v9 = vsub.s32 1, %v2603_v12  ;;  %v1116_v28 = vsub.s32 2, %v2603_v12 }
 0x3ed   : >> { %1223 = vperm.xlu0 %2096, %v1091_v50   ;;  %1191 = vperm.xlu1 %2093, %v1090_v51   ;;  %v1092_v57 = vld [vmem:[%s1089_s23 + $0x10] sm:$0xff]  ;;  %s1085_s17 = scalar_lea.vmem [#allocation5], %s2767_s28  ;;  %v1126_v36 = vsub.s32 3, %v2603_v12  ;;  %s1490_s16 = scalar_lea.vmem [#allocation7], %s2767_s28 }
 0x3ee   : >> { %v1086_v32 = vld [vmem:[%s1085_s17] sm:$0xff]  ;;  %s1079_s20 = sadd.s32 1, %s2341_s20  }
 0x3ef   : >> { %p1076_p10 = scmp.ge.s32.totalorder %s1079_s20, 2  }
 0x3f0   : >> { %v2771_v1 = vld [vmem:[%s1083_s19] sm:$0xff]  ;;  %1912 = vmatprep.subr.bf16.mxu0 (%p1076_p10), %v2346_v11  ;;  %1920 = vmatprep.mubr.msk.bf16.mxu0 (%p1076_p10), %vm2347_vm6, %v2346_v11  ;;  %s1820_s17 = sshll.u32 (%p1076_p10), %s2317_s29, 2  ;;  %s3059_s14 = sld [smem:[#allocation22_spill]] (%p1076_p10)  ;;  %vm1610_vm2 = vcmask (%p1076_p10), 257024  }
 0x3f1   : >> { %2098 = vset.pattern.permute.xlu0 %v2351_v52  ;;  %1195 = vperm.xlu1 %2093, %v1091_v50   ;;  %v1097_v5 = vrot.slane %v2771_v1, %v1096_v60  ;;  %v1107_v23 = vrot.slane %v2771_v1, %v1106_v9  ;;  %v1117_v33 = vrot.slane %v2771_v1, %v1116_v28  ;;  %s1629_s24 = sshll.u32 (%p1076_p10), %s2582_s15, 4  ;;  %s3060_s20 = sld [smem:[#allocation26_spill]] (%p1076_p10)  ;;  %s2952_s24 = int_to_ptr.vmem [resolvable:$true] %s1629_s24 }
 0x3f2   : >> { %1247 = vperm.xlu0 %2098, %v1090_v51   ;;  %v2798_v38 = vmul.f32 %v1086_v32, %v2771_v1  ;;  %v1127_v42 = vrot.slane %v2771_v1, %v1126_v36  ;;  %s2215_s13 = scalar_lea.vmem (%p1076_p10), %s2952_s24, 128  ;;  %s2357_s23 = smov (%p1076_p10), [#allocation13]  }
 0x3f3   : >> { %v1099_v8 = vmul.f32 %v1097_v5, %v2744_v62  ;;  %v1098_v10 = vmul.f32 %v1097_v5, %v2739_v61  ;;  %v1109_v26 = vmul.f32 %v1107_v23, %v2744_v62  ;;  %v1108_v29 = vmul.f32 %v1107_v23, %v2739_v61  ;;  %p2216_p12 = scmp.ne.s32.totalorder (%p1076_p10), %s2952_s24, %s2215_s13  ;;  %s2219_s28 = sshll.u32 (%p1076_p10), %s2357_s23, 4  ;;  %s2220_s28 = int_to_ptr.vmem [resolvable:$false] %s2219_s28 }
 0x3f4   : >> { %v1119_v37 = vmul.f32 %v1117_v33, %v2744_v62  ;;  %v1118_v44 = vmul.f32 %v1117_v33, %v2739_v61  ;;  %v1187_v45 = vrot.slane %v2798_v38, %v1096_v60  ;;  %s2221_s19 = scalar_lea.vmem (%p1076_p10), %s2220_s28, 256  ;;  %p2222_p7 = scmp.lt.s32.totalorder (%p1076_p10), %s2952_s24, %s2220_s28 }
 0x3f5   : >> { %2094 = vset.pattern.permute.xlu1 %v2352_v53  ;;  %v1102_v14 = vmul.f32 1.442695, %v1099_v8  ;;  %v1100_v25 = vmul.f32 1.442695, %v1098_v10  ;;  %v1112_v30 = vmul.f32 1.442695, %v1109_v26  ;;  %p2223_p9 = scmp.lt.s32.totalorder (%p1076_p10), %s2221_s19, %s2215_s13 }
 0x3f6   : >> { %2099 = vset.pattern.permute.xlu0 %v2353_v54  ;;  %1209 = vperm.xlu1 %2094, %v1091_v50   ;;  %v1110_v35 = vmul.f32 1.442695, %v1108_v29  ;;  %v1122_v46 = vmul.f32 1.442695, %v1119_v37  ;;  %v1146_v29 = vsub.s32 5, %v2603_v12  ;;  %p3061_p4 = scmp.ne.s32.totalorder (%p1076_p10), %s3059_s14, 0 }
 0x3f7   : >> { %1176 = vperm.xlu0 %2099, %v1090_v51   ;;  %2115 = vpow2.f32 %v1102_v14  ;;  %p2224_p11 = por (%p1076_p10), %p2223_p9, %p2222_p7 }
 0x3f8   : >> { %2117 = vpow2.f32 %v1100_v25  ;;  %p2217_p5 = pnand (%p1076_p10), %p2216_p12, %p3061_p4 }
 0x3f9   : >> { %2119 = vpow2.f32 %v1112_v30 }
 0x3fa   : >> { %2095 = vset.pattern.permute.xlu1 %v2349_v48  ;;  %2121 = vpow2.f32 %v1110_v35  ;;  %p2218_p6 = pneg (%p1076_p10), %p2217_p5 }
 0x3fb   : >> { %1181 = vperm.xlu0 %2099, %v1091_v50   ;;  %1219 = vperm.xlu1 %2095, %v1090_v51   ;;  %2123 = vpow2.f32 %v1122_v46 }
 0x3fc   : > { %p2225_p13 = pnand (%p1076_p10), %p2224_p11, %p2218_p6 }
 0x3ff   : >> { %1299 = vperm.xlu0 %2099, %v1093_v55   ;;  %2097 = vset.pattern.permute.xlu1 %v2354_v56 }
 0x400   : >> { %1233 = vperm.xlu1 %2097, %v1090_v51  }
 0x401   : >> { %v2116_v39 = vpop.eup %2115 }
 0x403   : >> { %2102 = vset.pattern.permute.xlu0 %v2352_v53 }
 0x404   : >> { %1205 = vperm.xlu0 %2102, %v1090_v51   ;;  %1237 = vperm.xlu1 %2097, %v1091_v50  }
 0x408   : >> { %1345 = vperm.xlu0 %2102, %v1092_v57   ;;  %2100 = vset.pattern.permute.xlu1 %v2351_v52 }
 0x409   : >> { %1251 = vperm.xlu1 %2100, %v1091_v50  }
 0x40c   : >> { %2107 = vset.pattern.permute.xlu0 %v2354_v56 }
 0x40d   : >> { %1395 = vperm.xlu0 %2107, %v1092_v57   ;;  %2101 = vset.pattern.permute.xlu1 %v2353_v54 }
 0x40e   : >> { %1294 = vperm.xlu1 %2101, %v1092_v57  }
 0x411   : >> { %2108 = vset.pattern.permute.xlu0 %v2355_v58 }
 0x412   : >> { %1265 = vperm.xlu0 %2108, %v1091_v50   ;;  %2103 = vset.pattern.permute.xlu1 %v2350_v49 }
 0x413   : >> { %1320 = vperm.xlu1 %2103, %v1092_v57  }
 0x416   : >> { %1445 = vperm.xlu0 %2108, %v1092_v57  }
 0x417   : >> { %1324 = vperm.xlu1 %2103, %v1093_v55  }
 0x41a   : >> { %2112 = vset.pattern.permute.xlu0 %v2356_v59 }
 0x41b   : >> { %1279 = vperm.xlu0 %2112, %v1091_v50   ;;  %2104 = vset.pattern.permute.xlu1 %v2352_v53  ;;  %v1289_v50 = vmul.f32 %v2333_v0, %v2116_v39  ;;  %v1215_v39 = vrot.slane %v2798_v38, %v1116_v28  ;;  %v1156_v28 = vsub.s32 6, %v2603_v12 }
 0x41c   : >> { %1349 = vperm.xlu1 %2104, %v1093_v55  }
 0x41f   : >> { %1474 = vperm.xlu0 %2112, %v1093_v55  }
 0x420   : >> { %2105 = vset.pattern.permute.xlu1 %v2355_v58 }
 0x421   : >> { %1261 = vperm.xlu1 %2105, %v1090_v51  }
 0x425   : >> { %2106 = vset.pattern.permute.xlu1 %v2349_v48  ;;  %v2118_v48 = vpop.eup %2117 }
 0x426   : >> { %1370 = vperm.xlu1 %2106, %v1092_v57  }
 0x42a   : >> { %1374 = vperm.xlu1 %2106, %v1093_v55  }
 0x42e   : >> { %2109 = vset.pattern.permute.xlu1 %v2354_v56  ;;  %v1136_v56 = vsub.s32 4, %v2603_v12 }
 0x42f   : >> { %1399 = vperm.xlu1 %2109, %v1093_v55  }
 0x430   : >> { %v1137_v0 = vrot.slane %v2771_v1, %v1136_v56 }
 0x432   : >> { %v1138_v33 = vmul.f32 %v1137_v0, %v2739_v61 }
 0x433   : >> { %2110 = vset.pattern.permute.xlu1 %v2356_v59 }
 0x434   : >> { %1275 = vperm.xlu1 %2110, %v1090_v51   ;;  %v1129_v51 = vmul.f32 %v1127_v42, %v2744_v62 }
 0x436   : >> { %v1132_v60 = vmul.f32 1.442695, %v1129_v51 }
 0x438   : >> { %2111 = vset.pattern.permute.xlu1 %v2351_v52  ;;  %v1120_v52 = vmul.f32 1.442695, %v1118_v44 }
 0x439   : >> { %1420 = vperm.xlu1 %2111, %v1092_v57  }
 0x43a   : >> { %2125 = vpow2.f32 %v1120_v52 }
 0x43b   : >> { %2127 = vpow2.f32 %v1132_v60 }
 0x43d   : >> { %1424 = vperm.xlu1 %2111, %v1093_v55  }
 0x441   : >> { %2113 = vset.pattern.permute.xlu1 %v2355_v58 }
 0x442   : >> { %1449 = vperm.xlu1 %2113, %v1093_v55   ;;  %v1288_v55 = vmul.f32 %v2337_v63, %v2118_v48  ;;  %v1201_v63 = vrot.slane %v2798_v38, %v1106_v9  ;;  %v1140_v48 = vmul.f32 1.442695, %v1138_v33 }
 0x446   : >> { %2114 = vset.pattern.permute.xlu1 %v2356_v59  ;;  %v2120_v59 = vpop.eup %2119 }
 0x447   : >> { %1470 = vperm.xlu1 %2114, %v1092_v57   ;;  %v1128_v57 = vmul.f32 %v1127_v42, %v2739_v61  ;;  %v2122_v10 = vpop.eup %2121 }
 0x448   : >> { %v2124_v37 = vpop.eup %2123 }
 0x449   : >> { %v1130_v14 = vmul.f32 1.442695, %v1128_v57 }
 0x44b   : >> { %2129 = vpow2.f32 %v1130_v14 }
 0x46c   : >> { %v2773_v4 = vpop.permute.xlu1 %1191  ;;  %v2776_v7 = vpop.permute.xlu0 %1223 }
 0x46d   : >> { %v1202_v9 = vmul.f32 %v1201_v63, %v2773_v4 }
 0x470   : >> { %v1196_v6 = vpop.permute.xlu1 %1195 }
 0x471   : >> { %v2784_v24 = vpop.permute.xlu0 %1247  ;;  %v1203_v26 = vmul.f32 %v1201_v63, %v1196_v6  ;;  %v1147_v6 = vrot.slane %v2771_v1, %v1146_v29 }
 0x473   : >> { %v1149_v52 = vmul.f32 %v1147_v6, %v2744_v62 }
 0x475   : >> { %v2781_v13 = vpop.permute.xlu1 %1209  ;;  %v1152_v63 = vmul.f32 1.442695, %v1149_v52 }
 0x476   : >> { %v1177_v31 = vpop.permute.xlu0 %1176  ;;  %v1217_v51 = vmul.f32 %v1215_v39, %v2781_v13  ;;  %v1157_v13 = vrot.slane %v2771_v1, %v1156_v28 }
 0x477   : >> { %v1188_v54 = vmul.f32 %v1187_v45, %v1177_v31  ;;  %v1139_v31 = vmul.f32 %v1137_v0, %v2744_v62  ;;  %v1229_v0 = vrot.slane %v2798_v38, %v1126_v36 }
 0x478   : >> { %v1159_v36 = vmul.f32 %v1157_v13, %v2744_v62 }
 0x479   : >> { %v2816_v5 = vadd.f32 %v1288_v55, %v1188_v54  ;;  %v1142_v42 = vmul.f32 1.442695, %v1139_v31  ;;  %v1231_v14 = vmul.f32 %v1229_v0, %v2776_v7  ;;  %v1166_v31 = vsub.s32 7, %v2603_v12 }
 0x47a   : >> { %v2787_v27 = vpop.permute.xlu1 %1219  ;;  %v1182_v40 = vpop.permute.xlu0 %1181  ;;  %v1809_v12 = vmul.f32 (%p1076_p10), -1.442695, %v2678_v43 }
 0x47b   : >> { %v1189_v49 = vmul.f32 %v1187_v45, %v1182_v40  ;;  %v1315_v30 = vmul.f32 %v2122_v10, %v2816_v5  ;;  %v2126_v45 = vpop.eup %2125  ;;  %2131 = vpow2.f32 %v1142_v42  ;;  %v1148_v10 = vmul.f32 %v1147_v6, %v2739_v61 }
 0x47c   : >> { %2133 = vpow2.f32 %v1140_v48  ;;  %v2128_v55 = vpop.eup %2127  ;;  %v1158_v6 = vmul.f32 %v1157_v13, %v2739_v61  ;;  %v1162_v48 = vmul.f32 1.442695, %v1159_v36 }
 0x47d   : >> { %v2814_v58 = vadd.f32 %v1289_v50, %v1189_v49  ;;  %v1317_v44 = vadd.f32 %v1315_v30, %v1202_v9  ;;  %v2130_v60 = vpop.eup %2129  ;;  %v1150_v30 = vmul.f32 1.442695, %v1148_v10  ;;  %2135 = vpow2.f32 %v1152_v63 }
 0x47e   : >> { %v1300_v25 = vpop.permute.xlu0 %1299  ;;  %v1160_v52 = vmul.f32 1.442695, %v1158_v6 }
 0x47f   : >> { %v2793_v34 = vpop.permute.xlu1 %1233  ;;  %v1316_v23 = vmul.f32 %v2120_v59, %v2814_v58  ;;  %v1340_v4 = vmul.f32 %v2126_v45, %v1317_v44  ;;  %2137 = vpow2.f32 %v1150_v30  ;;  %v1167_v45 = vrot.slane %v2771_v1, %v1166_v31 }
 0x480   : >> { %2139 = vpow2.f32 %v1162_v48 }
 0x481   : >> { %v1318_v32 = vadd.f32 %v1316_v23, %v1203_v26  ;;  %v1169_v1 = vmul.f32 %v1167_v45, %v2744_v62  ;;  %2141 = vpow2.f32 %v1160_v52  ;;  %v1497_v62 = vld [vmem:[#allocation5 + $0x8] sm:$0xff] (%p1076_p10) }
 0x483   : >> { %v2800_v41 = vpop.permute.xlu1 %1237  ;;  %v1206_v40 = vpop.permute.xlu0 %1205  ;;  %v1341_v46 = vmul.f32 %v2124_v37, %v1318_v32  ;;  %v1230_v37 = vmul.f32 %v1229_v0, %v2787_v27 }
 0x484   : >> { %v1216_v50 = vmul.f32 %v1215_v39, %v1206_v40 }
 0x485   : >> { %v1343_v54 = vadd.f32 %v1341_v46, %v1217_v51  ;;  %v2132_v39 = vpop.eup %2131  ;;  %v1243_v46 = vrot.slane %v2798_v38, %v1136_v56 }
 0x486   : >> { %v1342_v57 = vadd.f32 %v1340_v4, %v1216_v50  ;;  %v2134_v42 = vpop.eup %2133 }
 0x487   : >> { %v1366_v23 = vmul.f32 %v2128_v55, %v1343_v54  ;;  %v1346_v7 = vpop.permute.xlu0 %1345  ;;  %v1303_v55 = vmul.f32 %v1300_v25, %v2814_v58  ;;  %v1244_v63 = vmul.f32 %v1243_v46, %v2793_v34  ;;  %v2136_v25 = vpop.eup %2135 }
 0x488   : >> { %v2809_v53 = vpop.permute.xlu1 %1251  ;;  %v1365_v26 = vmul.f32 %v2130_v60, %v1342_v57  ;;  %v1245_v60 = vmul.f32 %v1243_v46, %v2800_v41  ;;  %v1352_v58 = vmul.f32 %v1346_v7, %v1342_v57 }
 0x489   : >> { %v1368_v9 = vadd.f32 %v1366_v23, %v1231_v14  ;;  %v1305_v23 = vsel %vm656_vm11, %v1303_v55, 0.0 }
 0x48a   : >> { %v1367_v40 = vadd.f32 %v1365_v26, %v1230_v37  ;;  %v2138_v26 = vpop.eup %2137  ;;  %v1354_v57 = vsel %vm656_vm11, %v1352_v58, 0.0 }
 0x48b   : >> { %v1391_v50 = vmul.f32 %v2132_v39, %v1368_v9 }
 0x48c   : >> { %v1390_v51 = vmul.f32 %v2134_v42, %v1367_v40  ;;  %v1396_v10 = vpop.permute.xlu0 %1395 }
 0x48d   : >> { %v2821_v8 = vpop.permute.xlu1 %1294 }
 0x48e   : >> { %v1302_v0 = vmul.f32 %v2821_v8, %v2816_v5  ;;  %v1392_v41 = vadd.f32 %v1390_v51, %v1244_v63 }
 0x490   : >> { %v1304_v34 = vsel %vm656_vm11, %v1302_v0, 0.0  ;;  %v1402_v6 = vmul.f32 %v1396_v10, %v1392_v41  ;;  %v2140_v0 = vpop.eup %2139 }
 0x491   : >> { %v1266_v37 = vpop.permute.xlu0 %1265 }
 0x492   : >> { %v1321_v35 = vpop.permute.xlu1 %1320 }
 0x493   : >> { %v1327_v56 = vmul.f32 %v1321_v35, %v1317_v44  ;;  %v1168_v35 = vmul.f32 %v1167_v45, %v2739_v61  ;;  %v1172_v44 = vmul.f32 1.442695, %v1169_v1  ;;  %v1808_v61 = vld [vmem:[%s3021_s11] ss:$0 sm:$0xff] (%p1076_p10) }
 0x495   : >> { %v1170_v46 = vmul.f32 1.442695, %v1168_v35  ;;  %2143 = vpow2.f32 %v1172_v44  ;;  %v1446_v63 = vpop.permute.xlu0 %1445 }
 0x496   : >> { %v1325_v49 = vpop.permute.xlu1 %1324 }
 0x497   : >> { %v1328_v4 = vmul.f32 %v1325_v49, %v1318_v32  ;;  %v1257_v32 = vrot.slane %v2798_v38, %v1146_v29  ;;  %v1393_v49 = vadd.f32 %v1391_v50, %v1245_v60  ;;  %2145 = vpow2.f32 %v1170_v46 }
 0x498   : > { %2151 = vpow2.f32 (%p1076_p10), %v1809_v12 }
 0x499   : >> { %v1330_v5 = vsel %vm656_vm11, %v1328_v4, 0.0  ;;  %v1416_v30 = vmul.f32 %v2136_v25, %v1393_v49  ;;  %v1259_v45 = vmul.f32 %v1257_v32, %v2809_v53  ;;  %v1258_v50 = vmul.f32 %v1257_v32, %v2784_v24 }
 0x49a   : >> { %v1271_v4 = vrot.slane %v2798_v38, %v1156_v28  ;;  %v1404_v53 = vsel %vm656_vm11, %v1402_v6, 0.0 }
 0x49b   : >> { %v1350_v59 = vpop.permute.xlu1 %1349  ;;  %v1418_v52 = vadd.f32 %v1416_v30, %v1259_v45 }
 0x49c   : >> { %v1353_v13 = vmul.f32 %v1350_v59, %v1343_v54  ;;  %v1329_v54 = vsel %vm656_vm11, %v1327_v56, 0.0  ;;  %v1273_v32 = vmul.f32 %v1271_v4, %v1266_v37 }
 0x49d   : >> { %v1331_v36 = vadd.f32 %v1330_v5, %v1329_v54 }
 0x49e   : >> { %v1355_v59 = vsel %vm656_vm11, %v1353_v13, 0.0  ;;  %v2142_v13 = vpop.eup %2141 }
 0x49f   : >> { %v1356_v48 = vadd.f32 %v1355_v59, %v1354_v57  ;;  %v1332_v55 = vrot.slane %v1331_v36, 4  ;;  %v2144_v44 = vpop.eup %2143 }
 0x4a0   : >> { %v2846_v33 = vpop.permute.xlu1 %1261 }
 0x4a1   : >> { %v1357_v56 = vrot.slane %v1356_v48, 4  ;;  %v1333_v58 = vadd.f32 %v1332_v55, %v1331_v36  ;;  %v1272_v28 = vmul.f32 %v1271_v4, %v2846_v33  ;;  %v2146_v46 = vpop.eup %2145 }
 0x4a3   : >> { %v1358_v5 = vadd.f32 %v1357_v56, %v1356_v48  ;;  %v1334_v59 = vrot.slane %v1333_v58, 2 }
 0x4a5   : >> { %v1371_v27 = vpop.permute.xlu1 %1370  ;;  %v1359_v36 = vrot.slane %v1358_v5, 2 }
 0x4a6   : >> { %v1377_v29 = vmul.f32 %v1371_v27, %v1367_v40  ;;  %v1415_v40 = vmul.f32 %v2138_v26, %v1392_v41 }
 0x4a8   : >> { %v1379_v27 = vsel %vm656_vm11, %v1377_v29, 0.0  ;;  %v1280_v29 = vpop.permute.xlu0 %1279 }
 0x4a9   : >> { %v1375_v14 = vpop.permute.xlu1 %1374 }
 0x4aa   : >> { %v1378_v8 = vmul.f32 %v1375_v14, %v1368_v9  ;;  %v1306_v9 = vadd.f32 %v1305_v23, %v1304_v34  ;;  %v1417_v14 = vadd.f32 %v1415_v40, %v1258_v50  ;;  %v1285_v34 = vrot.slane %v2798_v38, %v1166_v31 }
 0x4ab   : >> { %v1360_v40 = vadd.f32 %v1359_v36, %v1358_v5 }
 0x4ac   : >> { %v1380_v42 = vsel %vm656_vm11, %v1378_v8, 0.0  ;;  %v1307_v10 = vrot.slane %v1306_v9, 4  ;;  %v1440_v35 = vmul.f32 %v2142_v13, %v1417_v14  ;;  %v1287_v33 = vmul.f32 %v1285_v34, %v1280_v29 }
 0x4ad   : >> { %v1381_v60 = vadd.f32 %v1380_v42, %v1379_v27  ;;  %v1335_v42 = vadd.f32 %v1334_v59, %v1333_v58 }
 0x4ae   : >> { %v1400_v39 = vpop.permute.xlu1 %1399  ;;  %v1308_v41 = vadd.f32 %v1307_v10, %v1306_v9  ;;  %v1442_v30 = vadd.f32 %v1440_v35, %v1272_v28 }
 0x4af   : >> { %v1403_v7 = vmul.f32 %v1400_v39, %v1393_v49  ;;  %v1441_v49 = vmul.f32 %v2140_v0, %v1418_v52  ;;  %v1382_v25 = vrot.slane %v1381_v60, 4  ;;  %v1336_v10 = vrot.slane %v1335_v42, 1 }
 0x4b0   : >> { %v1309_v57 = vrot.slane %v1308_v41, 2  ;;  %v1452_v50 = vmul.f32 %v1446_v63, %v1442_v30 }
 0x4b1   : >> { %v1405_v51 = vsel %vm656_vm11, %v1403_v7, 0.0  ;;  %v1443_v54 = vadd.f32 %v1441_v49, %v1273_v32  ;;  %v1383_v26 = vadd.f32 %v1382_v25, %v1381_v60  ;;  %v1465_v32 = vmul.f32 %v2146_v46, %v1442_v30 }
 0x4b2   : >> { %v1406_v24 = vadd.f32 %v1405_v51, %v1404_v53  ;;  %v1310_v48 = vadd.f32 %v1309_v57, %v1308_v41  ;;  %v1475_v53 = vpop.permute.xlu0 %1474  ;;  %v1361_v49 = vrot.slane %v1360_v40, 1 }
 0x4b3   : >> { %v1276_v1 = vpop.permute.xlu1 %1275  ;;  %v1466_v7 = vmul.f32 %v2144_v44, %v1443_v54  ;;  %v1384_v45 = vrot.slane %v1383_v26, 2 }
 0x4b4   : >> { %v1407_v8 = vrot.slane %v1406_v24, 4  ;;  %v1286_v55 = vmul.f32 %v1285_v34, %v1276_v1  ;;  %v1311_v13 = vrot.slane %v1310_v48, 1 }
 0x4b5   : >> { %v2888_v0 = vadd.f32 %v1466_v7, %v1287_v33  }
 0x4b6   : >> { %v1408_v39 = vadd.f32 %v1407_v8, %v1406_v24  ;;  %v1467_v5 = vadd.f32 %v1465_v32, %v1286_v55   ;;  %v1312_v44 = vadd.f32 %v1311_v13, %v1310_v48 }
 0x4b7   : >> { %v3056_v4 = vmov %v2888_v0  ;;  %v1337_v0 = vadd.f32 %v1336_v10, %v1335_v42 }
 0x4b8   : >> { %v1421_v23 = vpop.permute.xlu1 %1420  ;;  %v1409_v27 = vrot.slane %v1408_v39, 2  ;;  %v1478_v41 = vmul.f32 %v1475_v53, %v3056_v4  ;;  %1492 = vst.msk [vmem:[#allocation2] sm:$0xff] (%p1076_p10), %vm656_vm11, %v1467_v5  ;;  %1493 = vst.msk [vmem:[#allocation2 + $0x8] sm:$0xff] (%p1076_p10), %vm656_vm11, %v3056_v4 }
 0x4b9   : >> { %v1427_v37 = vmul.f32 %v1421_v23, %v1417_v14  ;;  %v1454_v14 = vsel %vm656_vm11, %v1452_v50, 0.0 }
 0x4ba   : >> { %v1410_v58 = vadd.f32 %v1409_v27, %v1408_v39 }
 0x4bb   : >> { %v1429_v38 = vsel %vm656_vm11, %v1427_v37, 0.0  ;;  %v1338_v37 = vmul.f32 %v2625_v16, %v1337_v0  ;;  %v3057_v0 = vmov %v3056_v4  ;;  %v2149_v16 = vld [vmem:[%s3022_s12 + $0x10] sm:$0xff] (%p1076_p10)  }
 0x4bc   : >> { %v1425_v9 = vpop.permute.xlu1 %1424  ;;  %v1411_v59 = vrot.slane %v1410_v58, 1 }
 0x4bd   : >> { %v1428_v6 = vmul.f32 %v1425_v9, %v1418_v52  ;;  %v1385_v52 = vadd.f32 %v1384_v45, %v1383_v26  ;;  %v1480_v26 = vsel %vm656_vm11, %v1478_v41, 0.0  ;;  %v2148_v41 = vld [vmem:[%s3022_s12 + $0x8] sm:$0xff] (%p1076_p10)  }
 0x4be   : >> { %v1412_v7 = vadd.f32 %v1411_v59, %v1410_v58 }
 0x4bf   : >> { %v1430_v31 = vsel %vm656_vm11, %v1428_v6, 0.0  ;;  %v1386_v1 = vrot.slane %v1385_v52, 1  ;;  %v1313_v6 = vmul.f32 %v2622_v15, %v1312_v44  ;;  %v1810_v15 = vmul.f32 (%p1076_p10), -1.442695, %v2681_v47 }
 0x4c0   : >> { %v1431_v51 = vadd.f32 %v1430_v31, %v1429_v38 }
 0x4c1   : >> { %v1450_v60 = vpop.permute.xlu1 %1449  ;;  %v1387_v36 = vadd.f32 %v1386_v1, %v1385_v52  ;;  %v1339_v48 = vadd.f32 %v1338_v37, %v1313_v6  ;;  %2153 = vpow2.f32 (%p1076_p10), %v1810_v15 }
 0x4c2   : >> { %v1432_v56 = vrot.slane %v1431_v51, 4  ;;  %v1453_v24 = vmul.f32 %v1450_v60, %v1443_v54  ;;  %v1362_v54 = vadd.f32 %v1361_v49, %v1360_v40 }
 0x4c3   : >> { %v1388_v38 = vmul.f32 %v2631_v18, %v1387_v36  ;;  %v2152_v18 = vpop.eup (%p1076_p10), %2151 }
 0x4c4   : >> { %v1433_v25 = vadd.f32 %v1432_v56, %v1431_v51  ;;  %v1455_v63 = vsel %vm656_vm11, %v1453_v24, 0.0  ;;  %v1363_v42 = vmul.f32 %v2628_v17, %v1362_v54  ;;  %v1413_v51 = vmul.f32 %v2638_v19, %v1412_v7  ;;  %v2150_v17 = vld [vmem:[%s3022_s12 + $0x18] sm:$0xff] (%p1076_p10)  }
 0x4c5   : >> { %v1456_v28 = vadd.f32 %v1455_v63, %v1454_v14  ;;  %v3058_v63 = vmov %v1467_v5 }
 0x4c6   : >> { %v1434_v8 = vrot.slane %v1433_v25, 2  ;;  %v1471_v23 = vpop.permute.xlu1 %1470  ;;  %v1364_v27 = vadd.f32 %v1363_v42, %v1339_v48  ;;  %v2147_v63 = vld [vmem:[%s3022_s12] sm:$0xff] (%p1076_p10)  }
 0x4c7   : >> { %v1457_v34 = vrot.slane %v1456_v28, 4  ;;  %v1477_v35 = vmul.f32 %v1471_v23, %v1467_v5  ;;  %1913 = vmatpush3.bf16.msra.mxu0 (%p1076_p10), %v2147_v63  ;;  %v1506_v5 = vmul.f32 (%p1076_p10), %v1808_v61, %v1497_v62 }
 0x4c8   : >> { %v1435_v29 = vadd.f32 %v1434_v8, %v1433_v25  ;;  %v1389_v10 = vadd.f32 %v1388_v38, %v1364_v27  ;;  %1914 = vmatprep.subr.bf16.mxu0 (%p1076_p10), %v2346_v11 }
 0x4c9   : >> { %v1458_v57 = vadd.f32 %v1457_v34, %v1456_v28  ;;  %v1479_v30 = vsel %vm656_vm11, %v1477_v35, 0.0 }
 0x4ca   : >> { %v1436_v39 = vrot.slane %v1435_v29, 1  ;;  %v1481_v9 = vadd.f32 %v1480_v26, %v1479_v30  ;;  %v1414_v56 = vadd.f32 %v1413_v51, %v1389_v10 }
 0x4cb   : >> { %v1459_v33 = vrot.slane %v1458_v57, 2  ;;  %1915 = vmatpush3.bf16.msra.mxu0 (%p1076_p10), %v2148_v41  ;;  %v2154_v19 = vpop.eup (%p1076_p10), %2153 }
 0x4cc   : >> { %v1482_v45 = vrot.slane %v1481_v9, 4  ;;  %v1437_v31 = vadd.f32 %v1436_v39, %v1435_v29  ;;  %1916 = vmatprep.subr.bf16.mxu0 (%p1076_p10), %v2346_v11 }
 0x4cd   : >> { %v1460_v46 = vadd.f32 %v1459_v33, %v1458_v57 }
 0x4ce   : >> { %v1483_v50 = vadd.f32 %v1482_v45, %v1481_v9  ;;  %v1438_v53 = vmul.f32 %v2641_v20, %v1437_v31  ;;  %v1515_v20 = vadd.f32 (%p1076_p10), 1.0, %v2152_v18 }
 0x4cf   : >> { %v1461_v40 = vrot.slane %v1460_v46, 1  ;;  %1917 = vmatpush3.bf16.msra.mxu0 (%p1076_p10), %v2149_v16 }
 0x4d0   : >> { %v1484_v55 = vrot.slane %v1483_v50, 2  ;;  %v1439_v14 = vadd.f32 %v1438_v53, %v1414_v56  ;;  %1918 = vmatprep.subr.bf16.mxu0 (%p1076_p10), %v2346_v11  ;;  %2155 = vrcp.f32 (%p1076_p10), %v1515_v20 }
 0x4d1   : >> { %v1462_v60 = vadd.f32 %v1461_v40, %v1460_v46 }
 0x4d2   : >> { %v1485_v52 = vadd.f32 %v1484_v55, %v1483_v50 }
 0x4d3   : >> { %v1463_v24 = vmul.f32 %v2644_v21, %v1462_v60  ;;  %1919 = vmatpush3.bf16.msra.mxu0 (%p1076_p10), %v2150_v17  ;;  %v1516_v21 = vadd.f32 (%p1076_p10), 1.0, %v2154_v19 }
 0x4d4   : >> { %v1486_v13 = vrot.slane %v1485_v52, 1 }
 0x4d5   : >> { %v1464_v49 = vadd.f32 %v1463_v24, %v1439_v14  ;;  %2157 = vrcp.f32 (%p1076_p10), %v1516_v21 }
 0x4d6   : >> { %v1487_v32 = vadd.f32 %v1486_v13, %v1485_v52  ;;  %1078 = sbr.rel (!%p1076_p10) target bundleno = 1002 (0x3ea), region = 132 }
 0x4d8   : >> { %v1488_v58 = vmul.f32 %v2647_v22, %v1487_v32  ;;  %v1496_v22 = vld [vmem:[#allocation5] sm:$0xff] (%p1076_p10) }
 0x4d9   : > { %v1505_v4 = vmul.f32 (%p1076_p10), %v1808_v61, %v1496_v22 }
 0x4da   : >> { %v1489_v25 = vadd.f32 %v1488_v58, %v1464_v49  ;;  %v2156_v1 = vpop.eup (%p1076_p10), %2155 }
 0x4db   : > { %v1521_v34 = vmul.f32 (%p1076_p10), %v2156_v1, %v2678_v43 }
 0x4dc   : >> { %1491 = vst.msk [vmem:[%s1490_s16] sm:$0xff] %vm656_vm11, %v1489_v25  ;;  %s1626_s16 = sadd.s32 (%p1076_p10), %s1820_s17, %s2571_s18  ;;  %s2958_s18 = scalar_lea.sflag (%p1076_p10), [#allocation10], %s482_s21 }
 0x4dd   : > { %s1821_s22 = sshll.u32 %s1626_s16, 6 }
 0x4de   : > { %s2950_s29 = scalar_lea.hbm %s3060_s20, %s1821_s22 }
 0x4df   : > { %v2158_v23 = vpop.eup %2157 }
 0x4e0   : > { %v1522_v35 = vmul.f32 %v2158_v23, %v2681_v47 }
 0x4e3   : > { %v1494_v28 = vld [vmem:[#allocation7] sm:$0xff]  ;;  %v1495_v0 = vld [vmem:[#allocation7 + $0x8] sm:$0xff] }
 0x4e4   : > { %v1507_v11 = vadd.f32 %v1505_v4, %v1494_v28  ;;  %v1508_v8 = vadd.f32 %v1506_v5, %v1495_v0 }
 0x4e6   : > { %v1523_v44 = vmul.f32 %v1521_v34, %v1507_v11  ;;  %v1524_v54 = vmul.f32 %v1522_v35, %v1508_v8 }
 0x4e8   : > { %v1525_v59 = vpack.c.bf16 %v1524_v54, %v1523_v44 }
 0x4ea   : > { %1921 = vmatmul.mubr.msk.bf16.vlgmr.msra.gmra.mrb[8].mxu0 %vm656_vm11, %v1525_v59 }
 0x5bd   : > { %v1595_v29 = vpop.f32.mrb[8].mxu0 }
 0x5be   : > { %v1596_v26 = vadd.f32 %v2585_v2, %v1595_v29  ;;  %v1922_v57 = vpop.f32.mrb[9].mxu0 }
 0x5bf   : > { %v1598_v43 = vpop.f32.mrb[10].mxu0 }
 0x5c0   : > { %v1824_v47 = vpack.c.bf16 %v1596_v26, %v1596_v26  ;;  %v1599_v30 = vadd.f32 %v2587_v3, %v1598_v43  ;;  %v1923_v37 = vpop.f32.mrb[11].mxu0 }
 0x5c2   : > { %1611 = vst.msk [vmem:[%s2582_s15] sm:$0xf] %vm1610_vm2, %v1824_v47  ;;  %v1825_v2 = vpack.c.bf16 %v1599_v30, %v1599_v30 }
 0x5c4   : > { %1612 = vst.msk [vmem:[%s2582_s15 + $0x4] sm:$0xf] %vm1610_vm2, %v1825_v2 }
 0x5c5   : > { %2228 = shalt.err (!%p2225_p13)
}
 0x5c6   : > { %s2229_s21 = scalar_lea.hbm %s2950_s29, 128  ;;  %s2233_s16 = scalar_lea.hbm %s3060_s20, 512 }
 0x5c7   : > { %p2230_p1 = scmp.ne.s32.totalorder %s2950_s29, %s2229_s21  ;;  %p2234_p2 = scmp.lt.u32.totalorder %s2950_s29, %s3060_s20 }
 0x5c8   : > { %p2235_p8 = scmp.lt.u32.totalorder %s2233_s16, %s2229_s21  ;;  %p2237_p12 = scmp.lt.u32.totalorder %s2229_s21, %s2950_s29 }
 0x5c9   : > { %p2231_p3 = pnand %p2230_p1, %p3061_p4 }
 0x5ca   : > { %p2236_p10 = por %p2235_p8, %p2234_p2 }
 0x5cb   : > { %p2232_p0 = pneg %p2231_p3 }
 0x5cc   : > { %p2238_p5 = por %p2237_p12, %p2236_p10 }
 0x5ce   : > { %p2239_p6 = pnand %p2238_p5, %p2232_p0 }
 0x5d0   : > { %2242 = shalt.err (!%p2239_p6)
}
 0x5d1   : > { %s2358_s30 = smov 64   ;;  %s2359_s13 = smov 4  }
 0x5d2   : > { %1933 = dma.vmem_to_hbm [thread:$0]  (%p3061_p4), %s2952_s24, 128, %s2950_s29, %s2958_s18, %s2358_s30, %s2358_s30, %s2359_s13  }
 0x5d3 PF: > { %s3062_s23 = sld [smem:[#allocation20_spill]]  ;;  %s3063_s28 = sld [smem:[#allocation17_spill]] }
 0x5d4   : > { %s3064_s19 = sld [smem:[#allocation24_spill]] }
 0x5d9   : > { %p1950_p7 = scmp.ge.s32.totalorder %s3062_s23, 2  ;;  %s1644_s15 = sand.u32 1, %s3063_s28  }
 0x5da   : > { %p3065_p9 = scmp.ne.s32.totalorder %s3064_s19, 0  ;;  %s1645_s21 = scalar_lea.sflag [#allocation10], %s1644_s15 }
 0x5dc   : > { %p1943_p11 = pnand %p1950_p7, %p3065_p9 }
 0x5de   : > { %2296 = dma.done.wait (!%p1943_p11), %s1645_s21, 128  }
 0x5df   : > { %2298 = vsyncadd (!%p1943_p11), %s1645_s21, 4294967168  ;;  %s28_s15 = sadd.s32 1, %s3062_s23   ;;  %s3066_s17 = sld [smem:[#allocation25_spill]] }
 0x5e0   : > { %p25_p13 = scmp.ge.s32.totalorder %s28_s15, 6   ;;  %s3067_s28 = sld [smem:[#allocation18_spill]] }
 0x5e1   : > { %s3068_s29 = sld [smem:[#allocation19_spill]]  ;;  %s3069_s30 = sld [smem:[#allocation21_spill]] }
 0x5e2   : > { %s3070_s14 = sld [smem:[#allocation23_spill]]  ;;  %s3071_s25 = smov %s2305_s26 }
 0x5e3   : > { %s3072_s26 = smov %s2309_s27  ;;  %27 = sbr.rel (!%p25_p13) target bundleno = 9 (0x9), region = 143 }
 0x5e5   : > { %s3073_s27 = smov %s3066_s17 }
 0x5ea   :  { %1650 = vsyncpa [#allocation9], 1 }
 0x5eb   :  { %1652 = vsyncpa [#allocation9 + $0x1], 1 }
 0x5ec   :  { %1653 = vsyncpa [#allocation12], 1 }
 0x5ed   :  { %1654 = vsyncpa [#allocation10], 1 }
 0x5ee   :  { %1656 = vsyncpa [#allocation10 + $0x1], 1 }

// kernel: tpu_custom_call.1
= control target key start
LH: loop header
LB: loop body
LE: loop exit
PB: predicated region body
PF: predicated region fallthrough
CT: control target
= control target key end

     0   :  { %s3010_s0 = inlined_call_operand.vmem [shape: bf16[2,32,32], index: 0, kind: input, shape index: {}]   ;;  %s3011_s1 = inlined_call_operand.vmem [shape: f32[1,32], index: 1, kind: input, shape index: {}]   ;;  %s3012_s2 = inlined_call_operand.vmem [shape: bf16[32,64], index: 2, kind: input, shape index: {}]   ;;  %s3013_s3 = inlined_call_operand.vmem [shape: bf16[32,64], index: 3, kind: input, shape index: {}]   ;;  %s3014_s4 = inlined_call_operand.hbm [shape: f32[4,64], index: 4, kind: input, shape index: {}]   ;;  %s3015_s5 = inlined_call_operand.vmem [shape: f32[1,64], index: 5, kind: input, shape index: {}]   ;;  %s3016_s6 = inlined_call_operand.vmem [shape: bf16[64,128], index: 6, kind: input, shape index: {}]   ;;  %s3017_s7 = inlined_call_operand.vmem [shape: bf16[32,64], index: 7, kind: input, shape index: {}]   ;;  %s3018_s8 = inlined_call_operand.vmem [shape: bf16[128,64], index: 8, kind: input, shape index: {}]   ;;  %s3019_s9 = inlined_call_operand.hbm [shape: f32[1,64], index: 9, kind: input, shape index: {}]   ;;  %s3020_s10 = inlined_call_operand.vmem [shape: f32[16,64], index: 10, kind: input, shape index: {}]   ;;  %s3021_s11 = inlined_call_operand.vmem [shape: f32[1,64], index: 11, kind: input, shape index: {}]   ;;  %s3022_s12 = inlined_call_operand.vmem [shape: bf16[64,32], index: 12, kind: input, shape index: {}]   ;;  %s3023_s13 = inlined_call_operand.hbm [shape: bf16[2,32,32], index: 13, kind: output, shape index: {}]  }
   0x1   :  { %3039 = sst [smem:[#allocation26_spill]] %s3023_s13 }
   0x2   :  { %18 = vsyncpa [#allocation9], 0 }
   0x3   :  { %19 = vsyncpa [#allocation12], 0 }
   0x4   :  { %20 = vsyncpa [#allocation10], 0 }
   0x5   :  { %22 = vsyncpa [#allocation10 + $0x1], 0  ;;  %s2430_s25 = smov 0   ;;  %s2432_s26 = smov 0  }
   0x6   :  { %s2434_s27 = smov 0   ;;  %s2436_s28 = smov 0  }
   0x7   :  { %s2438_s29 = smov 0   ;;  %s2440_s30 = smov 0  }
   0x8   :  { %s2442_s14 = smov 0   ;;  %s2444_s15 = smov 0  }
   0x9 LB: > { %3040 = sst [smem:[#allocation17_spill]] %s2301_s25  ;;  %s1752_s16 = sadd.s32 4294967295, %s2329_s15   ;;  %s2329_s15 = sphi %s2444_s15, %s28_s15   ;;  %s2325_s14 = sphi %s2442_s14, %s3070_s14   ;;  %s2321_s30 = sphi %s2440_s30, %s3069_s30   ;;  %s2317_s29 = sphi %s2438_s29, %s3068_s29   ;;  %s2313_s28 = sphi %s2436_s28, %s3067_s28   ;;  %s2309_s27 = sphi %s2434_s27, %s3073_s27   ;;  %s2305_s26 = sphi %s2432_s26, %s3072_s26   ;;  %s2301_s25 = sphi %s2430_s25, %s3071_s25  }
   0xa   : > { %3041 = sst [smem:[#allocation18_spill]] %s2321_s30  ;;  %s1753_s17 = sadd.s32 4294967294, %s2329_s15  }
   0xb   : > { %3042 = sst [smem:[#allocation19_spill]] %s2325_s14  ;;  %s37_s18 = sadd.s32 1, %s2321_s30 }
   0xc   : > { %3043 = sst [smem:[#allocation20_spill]] %s2329_s15  ;;  %s40_s19 = sadd.s32 1, %s2325_s14 }
   0xd   : > { %p38_p0 = scmp.ge.s32.totalorder %s37_s18, 2  ;;  %s329_s20 = sadd.s32 1, %s2309_s27 }
   0xe   : > { %p339_p1 = scmp.ne.s32.totalorder %s2309_s27, %s2305_s26  ;;  %p340_p2 = scmp.eq.s32.totalorder %s1752_s16, 3 }
   0xf   : > { %s3075_s18 = smov (%p38_p0, %s37_s18), 0  ;;  %s3077_s19 = smov (!%p38_p0, %s40_s19), %s2325_s14 }
  0x10   : > { %3044 = sst [smem:[#allocation21_spill]] %s3075_s18  ;;  %s325_s21 = ssub.s32 %s2321_s30, %s3075_s18 }
  0x11   : > { %p2482_p3 = por %p340_p2, %p339_p1  ;;  %p42_p4 = scmp.ge.s32.totalorder %s3077_s19, 2 }
  0x12   : > { %p345_p5 = scmp.ne.s32.totalorder %s2305_s26, %s2301_s25  ;;  %p346_p6 = scmp.eq.s32.totalorder %s1753_s17, 3 }
  0x13   : > { %s3045_s22 = scalar_select %p2482_p3, 1, 0 }
  0x14   : > { %p1754_p7 = scmp.ge.s32.totalorder %s2329_s15, 1  ;;  %s3079_s19 = smov (%p42_p4, %s3077_s19), 0 }
  0x15   : > { %3046 = sst [smem:[#allocation22_spill]] %s3045_s22  ;;  %p2491_p8 = por %p346_p6, %p345_p5 }
  0x16   : > { %3047 = sst [smem:[#allocation23_spill]] %s3079_s19  ;;  %p353_p9 = scmp.lt.s32.totalorder %s2329_s15, 5 }
  0x17   : > { %s3048_s23 = scalar_select %p2491_p8, 1, 0 }
  0x18   : > { %s324_s24 = ssub.s32 %s2325_s14, %s3079_s19  ;;  %p2498_p10 = pnand %p1754_p7, %p353_p9 }
  0x19   : > { %3049 = sst [smem:[#allocation24_spill]] %s3048_s23  ;;  %s326_s13 = sor.u32 %s325_s21, %s324_s24 }
  0x1a   : > { %s3050_s18 = scalar_select %p2498_p10, 1, 0 }
  0x1b   : > { %p327_p11 = scmp.eq.s32.totalorder %s326_s13, 0  ;;  %p2502_p12 = scmp.eq.s32.totalorder %s1752_s16, 0 }
  0x1c   : > { %p1935_p13 = pneg %p2498_p10  ;;  %s2343_s25 = smov [#allocation8]  }
  0x1d   : > { %s3051_s30 = scalar_select %p2502_p12, 1, 0 }
  0x1e   : > { %s2509_s17 = scalar_select %p327_p11, %s2309_s27, %s329_s20  }
  0x1f   : > { %s375_s23 = sshll.u32 %s2343_s25, 4  ;;  %p2513_p0 = pnand %p2502_p12, %p1935_p13  ;;  %s376_s23 = int_to_ptr.vmem [resolvable:$true] %s375_s23 }
  0x20   : > { %3052 = sst [smem:[#allocation25_spill]] %s2509_s17  ;;  %s2344_s13 = smov [#allocation11]  }
  0x21   : > { %s398_s16 = sshll.u32 %s2344_s13, 4  ;;  %s2159_s14 = scalar_lea.hbm %s3014_s4, 64  ;;  %s399_s16 = int_to_ptr.vmem [resolvable:$true] %s398_s16 }
  0x22   : > { %p2160_p1 = scmp.ne.s32.totalorder %s3014_s4, %s2159_s14  ;;  %p2161_p2 = pneg %p2513_p0 }
  0x23   : > { %p2166_p6 = scmp.lt.u32.totalorder %s2159_s14, %s3014_s4 }
  0x24   : > { %p2162_p4 = pnand %p2161_p2, %p2160_p1 }
  0x26   : > { %p2163_p5 = pneg %p2162_p4 }
  0x28   : > { %p2168_p7 = pnand %p2166_p6, %p2163_p5 }
  0x2a   : > { %2171 = shalt.err (!%p2168_p7)
}
  0x2b   : > { %s2172_s13 = scalar_lea.vmem %s376_s23, 64  ;;  %p2180_p8 = scmp.lt.s32.totalorder %s376_s23, %s376_s23 }
  0x2c   : > { %p2173_p9 = scmp.ne.s32.totalorder %s376_s23, %s2172_s13  ;;  %p2181_p3 = scmp.lt.s32.totalorder %s2172_s13, %s2172_s13 }
  0x2e   : > { %p2175_p11 = pnand %p2173_p9, %p2161_p2  ;;  %p2182_p12 = por %p2181_p3, %p2180_p8 }
  0x30   : > { %p2176_p13 = pneg %p2175_p11 }
  0x32   : > { %p2183_p10 = pnand %p2182_p12, %p2176_p13 }
  0x34   : > { %2186 = shalt.err (!%p2183_p10)
}
  0x35   : > { %1938 = dma.hbm_to_vmem [thread:$0]  (!%p2513_p0), %s3014_s4, 64, %s376_s23, [#allocation9]  }
  0x36   : > { %s2187_s24 = scalar_lea.hbm %s3019_s9, 16 }
  0x37   : > { %p2188_p1 = scmp.ne.s32.totalorder %s3019_s9, %s2187_s24  ;;  %p2194_p10 = scmp.lt.u32.totalorder %s2187_s24, %s3019_s9 }
  0x39   : > { %p2190_p3 = pnand %p2188_p1, %p2161_p2 }
  0x3b   : > { %p2191_p8 = pneg %p2190_p3 }
  0x3d   : > { %p2196_p12 = pnand %p2194_p10, %p2191_p8 }
  0x3f   : > { %2199 = shalt.err (!%p2196_p12)
}
  0x40   : > { %s2200_s23 = scalar_lea.vmem %s399_s16, 16  ;;  %s2207_s15 = scalar_lea.vmem %s399_s16, 32 }
  0x41   : > { %p2201_p4 = scmp.ne.s32.totalorder %s399_s16, %s2200_s23  ;;  %p2208_p7 = scmp.lt.s32.totalorder %s399_s16, %s399_s16 }
  0x42   : > { %p2209_p9 = scmp.lt.s32.totalorder %s2207_s15, %s2200_s23 }
  0x43   : > { %p2203_p5 = pnand %p2201_p4, %p2161_p2 }
  0x44   : > { %p2210_p11 = por %p2209_p9, %p2208_p7 }
  0x45   : > { %p2204_p6 = pneg %p2203_p5 }
  0x47   : > { %p2211_p13 = pnand %p2210_p11, %p2204_p6 }
  0x49   : > { %2214 = shalt.err (!%p2211_p13)
}
  0x4a   : > { %1941 = dma.hbm_to_vmem [thread:$0]  (!%p2513_p0), %s3019_s9, 16, %s399_s16, [#allocation12]  }
  0x4b   : > { %p3054_p1 = scmp.ne.s32.totalorder %s3050_s18, 0 }
  0x4c   : > { %p3055_p3 = scmp.ne.s32.totalorder (!%p3054_p1), %s3051_s30, 0 }
  0x4d   : > { %433 = sbr.rel (%p3054_p1) target bundleno = 1491 (0x5d3), region = 72 }
  0x54   : > { %2288 = dma.done.wait (%p3055_p3), [#allocation9], 64  }
  0x55   : > { %2290 = vsyncadd (%p3055_p3), [#allocation9], 4294967232 }
  0x56   : > { %2292 = dma.done.wait (%p3055_p3), [#allocation12], 16  }
  0x57   : > { %2294 = vsyncadd (%p3055_p3), [#allocation12], 4294967280  ;;  %s482_s21 = sand.u32 1, %s2305_s26   ;;  %s2571_s18 = sshll.u32 %s2313_s28, 1 }
  0x58   : > { %s1761_s16 = sshll.u32 %s482_s21, 3  ;;  %p486_p0 = scmp.lt.s32.totalorder %s2317_s29, 1 }
  0x59   : > { %p488_p2 = scmp.lt.s32.totalorder %s2571_s18, 3  ;;  %s2582_s15 = scalar_lea.vmem [#allocation13], %s1761_s16 }
  0x5a   : > { %s487_s14 = scalar_select %p486_p0, %s2317_s29, 1 }
  0x5b   : > { %s489_s22 = scalar_select %p488_p2, %s2571_s18, 3 }
  0x5c   : > { %s1763_s24 = sshll.u32 %s487_s14, 2  ;;  %p1765_p8 = scmp.ne.s32.totalorder %s2313_s28, 0 }
  0x5d   : > { %s491_s25 = sadd.s32 %s1763_s24, %s489_s22  ;;  %vm501_vm0 = vcmask (!%p1765_p8), 523264   ;;  %v2345_v0 = vmov (!%p1765_p8), 0.0  }
  0x5e   : > { %s1764_s30 = sshll.u32 %s491_s25, 2  ;;  %500 = sbr.rel (%p1765_p8) target bundleno = 101 (0x65), region = 84  ;;  %502 = vst.msk [vmem:[#allocation2] sm:$0xff] (!%p1765_p8), %vm501_vm0, %v2345_v0  ;;  %503 = vst.msk [vmem:[#allocation2 + $0x8] sm:$0xff] (!%p1765_p8), %vm501_vm0, %v2345_v0 }
  0x5f   : > { %s493_s23 = scalar_lea.vmem %s3010_s0, %s1764_s30  ;;  %504 = vst.msk [vmem:[#allocation3] sm:$0xff] (!%p1765_p8), %vm501_vm0, %v2345_v0  ;;  %505 = vst.msk [vmem:[#allocation3 + $0x8] sm:$0xff] (!%p1765_p8), %vm501_vm0, %v2345_v0 }
  0x60   : > { %506 = vst.msk [vmem:[#allocation3 + $0x10] sm:$0xff] (!%p1765_p8), %vm501_vm0, %v2345_v0 }
  0x65 PF: > { %v1827_v1 = vld [vmem:[%s493_s23] sm:$0xff]   ;;  %vm513_vm1 = vcmask 261120   ;;  %v1046_v8 = vlaneseq  ;;  %v2346_v11 = vmov 0.0   ;;  %v2057_v13 = vld [vmem:[%s3012_s2 + $0x8] sm:$0xff]   ;;  %vm2347_vm6 = vmmov 0   ;;  %v2061_v39 = vld [vmem:[%s3016_s6 + $0x10] sm:$0xff]  }
  0x66   : > { %v2585_v2 = vunpack.c.l.bf16 %v1827_v1  ;;  %v2587_v3 = vunpack.c.h.bf16 %v1827_v1  ;;  %v2055_v9 = vld [vmem:[%s3012_s2] sm:$0xff]   ;;  %1858 = vmatprep.subr.bf16.mxu0 %v2346_v11  ;;  %1866 = vmatprep.subr.bf16.mxu1 %v2346_v11  ;;  %v2058_v14 = vld [vmem:[%s3013_s3 + $0x8] sm:$0xff]   ;;  %v2062_v40 = vld [vmem:[%s3016_s6 + $0x18] sm:$0xff]   ;;  %vm656_vm11 = vcmask 523264   ;;  %vm711_vm12 = vcmask 523269   ;;  %s2348_s14 = smov 120  }
  0x67   : > { %v2056_v10 = vld [vmem:[%s3013_s3] sm:$0xff]   ;;  %v2603_v12 = vshrl.u32 %v1046_v8, 7  ;;  %1859 = vmatpush3.bf16.msra.mxu0 %v2055_v9  ;;  %1862 = vmatprep.mubr.msk.bf16.mxu0 %vm2347_vm6, %v2346_v11  ;;  %v2060_v38 = vld [vmem:[%s3016_s6 + $0x8] sm:$0xff]   ;;  %v1774_v50 = vld [vmem:[#allocation8] ss:$0 sm:$0xff]  ;;  %vm1018_vm13 = vcmask 64512  }
  0x68   : > { %v511_v4 = vmul.f32 %v2585_v2, %v2585_v2  ;;  %v512_v5 = vmul.f32 %v2587_v3, %v2587_v3  ;;  %1867 = vmatpush3.bf16.msra.mxu1 %v2056_v10  ;;  %1860 = vmatprep.subr.bf16.mxu0 %v2346_v11  ;;  %v1766_v32 = vld [vmem:[%s3011_s1] ss:$0 sm:$0xff]  ;;  %v1775_v52 = vld [vmem:[#allocation8 + $0x1] ss:$0 sm:$0xff]  ;;  %v1776_v59 = vld [vmem:[#allocation8 + $0x2] ss:$0 sm:$0xff] }
  0x69   : > { %1868 = vmatprep.subr.bf16.mxu1 %v2346_v11  ;;  %vm1048_vm2 = vcmp.eq.s32.totalorder %v2603_v12, 0  ;;  %vm1051_vm3 = vcmp.eq.s32.totalorder %v2603_v12, 1  ;;  %vm1054_vm4 = vcmp.eq.s32.totalorder %v2603_v12, 2  ;;  %vm1057_vm5 = vcmp.eq.s32.totalorder %v2603_v12, 3  ;;  %1870 = vmatprep.mubr.msk.bf16.mxu1 %vm2347_vm6, %v2346_v11  ;;  %v2059_v37 = vld [vmem:[%s3016_s6] sm:$0xff]   ;;  %s2754_s20 = smov 0  }
  0x6a   : > { %v514_v6 = vsel %vm513_vm1, %v511_v4, 0.0  ;;  %v517_v7 = vsel %vm513_vm1, %v512_v5, 0.0  ;;  %v2622_v15 = vsel %vm1048_vm2, 1.0, %v2346_v11  ;;  %v2625_v16 = vsel %vm1051_vm3, 1.0, %v2346_v11  ;;  %v2063_v41 = vld [vmem:[%s3017_s7] sm:$0xff]  }
  0x6b   : > { %515 = vadd.xlane.f32.xlu0 %v514_v6  ;;  %v2628_v17 = vsel %vm1054_vm4, 1.0, %v2346_v11  ;;  %v2631_v18 = vsel %vm1057_vm5, 1.0, %v2346_v11  ;;  %vm1060_vm7 = vcmp.eq.s32.totalorder %v2603_v12, 4  ;;  %vm1063_vm8 = vcmp.eq.s32.totalorder %v2603_v12, 5  ;;  %1861 = vmatpush3.bf16.msra.mxu0 %v2057_v13  ;;  %v1773_v51 = vld [vmem:[%s3015_s5] ss:$0 sm:$0xff] }
  0x6c   : > { %vm1066_vm9 = vcmp.eq.s32.totalorder %v2603_v12, 6  ;;  %vm1069_vm10 = vcmp.eq.s32.totalorder %v2603_v12, 7  ;;  %1869 = vmatpush3.bf16.msra.mxu1 %v2058_v14  ;;  %v2638_v19 = vsel %vm1060_vm7, 1.0, %v2346_v11  ;;  %v2641_v20 = vsel %vm1063_vm8, 1.0, %v2346_v11  ;;  %1874 = vmatprep.subr.bf16.mxu0 %v2346_v11  ;;  %v1777_v0 = vld [vmem:[#allocation8 + $0x3] ss:$0 sm:$0xff] }
  0x6d   : > { %v2644_v21 = vsel %vm1066_vm9, 1.0, %v2346_v11  ;;  %v2647_v22 = vsel %vm1069_vm10, 1.0, %v2346_v11 }
  0x6f   : > { %518 = vadd.xlane.f32.xlu0 %v517_v7 }
  0xf8   : > { %v516_v23 = vpop.xlane.xlu0 %515 }
  0xf9   : > { %v521_v24 = vmul.f32 0.03125, %v516_v23 }
  0xfb   : > { %v523_v25 = vadd.f32 1e-05, %v521_v24 }
  0xfc   : > { %v519_v26 = vpop.xlane.xlu0 %518 }
  0xfd   : > { %2073 = vrsqrt.f32 %v523_v25  ;;  %v522_v27 = vmul.f32 0.03125, %v519_v26 }
  0xff   : > { %v524_v28 = vadd.f32 1e-05, %v522_v27 }
 0x101   : > { %2075 = vrsqrt.f32 %v524_v28 }
 0x107   : > { %v2074_v29 = vpop.eup %2073 }
 0x108   : > { %v527_v30 = vmul.f32 %v2074_v29, %v2585_v2 }
 0x10a   : > { %v536_v34 = vmul.f32 %v1766_v32, %v527_v30 }
 0x10b   : > { %v2076_v31 = vpop.eup %2075 }
 0x10c   : > { %v528_v33 = vmul.f32 %v2076_v31, %v2587_v3 }
 0x10e   : > { %v537_v35 = vmul.f32 %v1766_v32, %v528_v33 }
 0x110   : > { %v538_v36 = vpack.c.bf16 %v537_v35, %v536_v34 }
 0x112   : > { %1863 = vmatmul.mubr.msk.bf16.vlgmr.msra.gmra.mrb[0].mxu0 %vm513_vm1, %v538_v36  ;;  %1871 = vmatmul.mubr.msk.bf16.vlgmr.msra.gmra.mrb[0].mxu1 %vm513_vm1, %v538_v36 }
 0x113   : > { %1882 = vmatprep.mubr.msk.bf16.mxu0 %vm2347_vm6, %v2346_v11  ;;  %1875 = vmatpush3.bf16.msra.mxu0 %v2059_v37 }
 0x114   : > { %1876 = vmatprep.subr.bf16.mxu0 %v2346_v11  ;;  %1888 = vmatprep.mubr.msk.bf16.mxu1 %vm656_vm11, %v2063_v41  ;;  %v2066_v41 = vld [vmem:[%s3018_s8 + $0x8] sm:$0xff]  }
 0x117   : > { %1877 = vmatpush3.bf16.msra.mxu0 %v2060_v38 }
 0x118   : > { %1878 = vmatprep.subr.bf16.mxu0 %v2346_v11 }
 0x11b   : > { %1879 = vmatpush3.bf16.msra.mxu0 %v2061_v39  ;;  %v2064_v39 = vld [vmem:[%s3017_s7 + $0x8] sm:$0xff]  }
 0x11c   : > { %1880 = vmatprep.subr.bf16.mxu0 %v2346_v11 }
 0x11f   : > { %1881 = vmatpush3.bf16.msra.mxu0 %v2062_v40  ;;  %v2065_v40 = vld [vmem:[%s3018_s8] sm:$0xff]  }
 0x1e5   : > { %v592_v42 = vpop.f32.mrb[0].mxu0  ;;  %v2678_v43 = vpop.f32.mrb[0].mxu1 }
 0x1e6   : > { %657 = vst.msk [vmem:[#allocation3 + $0x8] sm:$0xff] %vm656_vm11, %v592_v42  ;;  %v1864_v44 = vpop.f32.mrb[1].mxu0  ;;  %v1872_v45 = vpop.f32.mrb[1].mxu1  ;;  %v2067_v42 = vld [vmem:[%s3018_s8 + $0x10] sm:$0xff]  }
 0x1e7   : > { %v595_v46 = vpop.f32.mrb[2].mxu0  ;;  %v2681_v47 = vpop.f32.mrb[2].mxu1  ;;  %v2068_v44 = vld [vmem:[%s3018_s8 + $0x18] sm:$0xff]   ;;  %v2069_v45 = vld [vmem:[%s3018_s8 + $0x20] sm:$0xff]  }
 0x1e8   : > { %658 = vst.msk [vmem:[#allocation3 + $0x10] sm:$0xff] %vm656_vm11, %v595_v46  ;;  %v1865_v48 = vpop.f32.mrb[3].mxu0  ;;  %v1873_v49 = vpop.f32.mrb[3].mxu1 }
 0x1e9   : > { %v2071_v48 = vld [vmem:[%s3018_s8 + $0x30] sm:$0xff]   ;;  %v2072_v49 = vld [vmem:[%s3018_s8 + $0x38] sm:$0xff]  }
 0x1ed   : > { %v668_v53 = vld [vmem:[#allocation3 + $0x5] sm:$0xff] }
 0x1ee   : > { %v679_v54 = vld [vmem:[#allocation3 + $0x6] sm:$0xff]  ;;  %v674_v56 = vmul.f32 %v1774_v50, %v668_v53 }
 0x1ef   : > { %v690_v55 = vld [vmem:[#allocation3 + $0x7] sm:$0xff]  ;;  %v685_v62 = vmul.f32 %v1775_v52, %v679_v54  ;;  %v691_v63 = vld [vmem:[#allocation3 + $0xf] sm:$0xff] }
 0x1f0   : > { %712 = vst.msk [vmem:[#allocation3] sm:$0xe0] %vm711_vm12, %v595_v46  ;;  %v669_v57 = vld [vmem:[#allocation3 + $0xd] sm:$0xff]  ;;  %v676_v61 = vadd.f32 %v1773_v51, %v674_v56  ;;  %v696_v7 = vmul.f32 %v1776_v59, %v690_v55  ;;  %v697_v10 = vmul.f32 %v1776_v59, %v691_v63  ;;  %v2070_v46 = vld [vmem:[%s3018_s8 + $0x28] sm:$0xff]  }
 0x1f1   : > { %v680_v58 = vld [vmem:[#allocation3 + $0xe] sm:$0xff]  ;;  %v675_v60 = vmul.f32 %v1774_v50, %v669_v57 }
 0x1f2   : > { %v701_v1 = vld [vmem:[#allocation3 + $0x8] sm:$0xff]  ;;  %v686_v5 = vmul.f32 %v1775_v52, %v680_v58  ;;  %v687_v6 = vadd.f32 %v685_v62, %v676_v61  ;;  %v702_v8 = vld [vmem:[#allocation3 + $0x10] sm:$0xff]  ;;  %v2744_v62 = vld [vmem:[%s3020_s10 + $0x8] sm:$0xff] }
 0x1f3   : > { %v677_v4 = vadd.f32 %v1773_v51, %v675_v60  ;;  %v707_v14 = vmul.f32 %v1777_v0, %v701_v1  ;;  %v708_v24 = vmul.f32 %v1777_v0, %v702_v8  ;;  %v2739_v61 = vld [vmem:[%s3020_s10] sm:$0xff]  ;;  %v1073_v0 = vld [vmem:[#allocation2 + $0x8] sm:$0xff]  }
 0x1f4   : > { %v698_v13 = vadd.f32 %v696_v7, %v687_v6  ;;  %v1072_v63 = vld [vmem:[#allocation2] sm:$0xff]  }
 0x1f5   : > { %v688_v9 = vadd.f32 %v686_v5, %v677_v4  ;;  %v1789_v5 = vld [vmem:[#allocation11] ss:$0 sm:$0xff] }
 0x1f6   : > { %v709_v25 = vadd.f32 %v707_v14, %v698_v13 }
 0x1f7   : > { %v699_v23 = vadd.f32 %v697_v10, %v688_v9 }
 0x1f8   : > { %v1778_v27 = vmul.f32 -1.442695, %v709_v25 }
 0x1f9   : > { %v710_v26 = vadd.f32 %v708_v24, %v699_v23 }
 0x1fa   : > { %2077 = vpow2.f32 %v1778_v27 }
 0x1fb   : > { %v1779_v28 = vmul.f32 -1.442695, %v710_v26 }
 0x1fd   : > { %2079 = vpow2.f32 %v1779_v28 }
 0x204   : > { %v2078_v29 = vpop.eup %2077 }
 0x205   : > { %v719_v30 = vadd.f32 1.0, %v2078_v29 }
 0x207   : > { %v2080_v31 = vpop.eup %2079  ;;  %2081 = vrcp.f32 %v719_v30 }
 0x208   : > { %v720_v32 = vadd.f32 1.0, %v2080_v31 }
 0x20a   : > { %2083 = vrcp.f32 %v720_v32 }
 0x211   : > { %v2082_v33 = vpop.eup %2081 }
 0x212   : > { %v725_v34 = vmul.f32 %v2082_v33, %v709_v25 }
 0x214   : > { %v2084_v35 = vpop.eup %2083  ;;  %1016 = vst.msk [vmem:[#allocation5] sm:$0xff] %vm656_vm11, %v725_v34 }
 0x215   : > { %v726_v36 = vmul.f32 %v2084_v35, %v710_v26 }
 0x217   : > { %v727_v37 = vpack.c.bf16 %v726_v36, %v725_v34  ;;  %1017 = vst.msk [vmem:[#allocation5 + $0x8] sm:$0xff] %vm656_vm11, %v726_v36 }
 0x219   : > { %1883 = vmatmul.mubr.msk.bf16.vlgmr.msra.gmra.mrb[4].mxu0 %vm656_vm11, %v727_v37  ;;  %1924 = vmatprep.subr.msk.bf16.mxu1 %vm656_vm11, %v727_v37  ;;  %v761_v38 = vsel %vm656_vm11, %v727_v37, 0 }
 0x21a   : > { %1887 = vmatpush3.bf16.xpose.msra.mxu1 %v761_v38 }
 0x21b   : > { %1892 = vmatprep.subr.bf16.mxu1 %v2346_v11 }
 0x221   : > { %1889 = vmatmul.mubr.msk.bf16.vlgmr.msra.gmra.mrb[4].mxu1 %vm656_vm11, %v2064_v39 }
 0x222   : > { %1893 = vmatpush3.bf16.msra.mxu1 %v2065_v40  ;;  %1908 = vmatprep.mubr.msk.bf16.mxu1 %vm2347_vm6, %v2346_v11 }
 0x223   : > { %1894 = vmatprep.subr.bf16.mxu1 %v2346_v11 }
 0x226   : > { %1895 = vmatpush3.bf16.msra.mxu1 %v2066_v41 }
 0x227   : > { %1896 = vmatprep.subr.bf16.mxu1 %v2346_v11 }
 0x22a   : > { %1897 = vmatpush3.bf16.msra.mxu1 %v2067_v42 }
 0x22b   : > { %1898 = vmatprep.subr.bf16.mxu1 %v2346_v11 }
 0x22e   : > { %1899 = vmatpush3.bf16.msra.mxu1 %v2068_v44 }
 0x22f   : > { %1900 = vmatprep.subr.bf16.mxu1 %v2346_v11 }
 0x232   : > { %1901 = vmatpush3.bf16.msra.mxu1 %v2069_v45 }
 0x233   : > { %1902 = vmatprep.subr.bf16.mxu1 %v2346_v11 }
 0x236   : > { %1903 = vmatpush3.bf16.msra.mxu1 %v2070_v46 }
 0x237   : > { %1904 = vmatprep.subr.bf16.mxu1 %v2346_v11 }
 0x23a   : > { %1905 = vmatpush3.bf16.msra.mxu1 %v2071_v48 }
 0x23b   : > { %1906 = vmatprep.subr.bf16.mxu1 %v2346_v11 }
 0x23e   : > { %1907 = vmatpush3.bf16.msra.mxu1 %v2072_v49 }
 0x2ec   : > { %v797_v50 = vpop.f32.mrb[4].mxu0 }
 0x2ed   : > { %v1884_v51 = vpop.f32.mrb[5].mxu0 }
 0x2ee   : > { %v800_v52 = vpop.f32.mrb[6].mxu0 }
 0x2ef   : > { %v873_v53 = vpack.c.bf16 %v800_v52, %v797_v50  ;;  %v1885_v54 = vpop.f32.mrb[7].mxu0 }
 0x2f1   : > { %1909 = vmatmul.mubr.bf16.vlgmr.msra.gmra.mrb[8].mxu1 %v873_v53 }
 0x2f4   : > { %v1890_v55 = vpop.f32.mrb[4].mxu1 }
 0x2f5   : > { %1021 = vst.msk [vmem:[#allocation6 + $0x10] sm:$0xff] %vm1018_vm13, %v1890_v55  ;;  %v858_v56 = vpop.f32.mrb[5].mxu1  ;;  %1031 = vrot.lane.b32.xlu0 %v1890_v55, %s2348_s14 }
 0x2f6   : > { %1019 = vst.msk [vmem:[#allocation6] sm:$0xff] %vm1018_vm13, %v858_v56  ;;  %1027 = vrot.lane.b32.xlu1 %v858_v56, %s2348_s14  ;;  %v1891_v57 = vpop.f32.mrb[6].mxu1 }
 0x2f7   : > { %1022 = vst.msk [vmem:[#allocation6 + $0x18] sm:$0xff] %vm1018_vm13, %v1891_v57  ;;  %v861_v58 = vpop.f32.mrb[7].mxu1 }
 0x2f8   : > { %1020 = vst.msk [vmem:[#allocation6 + $0x8] sm:$0xff] %vm1018_vm13, %v861_v58 }
 0x2fa   : > { %1029 = vrot.lane.b32.xlu1 %v861_v58, %s2348_s14 }
 0x2fe   : > { %1033 = vrot.lane.b32.xlu1 %v1891_v57, %s2348_s14 }
 0x367   : > { %v1032_v59 = vpop.permute.xlu0 %1031 }
 0x368   : > { %v1028_v60 = vpop.permute.xlu1 %1027  ;;  %1042 = vst.msk [vmem:[#allocation6 + $0x30] sm:$0xff] %vm1018_vm13, %v1032_v59 }
 0x369   : > { %1040 = vst.msk [vmem:[#allocation6 + $0x20] sm:$0xff] %vm1018_vm13, %v1028_v60 }
 0x36c   : > { %v1030_v1 = vpop.permute.xlu1 %1029 }
 0x36d   : > { %1041 = vst.msk [vmem:[#allocation6 + $0x28] sm:$0xff] %vm1018_vm13, %v1030_v1 }
 0x370   : > { %v1034_v4 = vpop.permute.xlu1 %1033 }
 0x371   : > { %1043 = vst.msk [vmem:[#allocation6 + $0x38] sm:$0xff] %vm1018_vm13, %v1034_v4 }
 0x3c4   : > { %v979_v6 = vpop.f32.mrb[8].mxu1 }
 0x3c5   : > { %v980_v7 = vadd.f32 %v1789_v5, %v979_v6  ;;  %v1910_v8 = vpop.f32.mrb[9].mxu1 }
 0x3c6   : > { %v982_v9 = vpop.f32.mrb[10].mxu1 }
 0x3c7   : > { %v988_v10 = vmin.f32 %v980_v7, 20.0  ;;  %v983_v13 = vadd.f32 %v1789_v5, %v982_v9  ;;  %v1911_v14 = vpop.f32.mrb[11].mxu1  ;;  %vm986_vm15 = vcmp.gt.f32.partialorder %v980_v7, 20.0 }
 0x3c9   : > { %v990_v23 = vmul.f32 1.442695, %v988_v10  ;;  %v989_v24 = vmin.f32 %v983_v13, 20.0  ;;  %vm987_vm1 = vcmp.gt.f32.partialorder %v983_v13, 20.0 }
 0x3cb   : > { %2085 = vpow2.f32 %v990_v23  ;;  %v992_v25 = vmul.f32 1.442695, %v989_v24 }
 0x3cd   : > { %2087 = vpow2.f32 %v992_v25 }
 0x3d5   : > { %v2086_v26 = vpop.eup %2085 }
 0x3d6   : > { %v994_v27 = vadd.f32 1.0, %v2086_v26  ;;  %v997_v30 = vmul.f32 -0.5, %v2086_v26  ;;  %v1000_v33 = vand.u32 2147483647, %v2086_v26 }
 0x3d7   : > { %v2088_v28 = vpop.eup %2087 }
 0x3d8   : > { %2089 = vlog2.f32 %v994_v27  ;;  %v1003_v29 = vadd.f32 1.0, %v2088_v28  ;;  %v1006_v31 = vmul.f32 -0.5, %v2088_v28  ;;  %v998_v32 = vadd.f32 1.0, %v997_v30 }
 0x3d9   : > { %v1009_v36 = vand.u32 2147483647, %v2088_v28  ;;  %vm1001_vm14 = vcmp.lt.f32.partialorder %v1000_v33, 0.0004427343 }
 0x3da   : > { %2091 = vlog2.f32 %v1003_v29  ;;  %v1007_v34 = vadd.f32 1.0, %v1006_v31  ;;  %v999_v38 = vmul.f32 %v2086_v26, %v998_v32 }
 0x3db   : > { %vm1010_vm0 = vcmp.lt.f32.partialorder %v1009_v36, 0.0004427343 }
 0x3dc   : > { %v1008_v42 = vmul.f32 %v2088_v28, %v1007_v34 }
 0x3e2   : > { %v2090_v35 = vpop.eup %2089 }
 0x3e3   : > { %v996_v37 = vmul.f32 0.6931472, %v2090_v35 }
 0x3e4   : > { %v2092_v39 = vpop.eup %2091 }
 0x3e5   : > { %v1002_v40 = vsel %vm1001_vm14, %v999_v38, %v996_v37  ;;  %v1005_v41 = vmul.f32 0.6931472, %v2092_v39 }
 0x3e6   : > { %v1012_v44 = vsel %vm986_vm15, %v980_v7, %v1002_v40 }
 0x3e7   : > { %1014 = vst.msk [vmem:[#allocation4] sm:$0xff] %vm656_vm11, %v1012_v44  ;;  %v1011_v45 = vsel %vm1010_vm0, %v1008_v42, %v1005_v41 }
 0x3e8   : > { %v1013_v46 = vsel %vm987_vm1, %v983_v13, %v1011_v45 }
 0x3e9   : > { %1015 = vst.msk [vmem:[#allocation4 + $0x8] sm:$0xff] %vm656_vm11, %v1013_v46 }
 0x3ea LB: >> { %v2349_v48 = vmov 3   ;;  %v2350_v49 = vmov 1   ;;  %s1807_s13 = sshll.u32 %s2341_s20, 5  ;;  %v2351_v52 = vmov 5   ;;  %v2352_v53 = vmov 2   ;;  %s2767_s28 = sshll.u32 %s2341_s20, 3  ;;  %s2341_s20 = sphi %s2754_s20, %s1079_s20   ;;  %v2337_v63 = vphi %v1072_v63, %v3058_v63   ;;  %v2333_v0 = vphi %v1073_v0, %v3057_v0  }
 0x3eb   : >> { %2096 = vset.pattern.permute.xlu0 %v2349_v48  ;;  %2093 = vset.pattern.permute.xlu1 %v2350_v49  ;;  %s1089_s23 = scalar_lea.vmem [#allocation6], %s1807_s13  ;;  %v2353_v54 = vmov 0   ;;  %v2354_v56 = vmov 4   ;;  %v2355_v58 = vmov 6   ;;  %v2356_v59 = vmov 7   ;;  %s1083_s19 = scalar_lea.vmem [#allocation4], %s2767_s28 }
 0x3ec   : >> { %v1091_v50 = vld [vmem:[%s1089_s23 + $0x8] sm:$0xff]  ;;  %v1090_v51 = vld [vmem:[%s1089_s23] sm:$0xff]  ;;  %v1093_v55 = vld [vmem:[%s1089_s23 + $0x18] sm:$0xff]  ;;  %v1096_v60 = vsub.s32 0, %v2603_v12  ;;  %v1106_v9 = vsub.s32 1, %v2603_v12  ;;  %v1116_v28 = vsub.s32 2, %v2603_v12 }
 0x3ed   : >> { %1223 = vperm.xlu0 %2096, %v1091_v50   ;;  %1191 = vperm.xlu1 %2093, %v1090_v51   ;;  %v1092_v57 = vld [vmem:[%s1089_s23 + $0x10] sm:$0xff]  ;;  %s1085_s17 = scalar_lea.vmem [#allocation5], %s2767_s28  ;;  %v1126_v36 = vsub.s32 3, %v2603_v12  ;;  %s1490_s16 = scalar_lea.vmem [#allocation7], %s2767_s28 }
 0x3ee   : >> { %v1086_v32 = vld [vmem:[%s1085_s17] sm:$0xff]  ;;  %s1079_s20 = sadd.s32 1, %s2341_s20  }
 0x3ef   : >> { %p1076_p10 = scmp.ge.s32.totalorder %s1079_s20, 2  }
 0x3f0   : >> { %v2771_v1 = vld [vmem:[%s1083_s19] sm:$0xff]  ;;  %1912 = vmatprep.subr.bf16.mxu0 (%p1076_p10), %v2346_v11  ;;  %1920 = vmatprep.mubr.msk.bf16.mxu0 (%p1076_p10), %vm2347_vm6, %v2346_v11  ;;  %s1820_s17 = sshll.u32 (%p1076_p10), %s2317_s29, 2  ;;  %s3059_s14 = sld [smem:[#allocation22_spill]] (%p1076_p10)  ;;  %vm1610_vm2 = vcmask (%p1076_p10), 257024  }
 0x3f1   : >> { %2098 = vset.pattern.permute.xlu0 %v2351_v52  ;;  %1195 = vperm.xlu1 %2093, %v1091_v50   ;;  %v1097_v5 = vrot.slane %v2771_v1, %v1096_v60  ;;  %v1107_v23 = vrot.slane %v2771_v1, %v1106_v9  ;;  %v1117_v33 = vrot.slane %v2771_v1, %v1116_v28  ;;  %s1629_s24 = sshll.u32 (%p1076_p10), %s2582_s15, 4  ;;  %s3060_s20 = sld [smem:[#allocation26_spill]] (%p1076_p10)  ;;  %s2952_s24 = int_to_ptr.vmem [resolvable:$true] %s1629_s24 }
 0x3f2   : >> { %1247 = vperm.xlu0 %2098, %v1090_v51   ;;  %v2798_v38 = vmul.f32 %v1086_v32, %v2771_v1  ;;  %v1127_v42 = vrot.slane %v2771_v1, %v1126_v36  ;;  %s2215_s13 = scalar_lea.vmem (%p1076_p10), %s2952_s24, 128  ;;  %s2357_s23 = smov (%p1076_p10), [#allocation13]  }
 0x3f3   : >> { %v1099_v8 = vmul.f32 %v1097_v5, %v2744_v62  ;;  %v1098_v10 = vmul.f32 %v1097_v5, %v2739_v61  ;;  %v1109_v26 = vmul.f32 %v1107_v23, %v2744_v62  ;;  %v1108_v29 = vmul.f32 %v1107_v23, %v2739_v61  ;;  %p2216_p12 = scmp.ne.s32.totalorder (%p1076_p10), %s2952_s24, %s2215_s13  ;;  %s2219_s28 = sshll.u32 (%p1076_p10), %s2357_s23, 4  ;;  %s2220_s28 = int_to_ptr.vmem [resolvable:$false] %s2219_s28 }
 0x3f4   : >> { %v1119_v37 = vmul.f32 %v1117_v33, %v2744_v62  ;;  %v1118_v44 = vmul.f32 %v1117_v33, %v2739_v61  ;;  %v1187_v45 = vrot.slane %v2798_v38, %v1096_v60  ;;  %s2221_s19 = scalar_lea.vmem (%p1076_p10), %s2220_s28, 256  ;;  %p2222_p7 = scmp.lt.s32.totalorder (%p1076_p10), %s2952_s24, %s2220_s28 }
 0x3f5   : >> { %2094 = vset.pattern.permute.xlu1 %v2352_v53  ;;  %v1102_v14 = vmul.f32 1.442695, %v1099_v8  ;;  %v1100_v25 = vmul.f32 1.442695, %v1098_v10  ;;  %v1112_v30 = vmul.f32 1.442695, %v1109_v26  ;;  %p2223_p9 = scmp.lt.s32.totalorder (%p1076_p10), %s2221_s19, %s2215_s13 }
 0x3f6   : >> { %2099 = vset.pattern.permute.xlu0 %v2353_v54  ;;  %1209 = vperm.xlu1 %2094, %v1091_v50   ;;  %v1110_v35 = vmul.f32 1.442695, %v1108_v29  ;;  %v1122_v46 = vmul.f32 1.442695, %v1119_v37  ;;  %v1146_v29 = vsub.s32 5, %v2603_v12  ;;  %p3061_p4 = scmp.ne.s32.totalorder (%p1076_p10), %s3059_s14, 0 }
 0x3f7   : >> { %1176 = vperm.xlu0 %2099, %v1090_v51   ;;  %2115 = vpow2.f32 %v1102_v14  ;;  %p2224_p11 = por (%p1076_p10), %p2223_p9, %p2222_p7 }
 0x3f8   : >> { %2117 = vpow2.f32 %v1100_v25  ;;  %p2217_p5 = pnand (%p1076_p10), %p2216_p12, %p3061_p4 }
 0x3f9   : >> { %2119 = vpow2.f32 %v1112_v30 }
 0x3fa   : >> { %2095 = vset.pattern.permute.xlu1 %v2349_v48  ;;  %2121 = vpow2.f32 %v1110_v35  ;;  %p2218_p6 = pneg (%p1076_p10), %p2217_p5 }
 0x3fb   : >> { %1181 = vperm.xlu0 %2099, %v1091_v50   ;;  %1219 = vperm.xlu1 %2095, %v1090_v51   ;;  %2123 = vpow2.f32 %v1122_v46 }
 0x3fc   : > { %p2225_p13 = pnand (%p1076_p10), %p2224_p11, %p2218_p6 }
 0x3ff   : >> { %1299 = vperm.xlu0 %2099, %v1093_v55   ;;  %2097 = vset.pattern.permute.xlu1 %v2354_v56 }
 0x400   : >> { %1233 = vperm.xlu1 %2097, %v1090_v51  }
 0x401   : >> { %v2116_v39 = vpop.eup %2115 }
 0x403   : >> { %2102 = vset.pattern.permute.xlu0 %v2352_v53 }
 0x404   : >> { %1205 = vperm.xlu0 %2102, %v1090_v51   ;;  %1237 = vperm.xlu1 %2097, %v1091_v50  }
 0x408   : >> { %1345 = vperm.xlu0 %2102, %v1092_v57   ;;  %2100 = vset.pattern.permute.xlu1 %v2351_v52 }
 0x409   : >> { %1251 = vperm.xlu1 %2100, %v1091_v50  }
 0x40c   : >> { %2107 = vset.pattern.permute.xlu0 %v2354_v56 }
 0x40d   : >> { %1395 = vperm.xlu0 %2107, %v1092_v57   ;;  %2101 = vset.pattern.permute.xlu1 %v2353_v54 }
 0x40e   : >> { %1294 = vperm.xlu1 %2101, %v1092_v57  }
 0x411   : >> { %2108 = vset.pattern.permute.xlu0 %v2355_v58 }
 0x412   : >> { %1265 = vperm.xlu0 %2108, %v1091_v50   ;;  %2103 = vset.pattern.permute.xlu1 %v2350_v49 }
 0x413   : >> { %1320 = vperm.xlu1 %2103, %v1092_v57  }
 0x416   : >> { %1445 = vperm.xlu0 %2108, %v1092_v57  }
 0x417   : >> { %1324 = vperm.xlu1 %2103, %v1093_v55  }
 0x41a   : >> { %2112 = vset.pattern.permute.xlu0 %v2356_v59 }
 0x41b   : >> { %1279 = vperm.xlu0 %2112, %v1091_v50   ;;  %2104 = vset.pattern.permute.xlu1 %v2352_v53  ;;  %v1289_v50 = vmul.f32 %v2333_v0, %v2116_v39  ;;  %v1215_v39 = vrot.slane %v2798_v38, %v1116_v28  ;;  %v1156_v28 = vsub.s32 6, %v2603_v12 }
 0x41c   : >> { %1349 = vperm.xlu1 %2104, %v1093_v55  }
 0x41f   : >> { %1474 = vperm.xlu0 %2112, %v1093_v55  }
 0x420   : >> { %2105 = vset.pattern.permute.xlu1 %v2355_v58 }
 0x421   : >> { %1261 = vperm.xlu1 %2105, %v1090_v51  }
 0x425   : >> { %2106 = vset.pattern.permute.xlu1 %v2349_v48  ;;  %v2118_v48 = vpop.eup %2117 }
 0x426   : >> { %1370 = vperm.xlu1 %2106, %v1092_v57  }
 0x42a   : >> { %1374 = vperm.xlu1 %2106, %v1093_v55  }
 0x42e   : >> { %2109 = vset.pattern.permute.xlu1 %v2354_v56  ;;  %v1136_v56 = vsub.s32 4, %v2603_v12 }
 0x42f   : >> { %1399 = vperm.xlu1 %2109, %v1093_v55  }
 0x430   : >> { %v1137_v0 = vrot.slane %v2771_v1, %v1136_v56 }
 0x432   : >> { %v1138_v33 = vmul.f32 %v1137_v0, %v2739_v61 }
 0x433   : >> { %2110 = vset.pattern.permute.xlu1 %v2356_v59 }
 0x434   : >> { %1275 = vperm.xlu1 %2110, %v1090_v51   ;;  %v1129_v51 = vmul.f32 %v1127_v42, %v2744_v62 }
 0x436   : >> { %v1132_v60 = vmul.f32 1.442695, %v1129_v51 }
 0x438   : >> { %2111 = vset.pattern.permute.xlu1 %v2351_v52  ;;  %v1120_v52 = vmul.f32 1.442695, %v1118_v44 }
 0x439   : >> { %1420 = vperm.xlu1 %2111, %v1092_v57  }
 0x43a   : >> { %2125 = vpow2.f32 %v1120_v52 }
 0x43b   : >> { %2127 = vpow2.f32 %v1132_v60 }
 0x43d   : >> { %1424 = vperm.xlu1 %2111, %v1093_v55  }
 0x441   : >> { %2113 = vset.pattern.permute.xlu1 %v2355_v58 }
 0x442   : >> { %1449 = vperm.xlu1 %2113, %v1093_v55   ;;  %v1288_v55 = vmul.f32 %v2337_v63, %v2118_v48  ;;  %v1201_v63 = vrot.slane %v2798_v38, %v1106_v9  ;;  %v1140_v48 = vmul.f32 1.442695, %v1138_v33 }
 0x446   : >> { %2114 = vset.pattern.permute.xlu1 %v2356_v59  ;;  %v2120_v59 = vpop.eup %2119 }
 0x447   : >> { %1470 = vperm.xlu1 %2114, %v1092_v57   ;;  %v1128_v57 = vmul.f32 %v1127_v42, %v2739_v61  ;;  %v2122_v10 = vpop.eup %2121 }
 0x448   : >> { %v2124_v37 = vpop.eup %2123 }
 0x449   : >> { %v1130_v14 = vmul.f32 1.442695, %v1128_v57 }
 0x44b   : >> { %2129 = vpow2.f32 %v1130_v14 }
 0x46c   : >> { %v2773_v4 = vpop.permute.xlu1 %1191  ;;  %v2776_v7 = vpop.permute.xlu0 %1223 }
 0x46d   : >> { %v1202_v9 = vmul.f32 %v1201_v63, %v2773_v4 }
 0x470   : >> { %v1196_v6 = vpop.permute.xlu1 %1195 }
 0x471   : >> { %v2784_v24 = vpop.permute.xlu0 %1247  ;;  %v1203_v26 = vmul.f32 %v1201_v63, %v1196_v6  ;;  %v1147_v6 = vrot.slane %v2771_v1, %v1146_v29 }
 0x473   : >> { %v1149_v52 = vmul.f32 %v1147_v6, %v2744_v62 }
 0x475   : >> { %v2781_v13 = vpop.permute.xlu1 %1209  ;;  %v1152_v63 = vmul.f32 1.442695, %v1149_v52 }
 0x476   : >> { %v1177_v31 = vpop.permute.xlu0 %1176  ;;  %v1217_v51 = vmul.f32 %v1215_v39, %v2781_v13  ;;  %v1157_v13 = vrot.slane %v2771_v1, %v1156_v28 }
 0x477   : >> { %v1188_v54 = vmul.f32 %v1187_v45, %v1177_v31  ;;  %v1139_v31 = vmul.f32 %v1137_v0, %v2744_v62  ;;  %v1229_v0 = vrot.slane %v2798_v38, %v1126_v36 }
 0x478   : >> { %v1159_v36 = vmul.f32 %v1157_v13, %v2744_v62 }
 0x479   : >> { %v2816_v5 = vadd.f32 %v1288_v55, %v1188_v54  ;;  %v1142_v42 = vmul.f32 1.442695, %v1139_v31  ;;  %v1231_v14 = vmul.f32 %v1229_v0, %v2776_v7  ;;  %v1166_v31 = vsub.s32 7, %v2603_v12 }
 0x47a   : >> { %v2787_v27 = vpop.permute.xlu1 %1219  ;;  %v1182_v40 = vpop.permute.xlu0 %1181  ;;  %v1809_v12 = vmul.f32 (%p1076_p10), -1.442695, %v2678_v43 }
 0x47b   : >> { %v1189_v49 = vmul.f32 %v1187_v45, %v1182_v40  ;;  %v1315_v30 = vmul.f32 %v2122_v10, %v2816_v5  ;;  %v2126_v45 = vpop.eup %2125  ;;  %2131 = vpow2.f32 %v1142_v42  ;;  %v1148_v10 = vmul.f32 %v1147_v6, %v2739_v61 }
 0x47c   : >> { %2133 = vpow2.f32 %v1140_v48  ;;  %v2128_v55 = vpop.eup %2127  ;;  %v1158_v6 = vmul.f32 %v1157_v13, %v2739_v61  ;;  %v1162_v48 = vmul.f32 1.442695, %v1159_v36 }
 0x47d   : >> { %v2814_v58 = vadd.f32 %v1289_v50, %v1189_v49  ;;  %v1317_v44 = vadd.f32 %v1315_v30, %v1202_v9  ;;  %v2130_v60 = vpop.eup %2129  ;;  %v1150_v30 = vmul.f32 1.442695, %v1148_v10  ;;  %2135 = vpow2.f32 %v1152_v63 }
 0x47e   : >> { %v1300_v25 = vpop.permute.xlu0 %1299  ;;  %v1160_v52 = vmul.f32 1.442695, %v1158_v6 }
 0x47f   : >> { %v2793_v34 = vpop.permute.xlu1 %1233  ;;  %v1316_v23 = vmul.f32 %v2120_v59, %v2814_v58  ;;  %v1340_v4 = vmul.f32 %v2126_v45, %v1317_v44  ;;  %2137 = vpow2.f32 %v1150_v30  ;;  %v1167_v45 = vrot.slane %v2771_v1, %v1166_v31 }
 0x480   : >> { %2139 = vpow2.f32 %v1162_v48 }
 0x481   : >> { %v1318_v32 = vadd.f32 %v1316_v23, %v1203_v26  ;;  %v1169_v1 = vmul.f32 %v1167_v45, %v2744_v62  ;;  %2141 = vpow2.f32 %v1160_v52  ;;  %v1497_v62 = vld [vmem:[#allocation5 + $0x8] sm:$0xff] (%p1076_p10) }
 0x483   : >> { %v2800_v41 = vpop.permute.xlu1 %1237  ;;  %v1206_v40 = vpop.permute.xlu0 %1205  ;;  %v1341_v46 = vmul.f32 %v2124_v37, %v1318_v32  ;;  %v1230_v37 = vmul.f32 %v1229_v0, %v2787_v27 }
 0x484   : >> { %v1216_v50 = vmul.f32 %v1215_v39, %v1206_v40 }
 0x485   : >> { %v1343_v54 = vadd.f32 %v1341_v46, %v1217_v51  ;;  %v2132_v39 = vpop.eup %2131  ;;  %v1243_v46 = vrot.slane %v2798_v38, %v1136_v56 }
 0x486   : >> { %v1342_v57 = vadd.f32 %v1340_v4, %v1216_v50  ;;  %v2134_v42 = vpop.eup %2133 }
 0x487   : >> { %v1366_v23 = vmul.f32 %v2128_v55, %v1343_v54  ;;  %v1346_v7 = vpop.permute.xlu0 %1345  ;;  %v1303_v55 = vmul.f32 %v1300_v25, %v2814_v58  ;;  %v1244_v63 = vmul.f32 %v1243_v46, %v2793_v34  ;;  %v2136_v25 = vpop.eup %2135 }
 0x488   : >> { %v2809_v53 = vpop.permute.xlu1 %1251  ;;  %v1365_v26 = vmul.f32 %v2130_v60, %v1342_v57  ;;  %v1245_v60 = vmul.f32 %v1243_v46, %v2800_v41  ;;  %v1352_v58 = vmul.f32 %v1346_v7, %v1342_v57 }
 0x489   : >> { %v1368_v9 = vadd.f32 %v1366_v23, %v1231_v14  ;;  %v1305_v23 = vsel %vm656_vm11, %v1303_v55, 0.0 }
 0x48a   : >> { %v1367_v40 = vadd.f32 %v1365_v26, %v1230_v37  ;;  %v2138_v26 = vpop.eup %2137  ;;  %v1354_v57 = vsel %vm656_vm11, %v1352_v58, 0.0 }
 0x48b   : >> { %v1391_v50 = vmul.f32 %v2132_v39, %v1368_v9 }
 0x48c   : >> { %v1390_v51 = vmul.f32 %v2134_v42, %v1367_v40  ;;  %v1396_v10 = vpop.permute.xlu0 %1395 }
 0x48d   : >> { %v2821_v8 = vpop.permute.xlu1 %1294 }
 0x48e   : >> { %v1302_v0 = vmul.f32 %v2821_v8, %v2816_v5  ;;  %v1392_v41 = vadd.f32 %v1390_v51, %v1244_v63 }
 0x490   : >> { %v1304_v34 = vsel %vm656_vm11, %v1302_v0, 0.0  ;;  %v1402_v6 = vmul.f32 %v1396_v10, %v1392_v41  ;;  %v2140_v0 = vpop.eup %2139 }
 0x491   : >> { %v1266_v37 = vpop.permute.xlu0 %1265 }
 0x492   : >> { %v1321_v35 = vpop.permute.xlu1 %1320 }
 0x493   : >> { %v1327_v56 = vmul.f32 %v1321_v35, %v1317_v44  ;;  %v1168_v35 = vmul.f32 %v1167_v45, %v2739_v61  ;;  %v1172_v44 = vmul.f32 1.442695, %v1169_v1  ;;  %v1808_v61 = vld [vmem:[%s3021_s11] ss:$0 sm:$0xff] (%p1076_p10) }
 0x495   : >> { %v1170_v46 = vmul.f32 1.442695, %v1168_v35  ;;  %2143 = vpow2.f32 %v1172_v44  ;;  %v1446_v63 = vpop.permute.xlu0 %1445 }
 0x496   : >> { %v1325_v49 = vpop.permute.xlu1 %1324 }
 0x497   : >> { %v1328_v4 = vmul.f32 %v1325_v49, %v1318_v32  ;;  %v1257_v32 = vrot.slane %v2798_v38, %v1146_v29  ;;  %v1393_v49 = vadd.f32 %v1391_v50, %v1245_v60  ;;  %2145 = vpow2.f32 %v1170_v46 }
 0x498   : > { %2151 = vpow2.f32 (%p1076_p10), %v1809_v12 }
 0x499   : >> { %v1330_v5 = vsel %vm656_vm11, %v1328_v4, 0.0  ;;  %v1416_v30 = vmul.f32 %v2136_v25, %v1393_v49  ;;  %v1259_v45 = vmul.f32 %v1257_v32, %v2809_v53  ;;  %v1258_v50 = vmul.f32 %v1257_v32, %v2784_v24 }
 0x49a   : >> { %v1271_v4 = vrot.slane %v2798_v38, %v1156_v28  ;;  %v1404_v53 = vsel %vm656_vm11, %v1402_v6, 0.0 }
 0x49b   : >> { %v1350_v59 = vpop.permute.xlu1 %1349  ;;  %v1418_v52 = vadd.f32 %v1416_v30, %v1259_v45 }
 0x49c   : >> { %v1353_v13 = vmul.f32 %v1350_v59, %v1343_v54  ;;  %v1329_v54 = vsel %vm656_vm11, %v1327_v56, 0.0  ;;  %v1273_v32 = vmul.f32 %v1271_v4, %v1266_v37 }
 0x49d   : >> { %v1331_v36 = vadd.f32 %v1330_v5, %v1329_v54 }
 0x49e   : >> { %v1355_v59 = vsel %vm656_vm11, %v1353_v13, 0.0  ;;  %v2142_v13 = vpop.eup %2141 }
 0x49f   : >> { %v1356_v48 = vadd.f32 %v1355_v59, %v1354_v57  ;;  %v1332_v55 = vrot.slane %v1331_v36, 4  ;;  %v2144_v44 = vpop.eup %2143 }
 0x4a0   : >> { %v2846_v33 = vpop.permute.xlu1 %1261 }
 0x4a1   : >> { %v1357_v56 = vrot.slane %v1356_v48, 4  ;;  %v1333_v58 = vadd.f32 %v1332_v55, %v1331_v36  ;;  %v1272_v28 = vmul.f32 %v1271_v4, %v2846_v33  ;;  %v2146_v46 = vpop.eup %2145 }
 0x4a3   : >> { %v1358_v5 = vadd.f32 %v1357_v56, %v1356_v48  ;;  %v1334_v59 = vrot.slane %v1333_v58, 2 }
 0x4a5   : >> { %v1371_v27 = vpop.permute.xlu1 %1370  ;;  %v1359_v36 = vrot.slane %v1358_v5, 2 }
 0x4a6   : >> { %v1377_v29 = vmul.f32 %v1371_v27, %v1367_v40  ;;  %v1415_v40 = vmul.f32 %v2138_v26, %v1392_v41 }
 0x4a8   : >> { %v1379_v27 = vsel %vm656_vm11, %v1377_v29, 0.0  ;;  %v1280_v29 = vpop.permute.xlu0 %1279 }
 0x4a9   : >> { %v1375_v14 = vpop.permute.xlu1 %1374 }
 0x4aa   : >> { %v1378_v8 = vmul.f32 %v1375_v14, %v1368_v9  ;;  %v1306_v9 = vadd.f32 %v1305_v23, %v1304_v34  ;;  %v1417_v14 = vadd.f32 %v1415_v40, %v1258_v50  ;;  %v1285_v34 = vrot.slane %v2798_v38, %v1166_v31 }
 0x4ab   : >> { %v1360_v40 = vadd.f32 %v1359_v36, %v1358_v5 }
 0x4ac   : >> { %v1380_v42 = vsel %vm656_vm11, %v1378_v8, 0.0  ;;  %v1307_v10 = vrot.slane %v1306_v9, 4  ;;  %v1440_v35 = vmul.f32 %v2142_v13, %v1417_v14  ;;  %v1287_v33 = vmul.f32 %v1285_v34, %v1280_v29 }
 0x4ad   : >> { %v1381_v60 = vadd.f32 %v1380_v42, %v1379_v27  ;;  %v1335_v42 = vadd.f32 %v1334_v59, %v1333_v58 }
 0x4ae   : >> { %v1400_v39 = vpop.permute.xlu1 %1399  ;;  %v1308_v41 = vadd.f32 %v1307_v10, %v1306_v9  ;;  %v1442_v30 = vadd.f32 %v1440_v35, %v1272_v28 }
 0x4af   : >> { %v1403_v7 = vmul.f32 %v1400_v39, %v1393_v49  ;;  %v1441_v49 = vmul.f32 %v2140_v0, %v1418_v52  ;;  %v1382_v25 = vrot.slane %v1381_v60, 4  ;;  %v1336_v10 = vrot.slane %v1335_v42, 1 }
 0x4b0   : >> { %v1309_v57 = vrot.slane %v1308_v41, 2  ;;  %v1452_v50 = vmul.f32 %v1446_v63, %v1442_v30 }
 0x4b1   : >> { %v1405_v51 = vsel %vm656_vm11, %v1403_v7, 0.0  ;;  %v1443_v54 = vadd.f32 %v1441_v49, %v1273_v32  ;;  %v1383_v26 = vadd.f32 %v1382_v25, %v1381_v60  ;;  %v1465_v32 = vmul.f32 %v2146_v46, %v1442_v30 }
 0x4b2   : >> { %v1406_v24 = vadd.f32 %v1405_v51, %v1404_v53  ;;  %v1310_v48 = vadd.f32 %v1309_v57, %v1308_v41  ;;  %v1475_v53 = vpop.permute.xlu0 %1474  ;;  %v1361_v49 = vrot.slane %v1360_v40, 1 }
 0x4b3   : >> { %v1276_v1 = vpop.permute.xlu1 %1275  ;;  %v1466_v7 = vmul.f32 %v2144_v44, %v1443_v54  ;;  %v1384_v45 = vrot.slane %v1383_v26, 2 }
 0x4b4   : >> { %v1407_v8 = vrot.slane %v1406_v24, 4  ;;  %v1286_v55 = vmul.f32 %v1285_v34, %v1276_v1  ;;  %v1311_v13 = vrot.slane %v1310_v48, 1 }
 0x4b5   : >> { %v2888_v0 = vadd.f32 %v1466_v7, %v1287_v33  }
 0x4b6   : >> { %v1408_v39 = vadd.f32 %v1407_v8, %v1406_v24  ;;  %v1467_v5 = vadd.f32 %v1465_v32, %v1286_v55   ;;  %v1312_v44 = vadd.f32 %v1311_v13, %v1310_v48 }
 0x4b7   : >> { %v3056_v4 = vmov %v2888_v0  ;;  %v1337_v0 = vadd.f32 %v1336_v10, %v1335_v42 }
 0x4b8   : >> { %v1421_v23 = vpop.permute.xlu1 %1420  ;;  %v1409_v27 = vrot.slane %v1408_v39, 2  ;;  %v1478_v41 = vmul.f32 %v1475_v53, %v3056_v4  ;;  %1492 = vst.msk [vmem:[#allocation2] sm:$0xff] (%p1076_p10), %vm656_vm11, %v1467_v5  ;;  %1493 = vst.msk [vmem:[#allocation2 + $0x8] sm:$0xff] (%p1076_p10), %vm656_vm11, %v3056_v4 }
 0x4b9   : >> { %v1427_v37 = vmul.f32 %v1421_v23, %v1417_v14  ;;  %v1454_v14 = vsel %vm656_vm11, %v1452_v50, 0.0 }
 0x4ba   : >> { %v1410_v58 = vadd.f32 %v1409_v27, %v1408_v39 }
 0x4bb   : >> { %v1429_v38 = vsel %vm656_vm11, %v1427_v37, 0.0  ;;  %v1338_v37 = vmul.f32 %v2625_v16, %v1337_v0  ;;  %v3057_v0 = vmov %v3056_v4  ;;  %v2149_v16 = vld [vmem:[%s3022_s12 + $0x10] sm:$0xff] (%p1076_p10)  }
 0x4bc   : >> { %v1425_v9 = vpop.permute.xlu1 %1424  ;;  %v1411_v59 = vrot.slane %v1410_v58, 1 }
 0x4bd   : >> { %v1428_v6 = vmul.f32 %v1425_v9, %v1418_v52  ;;  %v1385_v52 = vadd.f32 %v1384_v45, %v1383_v26  ;;  %v1480_v26 = vsel %vm656_vm11, %v1478_v41, 0.0  ;;  %v2148_v41 = vld [vmem:[%s3022_s12 + $0x8] sm:$0xff] (%p1076_p10)  }
 0x4be   : >> { %v1412_v7 = vadd.f32 %v1411_v59, %v1410_v58 }
 0x4bf   : >> { %v1430_v31 = vsel %vm656_vm11, %v1428_v6, 0.0  ;;  %v1386_v1 = vrot.slane %v1385_v52, 1  ;;  %v1313_v6 = vmul.f32 %v2622_v15, %v1312_v44  ;;  %v1810_v15 = vmul.f32 (%p1076_p10), -1.442695, %v2681_v47 }
 0x4c0   : >> { %v1431_v51 = vadd.f32 %v1430_v31, %v1429_v38 }
 0x4c1   : >> { %v1450_v60 = vpop.permute.xlu1 %1449  ;;  %v1387_v36 = vadd.f32 %v1386_v1, %v1385_v52  ;;  %v1339_v48 = vadd.f32 %v1338_v37, %v1313_v6  ;;  %2153 = vpow2.f32 (%p1076_p10), %v1810_v15 }
 0x4c2   : >> { %v1432_v56 = vrot.slane %v1431_v51, 4  ;;  %v1453_v24 = vmul.f32 %v1450_v60, %v1443_v54  ;;  %v1362_v54 = vadd.f32 %v1361_v49, %v1360_v40 }
 0x4c3   : >> { %v1388_v38 = vmul.f32 %v2631_v18, %v1387_v36  ;;  %v2152_v18 = vpop.eup (%p1076_p10), %2151 }
 0x4c4   : >> { %v1433_v25 = vadd.f32 %v1432_v56, %v1431_v51  ;;  %v1455_v63 = vsel %vm656_vm11, %v1453_v24, 0.0  ;;  %v1363_v42 = vmul.f32 %v2628_v17, %v1362_v54  ;;  %v1413_v51 = vmul.f32 %v2638_v19, %v1412_v7  ;;  %v2150_v17 = vld [vmem:[%s3022_s12 + $0x18] sm:$0xff] (%p1076_p10)  }
 0x4c5   : >> { %v1456_v28 = vadd.f32 %v1455_v63, %v1454_v14  ;;  %v3058_v63 = vmov %v1467_v5 }
 0x4c6   : >> { %v1434_v8 = vrot.slane %v1433_v25, 2  ;;  %v1471_v23 = vpop.permute.xlu1 %1470  ;;  %v1364_v27 = vadd.f32 %v1363_v42, %v1339_v48  ;;  %v2147_v63 = vld [vmem:[%s3022_s12] sm:$0xff] (%p1076_p10)  }
 0x4c7   : >> { %v1457_v34 = vrot.slane %v1456_v28, 4  ;;  %v1477_v35 = vmul.f32 %v1471_v23, %v1467_v5  ;;  %1913 = vmatpush3.bf16.msra.mxu0 (%p1076_p10), %v2147_v63  ;;  %v1506_v5 = vmul.f32 (%p1076_p10), %v1808_v61, %v1497_v62 }
 0x4c8   : >> { %v1435_v29 = vadd.f32 %v1434_v8, %v1433_v25  ;;  %v1389_v10 = vadd.f32 %v1388_v38, %v1364_v27  ;;  %1914 = vmatprep.subr.bf16.mxu0 (%p1076_p10), %v2346_v11 }
 0x4c9   : >> { %v1458_v57 = vadd.f32 %v1457_v34, %v1456_v28  ;;  %v1479_v30 = vsel %vm656_vm11, %v1477_v35, 0.0 }
 0x4ca   : >> { %v1436_v39 = vrot.slane %v1435_v29, 1  ;;  %v1481_v9 = vadd.f32 %v1480_v26, %v1479_v30  ;;  %v1414_v56 = vadd.f32 %v1413_v51, %v1389_v10 }
 0x4cb   : >> { %v1459_v33 = vrot.slane %v1458_v57, 2  ;;  %1915 = vmatpush3.bf16.msra.mxu0 (%p1076_p10), %v2148_v41  ;;  %v2154_v19 = vpop.eup (%p1076_p10), %2153 }
 0x4cc   : >> { %v1482_v45 = vrot.slane %v1481_v9, 4  ;;  %v1437_v31 = vadd.f32 %v1436_v39, %v1435_v29  ;;  %1916 = vmatprep.subr.bf16.mxu0 (%p1076_p10), %v2346_v11 }
 0x4cd   : >> { %v1460_v46 = vadd.f32 %v1459_v33, %v1458_v57 }
 0x4ce   : >> { %v1483_v50 = vadd.f32 %v1482_v45, %v1481_v9  ;;  %v1438_v53 = vmul.f32 %v2641_v20, %v1437_v31  ;;  %v1515_v20 = vadd.f32 (%p1076_p10), 1.0, %v2152_v18 }
 0x4cf   : >> { %v1461_v40 = vrot.slane %v1460_v46, 1  ;;  %1917 = vmatpush3.bf16.msra.mxu0 (%p1076_p10), %v2149_v16 }
 0x4d0   : >> { %v1484_v55 = vrot.slane %v1483_v50, 2  ;;  %v1439_v14 = vadd.f32 %v1438_v53, %v1414_v56  ;;  %1918 = vmatprep.subr.bf16.mxu0 (%p1076_p10), %v2346_v11  ;;  %2155 = vrcp.f32 (%p1076_p10), %v1515_v20 }
 0x4d1   : >> { %v1462_v60 = vadd.f32 %v1461_v40, %v1460_v46 }
 0x4d2   : >> { %v1485_v52 = vadd.f32 %v1484_v55, %v1483_v50 }
 0x4d3   : >> { %v1463_v24 = vmul.f32 %v2644_v21, %v1462_v60  ;;  %1919 = vmatpush3.bf16.msra.mxu0 (%p1076_p10), %v2150_v17  ;;  %v1516_v21 = vadd.f32 (%p1076_p10), 1.0, %v2154_v19 }
 0x4d4   : >> { %v1486_v13 = vrot.slane %v1485_v52, 1 }
 0x4d5   : >> { %v1464_v49 = vadd.f32 %v1463_v24, %v1439_v14  ;;  %2157 = vrcp.f32 (%p1076_p10), %v1516_v21 }
 0x4d6   : >> { %v1487_v32 = vadd.f32 %v1486_v13, %v1485_v52  ;;  %1078 = sbr.rel (!%p1076_p10) target bundleno = 1002 (0x3ea), region = 132 }
 0x4d8   : >> { %v1488_v58 = vmul.f32 %v2647_v22, %v1487_v32  ;;  %v1496_v22 = vld [vmem:[#allocation5] sm:$0xff] (%p1076_p10) }
 0x4d9   : > { %v1505_v4 = vmul.f32 (%p1076_p10), %v1808_v61, %v1496_v22 }
 0x4da   : >> { %v1489_v25 = vadd.f32 %v1488_v58, %v1464_v49  ;;  %v2156_v1 = vpop.eup (%p1076_p10), %2155 }
 0x4db   : > { %v1521_v34 = vmul.f32 (%p1076_p10), %v2156_v1, %v2678_v43 }
 0x4dc   : >> { %1491 = vst.msk [vmem:[%s1490_s16] sm:$0xff] %vm656_vm11, %v1489_v25  ;;  %s1626_s16 = sadd.s32 (%p1076_p10), %s1820_s17, %s2571_s18  ;;  %s2958_s18 = scalar_lea.sflag (%p1076_p10), [#allocation10], %s482_s21 }
 0x4dd   : > { %s1821_s22 = sshll.u32 %s1626_s16, 6 }
 0x4de   : > { %s2950_s29 = scalar_lea.hbm %s3060_s20, %s1821_s22 }
 0x4df   : > { %v2158_v23 = vpop.eup %2157 }
 0x4e0   : > { %v1522_v35 = vmul.f32 %v2158_v23, %v2681_v47 }
 0x4e3   : > { %v1494_v28 = vld [vmem:[#allocation7] sm:$0xff]  ;;  %v1495_v0 = vld [vmem:[#allocation7 + $0x8] sm:$0xff] }
 0x4e4   : > { %v1507_v11 = vadd.f32 %v1505_v4, %v1494_v28  ;;  %v1508_v8 = vadd.f32 %v1506_v5, %v1495_v0 }
 0x4e6   : > { %v1523_v44 = vmul.f32 %v1521_v34, %v1507_v11  ;;  %v1524_v54 = vmul.f32 %v1522_v35, %v1508_v8 }
 0x4e8   : > { %v1525_v59 = vpack.c.bf16 %v1524_v54, %v1523_v44 }
 0x4ea   : > { %1921 = vmatmul.mubr.msk.bf16.vlgmr.msra.gmra.mrb[8].mxu0 %vm656_vm11, %v1525_v59 }
 0x5bd   : > { %v1595_v29 = vpop.f32.mrb[8].mxu0 }
 0x5be   : > { %v1596_v26 = vadd.f32 %v2585_v2, %v1595_v29  ;;  %v1922_v57 = vpop.f32.mrb[9].mxu0 }
 0x5bf   : > { %v1598_v43 = vpop.f32.mrb[10].mxu0 }
 0x5c0   : > { %v1824_v47 = vpack.c.bf16 %v1596_v26, %v1596_v26  ;;  %v1599_v30 = vadd.f32 %v2587_v3, %v1598_v43  ;;  %v1923_v37 = vpop.f32.mrb[11].mxu0 }
 0x5c2   : > { %1611 = vst.msk [vmem:[%s2582_s15] sm:$0xf] %vm1610_vm2, %v1824_v47  ;;  %v1825_v2 = vpack.c.bf16 %v1599_v30, %v1599_v30 }
 0x5c4   : > { %1612 = vst.msk [vmem:[%s2582_s15 + $0x4] sm:$0xf] %vm1610_vm2, %v1825_v2 }
 0x5c5   : > { %2228 = shalt.err (!%p2225_p13)
}
 0x5c6   : > { %s2229_s21 = scalar_lea.hbm %s2950_s29, 128  ;;  %s2233_s16 = scalar_lea.hbm %s3060_s20, 512 }
 0x5c7   : > { %p2230_p1 = scmp.ne.s32.totalorder %s2950_s29, %s2229_s21  ;;  %p2234_p2 = scmp.lt.u32.totalorder %s2950_s29, %s3060_s20 }
 0x5c8   : > { %p2235_p8 = scmp.lt.u32.totalorder %s2233_s16, %s2229_s21  ;;  %p2237_p12 = scmp.lt.u32.totalorder %s2229_s21, %s2950_s29 }
 0x5c9   : > { %p2231_p3 = pnand %p2230_p1, %p3061_p4 }
 0x5ca   : > { %p2236_p10 = por %p2235_p8, %p2234_p2 }
 0x5cb   : > { %p2232_p0 = pneg %p2231_p3 }
 0x5cc   : > { %p2238_p5 = por %p2237_p12, %p2236_p10 }
 0x5ce   : > { %p2239_p6 = pnand %p2238_p5, %p2232_p0 }
 0x5d0   : > { %2242 = shalt.err (!%p2239_p6)
}
 0x5d1   : > { %s2358_s30 = smov 64   ;;  %s2359_s13 = smov 4  }
 0x5d2   : > { %1933 = dma.vmem_to_hbm [thread:$0]  (%p3061_p4), %s2952_s24, 128, %s2950_s29, %s2958_s18, %s2358_s30, %s2358_s30, %s2359_s13  }
 0x5d3 PF: > { %s3062_s23 = sld [smem:[#allocation20_spill]]  ;;  %s3063_s28 = sld [smem:[#allocation17_spill]] }
 0x5d4   : > { %s3064_s19 = sld [smem:[#allocation24_spill]] }
 0x5d9   : > { %p1950_p7 = scmp.ge.s32.totalorder %s3062_s23, 2  ;;  %s1644_s15 = sand.u32 1, %s3063_s28  }
 0x5da   : > { %p3065_p9 = scmp.ne.s32.totalorder %s3064_s19, 0  ;;  %s1645_s21 = scalar_lea.sflag [#allocation10], %s1644_s15 }
 0x5dc   : > { %p1943_p11 = pnand %p1950_p7, %p3065_p9 }
 0x5de   : > { %2296 = dma.done.wait (!%p1943_p11), %s1645_s21, 128  }
 0x5df   : > { %2298 = vsyncadd (!%p1943_p11), %s1645_s21, 4294967168  ;;  %s28_s15 = sadd.s32 1, %s3062_s23   ;;  %s3066_s17 = sld [smem:[#allocation25_spill]] }
 0x5e0   : > { %p25_p13 = scmp.ge.s32.totalorder %s28_s15, 6   ;;  %s3067_s28 = sld [smem:[#allocation18_spill]] }
 0x5e1   : > { %s3068_s29 = sld [smem:[#allocation19_spill]]  ;;  %s3069_s30 = sld [smem:[#allocation21_spill]] }
 0x5e2   : > { %s3070_s14 = sld [smem:[#allocation23_spill]]  ;;  %s3071_s25 = smov %s2305_s26 }
 0x5e3   : > { %s3072_s26 = smov %s2309_s27  ;;  %27 = sbr.rel (!%p25_p13) target bundleno = 9 (0x9), region = 143 }
 0x5e5   : > { %s3073_s27 = smov %s3066_s17 }
 0x5ea   :  { %1650 = vsyncpa [#allocation9], 1 }
 0x5eb   :  { %1652 = vsyncpa [#allocation9 + $0x1], 1 }
 0x5ec   :  { %1653 = vsyncpa [#allocation12], 1 }
 0x5ed   :  { %1654 = vsyncpa [#allocation10], 1 }
 0x5ee   :  { %1656 = vsyncpa [#allocation10 + $0x1], 1 }

</bundles_post_ra>
